<compile_context>
chip_gen: v7x
topology: tpu7x:2x2x1
jax: 0.10.0
libtpu: 0.0.40
codegen_flags: <defaults>
</compile_context>

<pallas_src>
import math

import jax
import jax.numpy as jnp
from jax import lax
from jax.experimental import pallas as pl
from jax.experimental.pallas import tpu as pltpu

CONV_OUT = 512
HIDDEN = 512
SPATIAL = 4                  # forward() requires 4x4 spatial (dense expects 4*4*512)
HW = SPATIAL * SPATIAL
NEG_SLOPE = 0.2
P_POS = 8                    # spatial positions per grid step -> grid = (2,)
K_CHUNK = P_POS * CONV_OUT   # dense-1 contraction handled per grid step (4096)

assert HW % P_POS == 0


def _lrelu(x):
    return jnp.where(x >= 0, x, NEG_SLOPE * x)


def final_block_kernel(patch_ref, wc_ref, bc_ref, w1_ref, w1s_ref, b1_ref,
                       h2_ref, h_ref, acc_ref):
    q = pl.program_id(0)
    B = acc_ref.shape[0]

    # Step 0: 3x3 "same" conv for ALL 16 spatial positions as one bf16 matmul
    # (+ bias + LeakyReLU).  Scatter the result into the (B, HW*512) activation
    # scratch (lane offset p*512) so every dense-1 step below is a single
    # lane-aligned K=4096 dot instead of 8 sublane-misaligned per-position dots.
    @pl.when(q == 0)
    def _():
        acc_ref[...] = jnp.zeros_like(acc_ref)
        h = jnp.dot(patch_ref[...], wc_ref[...],
                    preferred_element_type=jnp.float32) + bc_ref[...]
        h = _lrelu(h).astype(h_ref.dtype)                 # (HW*B, 512) bf16, row = p*B + b
        for p in range(HW):                               # 16 small one-time slab writes
            h_ref[:, p * CONV_OUT:(p + 1) * CONV_OUT] = h[p * B:(p + 1) * B, :]

    # Every step: ONE (B, K_CHUNK) @ (K_CHUNK, 512) MXU dot against this step's
    # streamed int8 W1 block (Pallas double-buffers the 2 MiB DMA from HBM --
    # this stream is the wall-time cost).  int8 values are exact in bf16; the
    # per-column dequant scale is applied to the accumulator at the end.
    start = pl.multiple_of(q * K_CHUNK, K_CHUNK)
    hq = h_ref[:, pl.ds(start, K_CHUNK)]                  # (B, 4096) bf16
    w1b = w1_ref[...].astype(jnp.bfloat16)                # (4096, 512) int8 -> bf16
    acc_ref[...] += jnp.dot(hq, w1b, preferred_element_type=jnp.float32)

    # Last step: dequant scale + bias + LeakyReLU; emit lane-dense (B, 512)
    # dense-1 activations.  The tiny 512 -> out_channels dense-2 runs in XLA.
    @pl.when(q == pl.num_programs(0) - 1)
    def _():
        h2 = _lrelu(acc_ref[...] * w1s_ref[...] + b1_ref[...])
        h2_ref[...] = h2.astype(h2_ref.dtype)


def _im2col_3x3_same(x):
    """x: (B, C, H, W) -> patches (H*W*B, C*9); row = p*B + b, feature = (c, kh, kw)."""
    B, C, H, W = x.shape
    xp = jnp.pad(x, ((0, 0), (0, 0), (1, 1), (1, 1)))
    cols = [xp[:, :, kh:kh + H, kw:kw + W] for kh in range(3) for kw in range(3)]
    p = jnp.stack(cols, axis=0)                 # (9, B, C, H, W), k = kh*3+kw
    p = p.transpose(3, 4, 1, 2, 0)              # (H, W, B, C, 9)
    return p.reshape(H * W * B, C * 9)


def _quantize_rows_int8(w):
    """Per-row symmetric int8 quantization.  w: (N, K) f32 -> (int8 (N,K), f32 (N,1))."""
    amax = jnp.max(jnp.abs(w), axis=1, keepdims=True)
    scale = jnp.maximum(amax, 1e-30) / 127.0
    q = jnp.clip(jnp.round(w / scale), -127.0, 127.0).astype(jnp.int8)
    return q, scale


@jax.jit
def final_block(x, conv_w, conv_b, w1, b1, w2, b2):
    """x: (B, Cin, 4, 4); params in PyTorch layout.  Returns (B, out_channels)."""
    B, Cin, H, W = x.shape
    assert H == SPATIAL and W == SPATIAL
    out_c = w2.shape[0]
    K = Cin * 9
    Kpad = max(128, ((K + 127) // 128) * 128)       # lane-aligned K for the conv matmul

    # --- glue: parameter re-layout / quantization (no compute of interest) ---
    wc_r = conv_w.reshape(CONV_OUT, K).T.astype(jnp.float32)            # (K, 512)
    wc_r = jnp.pad(wc_r, ((0, Kpad - K), (0, 0))).astype(jnp.bfloat16)  # (Kpad, 512) bf16
    bc_r = conv_b.reshape(1, CONV_OUT).astype(jnp.float32)

    # Dense-1 (LinearEqualized, gain=sqrt(2)): runtime scale, then per-output-
    # column int8 quantization.  PyTorch's (c,h,w) flatten order is absorbed by
    # re-indexing the weight to (p*512 + c, n) so it matches the kernel's
    # (B, HW*512) activation layout.
    s1 = math.sqrt(2.0) / math.sqrt(HW * CONV_OUT)
    w1f = w1.astype(jnp.float32) * s1                                   # (512, 8192), col = c*HW+p
    w1q, w1scale = _quantize_rows_int8(w1f)                             # per dense-1 output
    w1q_r = (w1q.reshape(HIDDEN, CONV_OUT, HW)
                 .transpose(2, 1, 0)                                    # (p, c, n)
                 .reshape(HW * CONV_OUT, HIDDEN))                       # (8192, 512) int8
    w1s_r = w1scale.reshape(1, HIDDEN).astype(jnp.float32)
    b1_r = b1.reshape(1, HIDDEN).astype(jnp.float32)

    # im2col patches, pre-flattened to (HW*B, Kpad), row index = p*B + b, bf16.
    patches = _im2col_3x3_same(x.astype(jnp.float32))                   # (HW*B, K)
    patches = jnp.pad(patches, ((0, 0), (0, Kpad - K))).astype(jnp.bfloat16)

    grid = (HW // P_POS,)
    grid_spec = pltpu.PrefetchScalarGridSpec(
        num_scalar_prefetch=0,
        grid=grid,
        in_specs=[
            pl.BlockSpec((HW * B, Kpad), lambda q: (0, 0)),             # patches (full)
            pl.BlockSpec((Kpad, CONV_OUT), lambda q: (0, 0)),           # conv weight (bf16)
            pl.BlockSpec((1, CONV_OUT), lambda q: (0, 0)),              # conv bias
            pl.BlockSpec((K_CHUNK, HIDDEN), lambda q: (q, 0)),          # int8 W1 block (streamed)
            pl.BlockSpec((1, HIDDEN), lambda q: (0, 0)),                # int8 dequant scale
            pl.BlockSpec((1, HIDDEN), lambda q: (0, 0)),                # dense-1 bias
        ],
        out_specs=pl.BlockSpec((B, HIDDEN), lambda q: (0, 0)),
        scratch_shapes=[
            pltpu.VMEM((B, HW * CONV_OUT), jnp.bfloat16),  # conv activations, (B, 8192)
            pltpu.VMEM((B, HIDDEN), jnp.float32),          # dense-1 f32 accumulator
        ],
    )

    h2 = pl.pallas_call(
        final_block_kernel,
        out_shape=jax.ShapeDtypeStruct((B, HIDDEN), jnp.float32),
        grid_spec=grid_spec,
        compiler_params=pltpu.CompilerParams(
            dimension_semantics=("arbitrary",),            # grid axis is a K reduction
            vmem_limit_bytes=32 * 1024 * 1024),
    )(patches, wc_r, bc_r, w1q_r, w1s_r, b1_r)

    # Dense-2 (LinearEqualized, gain=1.0): tiny (B,512)@(512,out_c) epilogue in XLA,
    # keeping the kernel output lane-dense (review: avoid lane-width-1 blocks).
    s2 = 1.0 / math.sqrt(HIDDEN)
    w2_r = (w2.astype(jnp.float32) * s2).T                              # (512, out_c)
    return jnp.dot(h2, w2_r, precision=lax.Precision.HIGHEST) + b2.astype(jnp.float32)


def final_block_reference(x, conv_w, conv_b, w1, b1, w2, b2, *, quantized=False):
    """Pure-JAX reference mirroring the PyTorch forward.  With quantized=True it
    applies the same bf16 (conv operands / activations) and per-row int8
    (dense-1 weight) quantization as the kernel, for a tight numerical check."""
    f32 = jnp.float32
    xq, cw = x.astype(f32), conv_w.astype(f32)
    if quantized:
        xq = xq.astype(jnp.bfloat16).astype(f32)
        cw = cw.astype(jnp.bfloat16).astype(f32)
    y = lax.conv_general_dilated(
        xq, cw, window_strides=(1, 1), padding="SAME",
        dimension_numbers=("NCHW", "OIHW", "NCHW"),
        precision=lax.Precision.HIGHEST)
    y = _lrelu(y + conv_b.reshape(1, -1, 1, 1).astype(f32))
    y = y.reshape(x.shape[0], -1)                       # (B, 512*4*4), (c,h,w) order
    if quantized:
        y = y.astype(jnp.bfloat16).astype(f32)
    s1 = math.sqrt(2.0) / math.sqrt(y.shape[1])
    w1s = w1.astype(f32) * s1
    if quantized:
        q, sc = _quantize_rows_int8(w1s)
        w1s = q.astype(f32) * sc
    h = _lrelu(jnp.dot(y, w1s.T, precision=lax.Precision.HIGHEST) + b1.astype(f32))
    s2 = 1.0 / math.sqrt(HIDDEN)
    return jnp.dot(h, (w2.astype(f32) * s2).T,
                   precision=lax.Precision.HIGHEST) + b2.astype(f32)


if __name__ == "__main__":
    # B=8: feeds the MXU 8 rows per pass of the W1 stream (review item #5), still small.
    B, Cin, out_channels = 8, 4, 1

    key = jax.random.PRNGKey(0)
    kx, kcw, kcb, k1w, k1b, k2w, k2b = jax.random.split(key, 7)

    x = jax.random.normal(kx, (B, Cin, SPATIAL, SPATIAL), jnp.float32)
    conv_w = 0.1 * jax.random.normal(kcw, (CONV_OUT, Cin, 3, 3), jnp.float32)
    conv_b = 0.1 * jax.random.normal(kcb, (CONV_OUT,), jnp.float32)
    w1 = jax.random.normal(k1w, (HIDDEN, HW * CONV_OUT), jnp.float32)
    b1 = 0.1 * jax.random.normal(k1b, (HIDDEN,), jnp.float32)
    w2 = jax.random.normal(k2w, (out_channels, HIDDEN), jnp.float32)
    b2 = 0.1 * jax.random.normal(k2b, (out_channels,), jnp.float32)

    out = jax.block_until_ready(final_block(x, conv_w, conv_b, w1, b1, w2, b2))
    assert out.shape == (B, out_channels), out.shape

    # Tight check vs. a reference that applies the SAME quantization (bf16 conv
    # operands / activations, per-row int8 dense-1 weights).
    ref_q = jax.block_until_ready(
        final_block_reference(x, conv_w, conv_b, w1, b1, w2, b2, quantized=True))
    assert jnp.allclose(out, ref_q, rtol=5e-3, atol=5e-3), \
        float(jnp.max(jnp.abs(out - ref_q)))

    # Loose check vs. the exact f32 PyTorch-faithful forward (int8 W1 storage and
    # bf16 conv/activations are the only approximations).
    ref_f32 = jax.block_until_ready(
        final_block_reference(x, conv_w, conv_b, w1, b1, w2, b2))
    assert jnp.allclose(out, ref_f32, rtol=5e-2, atol=5e-2), \
        float(jnp.max(jnp.abs(out - ref_f32)))

    print("KERNEL_OK")
</pallas_src>

<mosaic_0001>
module attributes {stable_mosaic.version = 11 : i64} {
  func.func @final_block_kernel(%arg0: i32, %arg1: memref<128x128xbf16, #tpu.memory_space<vmem>>, %arg2: memref<128x512xbf16, #tpu.memory_space<vmem>>, %arg3: memref<1x512xf32, #tpu.memory_space<vmem>>, %arg4: memref<4096x512xi8, #tpu.memory_space<vmem>>, %arg5: memref<1x512xf32, #tpu.memory_space<vmem>>, %arg6: memref<1x512xf32, #tpu.memory_space<vmem>>, %arg7: memref<8x512xf32, #tpu.memory_space<vmem>>, %arg8: memref<8x8192xbf16, #tpu.memory_space<vmem>>, %arg9: memref<8x512xf32, #tpu.memory_space<vmem>>) attributes {dimension_semantics = [#tpu.dimension_semantics<arbitrary>], iteration_bounds = array<i64: 2>, scalar_prefetch = 0 : i64, scratch_operands = 2 : i64, tpu.core_type = #tpu.core_type<tc>, window_params = [{pipeline_mode = #tpu.pipeline_mode<synchronous>, transform_indices = @transform_0, window_bounds = array<i64: 128, 128>}, {pipeline_mode = #tpu.pipeline_mode<synchronous>, transform_indices = @transform_1, window_bounds = array<i64: 128, 512>}, {pipeline_mode = #tpu.pipeline_mode<synchronous>, transform_indices = @transform_2, window_bounds = array<i64: 1, 512>}, {transform_indices = @transform_3, window_bounds = array<i64: 4096, 512>}, {pipeline_mode = #tpu.pipeline_mode<synchronous>, transform_indices = @transform_4, window_bounds = array<i64: 1, 512>}, {pipeline_mode = #tpu.pipeline_mode<synchronous>, transform_indices = @transform_5, window_bounds = array<i64: 1, 512>}, {pipeline_mode = #tpu.pipeline_mode<synchronous>, transform_indices = @transform_6, window_bounds = array<i64: 8, 512>}]} {
    %c0_i32 = arith.constant 0 : i32
    %0 = arith.cmpi eq, %arg0, %c0_i32 : i32
    %1 = arith.extui %0 : i1 to i32
    %c0_i32_0 = arith.constant 0 : i32
    %2 = arith.cmpi ne, %1, %c0_i32_0 : i32
    scf.if %2 {
      %cst_8 = arith.constant 0.000000e+00 : f32
      %16 = vector.broadcast %cst_8 : f32 to vector<8x512xf32>
      %c0_9 = arith.constant 0 : index
      %c0_10 = arith.constant 0 : index
      %17 = vector.load %arg9[%c0_9, %c0_10] : memref<8x512xf32, #tpu.memory_space<vmem>>, vector<8x512xf32>
      tpu.vector_store %arg9[%c0_9, %c0_10], %16 {strides = array<i32>} : memref<8x512xf32, #tpu.memory_space<vmem>>, vector<8x512xf32>,
      %c0_11 = arith.constant 0 : index
      %c0_12 = arith.constant 0 : index
      %18 = vector.load %arg1[%c0_11, %c0_12] : memref<128x128xbf16, #tpu.memory_space<vmem>>, vector<128x128xbf16>
      %c0_13 = arith.constant 0 : index
      %c0_14 = arith.constant 0 : index
      %19 = vector.load %arg2[%c0_13, %c0_14] : memref<128x512xbf16, #tpu.memory_space<vmem>>, vector<128x512xbf16>
      %cst_15 = arith.constant dense<0.000000e+00> : vector<128x512xf32>
      %20 = tpu.matmul %18, %19, %cst_15 {dimension_numbers = #tpu.dot_dimension_numbers<[1], [0], [0], [1], [0, 0, 1, 1], [], []>} : vector<128x128xbf16>, vector<128x512xbf16>, vector<128x512xf32> -> vector<128x512xf32>
      %c0_16 = arith.constant 0 : index
      %c0_17 = arith.constant 0 : index
      %21 = vector.load %arg3[%c0_16, %c0_17] : memref<1x512xf32, #tpu.memory_space<vmem>>, vector<1x512xf32>
      %22 = vector.broadcast %21 : vector<1x512xf32> to vector<128x512xf32>
      %23 = arith.addf %20, %22 : vector<128x512xf32>
      %cst_18 = arith.constant 0.000000e+00 : f32
      %24 = vector.broadcast %cst_18 : f32 to vector<128x512xf32>
      %25 = arith.cmpf oge, %23, %24 : vector<128x512xf32>
      %cst_19 = arith.constant 2.000000e-01 : f32
      %26 = vector.broadcast %cst_19 : f32 to vector<128x512xf32>
      %27 = arith.mulf %26, %23 : vector<128x512xf32>
      %28 = arith.select %25, %23, %27 : vector<128x512xi1>, vector<128x512xf32>
      %29 = arith.truncf %28 : vector<128x512xf32> to vector<128x512xbf16>
      %30 = vector.extract_strided_slice %29 {offsets = [0, 0], sizes = [8, 512], strides = [1, 1]} : vector<128x512xbf16> to vector<8x512xbf16>
      %c0_20 = arith.constant 0 : index
      %c0_21 = arith.constant 0 : index
      %31 = vector.load %arg8[%c0_20, %c0_21] : memref<8x8192xbf16, #tpu.memory_space<vmem>>, vector<8x512xbf16>
      tpu.vector_store %arg8[%c0_20, %c0_21], %30 {strides = array<i32>} : memref<8x8192xbf16, #tpu.memory_space<vmem>>, vector<8x512xbf16>,
      %32 = vector.extract_strided_slice %29 {offsets = [8, 0], sizes = [8, 512], strides = [1, 1]} : vector<128x512xbf16> to vector<8x512xbf16>
      %c0_22 = arith.constant 0 : index
      %c512 = arith.constant 512 : index
      %33 = vector.load %arg8[%c0_22, %c512] : memref<8x8192xbf16, #tpu.memory_space<vmem>>, vector<8x512xbf16>
      tpu.vector_store %arg8[%c0_22, %c512], %32 {strides = array<i32>} : memref<8x8192xbf16, #tpu.memory_space<vmem>>, vector<8x512xbf16>,
      %34 = vector.extract_strided_slice %29 {offsets = [16, 0], sizes = [8, 512], strides = [1, 1]} : vector<128x512xbf16> to vector<8x512xbf16>
      %c0_23 = arith.constant 0 : index
      %c1024 = arith.constant 1024 : index
      %35 = vector.load %arg8[%c0_23, %c1024] : memref<8x8192xbf16, #tpu.memory_space<vmem>>, vector<8x512xbf16>
      tpu.vector_store %arg8[%c0_23, %c1024], %34 {strides = array<i32>} : memref<8x8192xbf16, #tpu.memory_space<vmem>>, vector<8x512xbf16>,
      %36 = vector.extract_strided_slice %29 {offsets = [24, 0], sizes = [8, 512], strides = [1, 1]} : vector<128x512xbf16> to vector<8x512xbf16>
      %c0_24 = arith.constant 0 : index
      %c1536 = arith.constant 1536 : index
      %37 = vector.load %arg8[%c0_24, %c1536] : memref<8x8192xbf16, #tpu.memory_space<vmem>>, vector<8x512xbf16>
      tpu.vector_store %arg8[%c0_24, %c1536], %36 {strides = array<i32>} : memref<8x8192xbf16, #tpu.memory_space<vmem>>, vector<8x512xbf16>,
      %38 = vector.extract_strided_slice %29 {offsets = [32, 0], sizes = [8, 512], strides = [1, 1]} : vector<128x512xbf16> to vector<8x512xbf16>
      %c0_25 = arith.constant 0 : index
      %c2048 = arith.constant 2048 : index
      %39 = vector.load %arg8[%c0_25, %c2048] : memref<8x8192xbf16, #tpu.memory_space<vmem>>, vector<8x512xbf16>
      tpu.vector_store %arg8[%c0_25, %c2048], %38 {strides = array<i32>} : memref<8x8192xbf16, #tpu.memory_space<vmem>>, vector<8x512xbf16>,
      %40 = vector.extract_strided_slice %29 {offsets = [40, 0], sizes = [8, 512], strides = [1, 1]} : vector<128x512xbf16> to vector<8x512xbf16>
      %c0_26 = arith.constant 0 : index
      %c2560 = arith.constant 2560 : index
      %41 = vector.load %arg8[%c0_26, %c2560] : memref<8x8192xbf16, #tpu.memory_space<vmem>>, vector<8x512xbf16>
      tpu.vector_store %arg8[%c0_26, %c2560], %40 {strides = array<i32>} : memref<8x8192xbf16, #tpu.memory_space<vmem>>, vector<8x512xbf16>,
      %42 = vector.extract_strided_slice %29 {offsets = [48, 0], sizes = [8, 512], strides = [1, 1]} : vector<128x512xbf16> to vector<8x512xbf16>
      %c0_27 = arith.constant 0 : index
      %c3072 = arith.constant 3072 : index
      %43 = vector.load %arg8[%c0_27, %c3072] : memref<8x8192xbf16, #tpu.memory_space<vmem>>, vector<8x512xbf16>
      tpu.vector_store %arg8[%c0_27, %c3072], %42 {strides = array<i32>} : memref<8x8192xbf16, #tpu.memory_space<vmem>>, vector<8x512xbf16>,
      %44 = vector.extract_strided_slice %29 {offsets = [56, 0], sizes = [8, 512], strides = [1, 1]} : vector<128x512xbf16> to vector<8x512xbf16>
      %c0_28 = arith.constant 0 : index
      %c3584 = arith.constant 3584 : index
      %45 = vector.load %arg8[%c0_28, %c3584] : memref<8x8192xbf16, #tpu.memory_space<vmem>>, vector<8x512xbf16>
      tpu.vector_store %arg8[%c0_28, %c3584], %44 {strides = array<i32>} : memref<8x8192xbf16, #tpu.memory_space<vmem>>, vector<8x512xbf16>,
      %46 = vector.extract_strided_slice %29 {offsets = [64, 0], sizes = [8, 512], strides = [1, 1]} : vector<128x512xbf16> to vector<8x512xbf16>
      %c0_29 = arith.constant 0 : index
      %c4096 = arith.constant 4096 : index
      %47 = vector.load %arg8[%c0_29, %c4096] : memref<8x8192xbf16, #tpu.memory_space<vmem>>, vector<8x512xbf16>
      tpu.vector_store %arg8[%c0_29, %c4096], %46 {strides = array<i32>} : memref<8x8192xbf16, #tpu.memory_space<vmem>>, vector<8x512xbf16>,
      %48 = vector.extract_strided_slice %29 {offsets = [72, 0], sizes = [8, 512], strides = [1, 1]} : vector<128x512xbf16> to vector<8x512xbf16>
      %c0_30 = arith.constant 0 : index
      %c4608 = arith.constant 4608 : index
      %49 = vector.load %arg8[%c0_30, %c4608] : memref<8x8192xbf16, #tpu.memory_space<vmem>>, vector<8x512xbf16>
      tpu.vector_store %arg8[%c0_30, %c4608], %48 {strides = array<i32>} : memref<8x8192xbf16, #tpu.memory_space<vmem>>, vector<8x512xbf16>,
      %50 = vector.extract_strided_slice %29 {offsets = [80, 0], sizes = [8, 512], strides = [1, 1]} : vector<128x512xbf16> to vector<8x512xbf16>
      %c0_31 = arith.constant 0 : index
      %c5120 = arith.constant 5120 : index
      %51 = vector.load %arg8[%c0_31, %c5120] : memref<8x8192xbf16, #tpu.memory_space<vmem>>, vector<8x512xbf16>
      tpu.vector_store %arg8[%c0_31, %c5120], %50 {strides = array<i32>} : memref<8x8192xbf16, #tpu.memory_space<vmem>>, vector<8x512xbf16>,
      %52 = vector.extract_strided_slice %29 {offsets = [88, 0], sizes = [8, 512], strides = [1, 1]} : vector<128x512xbf16> to vector<8x512xbf16>
      %c0_32 = arith.constant 0 : index
      %c5632 = arith.constant 5632 : index
      %53 = vector.load %arg8[%c0_32, %c5632] : memref<8x8192xbf16, #tpu.memory_space<vmem>>, vector<8x512xbf16>
      tpu.vector_store %arg8[%c0_32, %c5632], %52 {strides = array<i32>} : memref<8x8192xbf16, #tpu.memory_space<vmem>>, vector<8x512xbf16>,
      %54 = vector.extract_strided_slice %29 {offsets = [96, 0], sizes = [8, 512], strides = [1, 1]} : vector<128x512xbf16> to vector<8x512xbf16>
      %c0_33 = arith.constant 0 : index
      %c6144 = arith.constant 6144 : index
      %55 = vector.load %arg8[%c0_33, %c6144] : memref<8x8192xbf16, #tpu.memory_space<vmem>>, vector<8x512xbf16>
      tpu.vector_store %arg8[%c0_33, %c6144], %54 {strides = array<i32>} : memref<8x8192xbf16, #tpu.memory_space<vmem>>, vector<8x512xbf16>,
      %56 = vector.extract_strided_slice %29 {offsets = [104, 0], sizes = [8, 512], strides = [1, 1]} : vector<128x512xbf16> to vector<8x512xbf16>
      %c0_34 = arith.constant 0 : index
      %c6656 = arith.constant 6656 : index
      %57 = vector.load %arg8[%c0_34, %c6656] : memref<8x8192xbf16, #tpu.memory_space<vmem>>, vector<8x512xbf16>
      tpu.vector_store %arg8[%c0_34, %c6656], %56 {strides = array<i32>} : memref<8x8192xbf16, #tpu.memory_space<vmem>>, vector<8x512xbf16>,
      %58 = vector.extract_strided_slice %29 {offsets = [112, 0], sizes = [8, 512], strides = [1, 1]} : vector<128x512xbf16> to vector<8x512xbf16>
      %c0_35 = arith.constant 0 : index
      %c7168 = arith.constant 7168 : index
      %59 = vector.load %arg8[%c0_35, %c7168] : memref<8x8192xbf16, #tpu.memory_space<vmem>>, vector<8x512xbf16>
      tpu.vector_store %arg8[%c0_35, %c7168], %58 {strides = array<i32>} : memref<8x8192xbf16, #tpu.memory_space<vmem>>, vector<8x512xbf16>,
      %60 = vector.extract_strided_slice %29 {offsets = [120, 0], sizes = [8, 512], strides = [1, 1]} : vector<128x512xbf16> to vector<8x512xbf16>
      %c0_36 = arith.constant 0 : index
      %c7680 = arith.constant 7680 : index
      %61 = vector.load %arg8[%c0_36, %c7680] : memref<8x8192xbf16, #tpu.memory_space<vmem>>, vector<8x512xbf16>
      tpu.vector_store %arg8[%c0_36, %c7680], %60 {strides = array<i32>} : memref<8x8192xbf16, #tpu.memory_space<vmem>>, vector<8x512xbf16>,
    } else {
    }
    %c4096_i32 = arith.constant 4096 : i32
    %3 = arith.muli %arg0, %c4096_i32 : i32
    %4 = tpu.assume_multiple %3, 4096 : i32
    %c0 = arith.constant 0 : index
    %5 = arith.index_cast %4 : i32 to index
    %6 = vector.load %arg8[%c0, %5] : memref<8x8192xbf16, #tpu.memory_space<vmem>>, vector<8x4096xbf16>
    %c0_1 = arith.constant 0 : index
    %c0_2 = arith.constant 0 : index
    %7 = vector.load %arg4[%c0_1, %c0_2] : memref<4096x512xi8, #tpu.memory_space<vmem>>, vector<4096x512xi8>
    %8 = arith.sitofp %7 : vector<4096x512xi8> to vector<4096x512xbf16>
    %c0_3 = arith.constant 0 : index
    %c0_4 = arith.constant 0 : index
    %9 = vector.load %arg9[%c0_3, %c0_4] : memref<8x512xf32, #tpu.memory_space<vmem>>, vector<8x512xf32>
    %cst = arith.constant dense<0.000000e+00> : vector<8x512xf32>
    %10 = tpu.matmul %6, %8, %cst {dimension_numbers = #tpu.dot_dimension_numbers<[1], [0], [0], [1], [0, 0, 1, 1], [], []>} : vector<8x4096xbf16>, vector<4096x512xbf16>, vector<8x512xf32> -> vector<8x512xf32>
    %11 = arith.addf %9, %10 : vector<8x512xf32>
    %c0_5 = arith.constant 0 : index
    %c0_6 = arith.constant 0 : index
    %12 = vector.load %arg9[%c0_5, %c0_6] : memref<8x512xf32, #tpu.memory_space<vmem>>, vector<8x512xf32>
    tpu.vector_store %arg9[%c0_5, %c0_6], %11 {strides = array<i32>} : memref<8x512xf32, #tpu.memory_space<vmem>>, vector<8x512xf32>,
    %c1_i32 = arith.constant 1 : i32
    %13 = arith.cmpi eq, %arg0, %c1_i32 : i32
    %14 = arith.extui %13 : i1 to i32
    %c0_i32_7 = arith.constant 0 : i32
    %15 = arith.cmpi ne, %14, %c0_i32_7 : i32
    scf.if %15 {
      %c0_8 = arith.constant 0 : index
      %c0_9 = arith.constant 0 : index
      %16 = vector.load %arg9[%c0_8, %c0_9] : memref<8x512xf32, #tpu.memory_space<vmem>>, vector<8x512xf32>
      %c0_10 = arith.constant 0 : index
      %c0_11 = arith.constant 0 : index
      %17 = vector.load %arg5[%c0_10, %c0_11] : memref<1x512xf32, #tpu.memory_space<vmem>>, vector<1x512xf32>
      %18 = vector.broadcast %17 : vector<1x512xf32> to vector<8x512xf32>
      %19 = arith.mulf %16, %18 : vector<8x512xf32>
      %c0_12 = arith.constant 0 : index
      %c0_13 = arith.constant 0 : index
      %20 = vector.load %arg6[%c0_12, %c0_13] : memref<1x512xf32, #tpu.memory_space<vmem>>, vector<1x512xf32>
      %21 = vector.broadcast %20 : vector<1x512xf32> to vector<8x512xf32>
      %22 = arith.addf %19, %21 : vector<8x512xf32>
      %cst_14 = arith.constant 0.000000e+00 : f32
      %23 = vector.broadcast %cst_14 : f32 to vector<8x512xf32>
      %24 = arith.cmpf oge, %22, %23 : vector<8x512xf32>
      %cst_15 = arith.constant 2.000000e-01 : f32
      %25 = vector.broadcast %cst_15 : f32 to vector<8x512xf32>
      %26 = arith.mulf %25, %22 : vector<8x512xf32>
      %27 = arith.select %24, %22, %26 : vector<8x512xi1>, vector<8x512xf32>
      %c0_16 = arith.constant 0 : index
      %c0_17 = arith.constant 0 : index
      %28 = vector.load %arg7[%c0_16, %c0_17] : memref<8x512xf32, #tpu.memory_space<vmem>>, vector<8x512xf32>
      tpu.vector_store %arg7[%c0_16, %c0_17], %27 {strides = array<i32>} : memref<8x512xf32, #tpu.memory_space<vmem>>, vector<8x512xf32>,
    } else {
    }
    return
  }
  func.func @transform_0(%arg0: i32) -> (i32, i32) {
    %c0_i32 = arith.constant 0 : i32
    %c0_i32_0 = arith.constant 0 : i32
    %c0_i32_1 = arith.constant 0 : i32
    return %c0_i32, %c0_i32_0 : i32, i32
  }
  func.func @transform_1(%arg0: i32) -> (i32, i32) {
    %c0_i32 = arith.constant 0 : i32
    %c0_i32_0 = arith.constant 0 : i32
    %c0_i32_1 = arith.constant 0 : i32
    return %c0_i32, %c0_i32_0 : i32, i32
  }
  func.func @transform_2(%arg0: i32) -> (i32, i32) {
    %c0_i32 = arith.constant 0 : i32
    %c0_i32_0 = arith.constant 0 : i32
    %c0_i32_1 = arith.constant 0 : i32
    return %c0_i32, %c0_i32_0 : i32, i32
  }
  func.func @transform_3(%arg0: i32) -> (i32, i32) {
    %c0_i32 = arith.constant 0 : i32
    %c0_i32_0 = arith.constant 0 : i32
    return %arg0, %c0_i32 : i32, i32
  }
  func.func @transform_4(%arg0: i32) -> (i32, i32) {
    %c0_i32 = arith.constant 0 : i32
    %c0_i32_0 = arith.constant 0 : i32
    %c0_i32_1 = arith.constant 0 : i32
    return %c0_i32, %c0_i32_0 : i32, i32
  }
  func.func @transform_5(%arg0: i32) -> (i32, i32) {
    %c0_i32 = arith.constant 0 : i32
    %c0_i32_0 = arith.constant 0 : i32
    %c0_i32_1 = arith.constant 0 : i32
    return %c0_i32, %c0_i32_0 : i32, i32
  }
  func.func @transform_6(%arg0: i32) -> (i32, i32) {
    %c0_i32 = arith.constant 0 : i32
    %c0_i32_0 = arith.constant 0 : i32
    %c0_i32_1 = arith.constant 0 : i32
    return %c0_i32, %c0_i32_0 : i32, i32
  }
}

</mosaic_0001>

<bundles_post_ra>
// kernel: final_block.1
= control target key start
LH: loop header
LB: loop body
LE: loop exit
PB: predicated region body
PF: predicated region fallthrough
CT: control target
= control target key end

     0   :  { %s4563_s21 = smov 0   ;;  %s5638_s0 = inlined_call_operand.vmem [shape: bf16[128,128], index: 0, kind: input, shape index: {}]   ;;  %s5639_s1 = inlined_call_operand.vmem [shape: bf16[128,512], index: 1, kind: input, shape index: {}]   ;;  %s5640_s2 = inlined_call_operand.vmem [shape: f32[1,512], index: 2, kind: input, shape index: {}]   ;;  %s5641_s3 = inlined_call_operand.vmem [shape: s8[8192,512], index: 3, kind: input, shape index: {}]   ;;  %s5642_s4 = inlined_call_operand.vmem [shape: f32[1,512], index: 4, kind: input, shape index: {}]   ;;  %s5643_s5 = inlined_call_operand.vmem [shape: f32[1,512], index: 5, kind: input, shape index: {}]   ;;  %s5644_s6 = inlined_call_operand.vmem [shape: f32[8,512], index: 6, kind: output, shape index: {}]  }
   0x1 LB: > { %s4569_s22 = sadd.s32 4294967295, %s4524_s21   ;;  %p4273_p0 = scmp.ge.s32.totalorder %s4524_s21, 1  ;;  %s4524_s21 = sphi %s4563_s21, %s16_s21  }
   0x2   : > { %p209_p1 = scmp.lt.s32.totalorder %s4524_s21, 3 }
   0x4   : > { %p210_p2 = pnand %p4273_p0, %p209_p1 }
   0x5   : > { %s4274_s23 = sshll.u32 (!%p210_p2), %s4569_s22, 7  ;;  %p4277_p4 = scmp.ne.s32.totalorder (!%p210_p2), %s4569_s22, 0 }
   0x6   : > { %213 = sbr.rel (%p210_p2) target bundleno = 1600 (0x640), region = 44  ;;  %p236_p3 = scmp.lt.s32.totalorder (!%p210_p2), %s4274_s23, 255 }
   0xd   : > { %s5646_s23 = smov (!%p236_p3, %s4274_s23), 255  ;;  %246 = sbr.rel (%p4277_p4) target bundleno = 338 (0x152), region = 48 }
   0xe   : > { %s4387_s24 = sshll.u32 %s5646_s23, 5  ;;  %v4430_v0 = vld [vmem:[%s5639_s1 + $0x4] ss:$16 sps:$4 sm:$0xff] (!%p4277_p4)   ;;  %v4526_v1 = vmov (!%p4277_p4), 0.0   ;;  %v4432_v2 = vld [vmem:[%s5639_s1 + $0xc] ss:$16 sps:$4 sm:$0xff] (!%p4277_p4)   ;;  %v301_v42 = vlaneseq (!%p4277_p4) }
   0xf   : > { %s4577_s27 = scalar_lea.vmem %s5641_s3, %s4387_s24  ;;  %247 = vst [vmem:[#allocation3] sm:$0xff] (!%p4277_p4), %v4526_v1  ;;  %248 = vst [vmem:[#allocation3 + $0x8] sm:$0xff] (!%p4277_p4), %v4526_v1  ;;  %v4527_v3 = vmov (!%p4277_p4), 0   ;;  %529 = vmatprep.subr.bf16.mxu0 (!%p4277_p4), %v4430_v0  ;;  %v4434_v4 = vld [vmem:[%s5639_s1] ss:$16 sps:$4 sm:$0xff] (!%p4277_p4)   ;;  %642 = vmatprep.subr.bf16.mxu1 (!%p4277_p4), %v4432_v2  ;;  %v4479_v35 = vld [vmem:[%s5638_s0 + $0x8] sm:$0xff] (!%p4277_p4)  }
  0x10   : > { %249 = vst [vmem:[#allocation3 + $0x10] sm:$0xff] (!%p4277_p4), %v4526_v1  ;;  %250 = vst [vmem:[#allocation3 + $0x18] sm:$0xff] (!%p4277_p4), %v4526_v1  ;;  %561 = vmatprep.mubr.bf16.mxu0 (!%p4277_p4), %v4527_v3  ;;  %674 = vmatprep.mubr.bf16.mxu1 (!%p4277_p4), %v4527_v3  ;;  %v4435_v5 = vld [vmem:[%s5639_s1 + $0x8] ss:$16 sps:$4 sm:$0xff] (!%p4277_p4)   ;;  %v4436_v6 = vld [vmem:[%s5639_s1 + $0x24] ss:$16 sps:$4 sm:$0xff] (!%p4277_p4)  }
  0x11   : > { %530 = vmatpush1.bf16.msra.mxu0 (!%p4277_p4), %v4434_v4  ;;  %643 = vmatpush1.bf16.msra.mxu1 (!%p4277_p4), %v4435_v5  ;;  %v4438_v7 = vld [vmem:[%s5639_s1 + $0x2c] ss:$16 sps:$4 sm:$0xff] (!%p4277_p4)   ;;  %v4440_v8 = vld [vmem:[%s5639_s1 + $0x20] ss:$16 sps:$4 sm:$0xff] (!%p4277_p4)   ;;  %v4441_v9 = vld [vmem:[%s5639_s1 + $0x28] ss:$16 sps:$4 sm:$0xff] (!%p4277_p4)  }
  0x12   : > { %531 = vmatprep.subr.bf16.mxu0 (!%p4277_p4), %v4436_v6  ;;  %644 = vmatprep.subr.bf16.mxu1 (!%p4277_p4), %v4438_v7  ;;  %v4442_v10 = vld [vmem:[%s5639_s1 + $0x44] ss:$16 sps:$4 sm:$0xff] (!%p4277_p4)   ;;  %v4444_v11 = vld [vmem:[%s5639_s1 + $0x4c] ss:$16 sps:$4 sm:$0xff] (!%p4277_p4)   ;;  %v4446_v12 = vld [vmem:[%s5639_s1 + $0x40] ss:$16 sps:$4 sm:$0xff] (!%p4277_p4)  }
  0x13   : > { %v4447_v13 = vld [vmem:[%s5639_s1 + $0x48] ss:$16 sps:$4 sm:$0xff] (!%p4277_p4)   ;;  %v4448_v14 = vld [vmem:[%s5639_s1 + $0x64] ss:$16 sps:$4 sm:$0xff] (!%p4277_p4)   ;;  %v4450_v15 = vld [vmem:[%s5639_s1 + $0x6c] ss:$16 sps:$4 sm:$0xff] (!%p4277_p4)  }
  0x14   : > { %v4452_v16 = vld [vmem:[%s5639_s1 + $0x60] ss:$16 sps:$4 sm:$0xff]   ;;  %v4453_v17 = vld [vmem:[%s5639_s1 + $0x68] ss:$16 sps:$4 sm:$0xff]   ;;  %v4454_v18 = vld [vmem:[%s5639_s1 + $0x84] ss:$16 sps:$4 sm:$0xff]  }
  0x15   : > { %532 = vmatpush1.bf16.msra.mxu0 %v4440_v8  ;;  %645 = vmatpush1.bf16.msra.mxu1 %v4441_v9  ;;  %v4456_v19 = vld [vmem:[%s5639_s1 + $0x8c] ss:$16 sps:$4 sm:$0xff]   ;;  %v4458_v20 = vld [vmem:[%s5639_s1 + $0x80] ss:$16 sps:$4 sm:$0xff]   ;;  %v4459_v21 = vld [vmem:[%s5639_s1 + $0x88] ss:$16 sps:$4 sm:$0xff]  }
  0x16   : > { %533 = vmatprep.subr.bf16.mxu0 %v4442_v10  ;;  %646 = vmatprep.subr.bf16.mxu1 %v4444_v11  ;;  %v4460_v22 = vld [vmem:[%s5639_s1 + $0xa4] ss:$16 sps:$4 sm:$0xff]   ;;  %v4462_v23 = vld [vmem:[%s5639_s1 + $0xac] ss:$16 sps:$4 sm:$0xff]   ;;  %v4464_v24 = vld [vmem:[%s5639_s1 + $0xa0] ss:$16 sps:$4 sm:$0xff]  }
  0x17   : > { %v4465_v25 = vld [vmem:[%s5639_s1 + $0xa8] ss:$16 sps:$4 sm:$0xff]   ;;  %v4466_v26 = vld [vmem:[%s5639_s1 + $0xc4] ss:$16 sps:$4 sm:$0xff]   ;;  %v4468_v27 = vld [vmem:[%s5639_s1 + $0xcc] ss:$16 sps:$4 sm:$0xff]  }
  0x18   : > { %v4470_v28 = vld [vmem:[%s5639_s1 + $0xc0] ss:$16 sps:$4 sm:$0xff]   ;;  %v4471_v29 = vld [vmem:[%s5639_s1 + $0xc8] ss:$16 sps:$4 sm:$0xff]   ;;  %v4472_v30 = vld [vmem:[%s5639_s1 + $0xe4] ss:$16 sps:$4 sm:$0xff]  }
  0x19   : > { %534 = vmatpush1.bf16.msra.mxu0 %v4446_v12  ;;  %647 = vmatpush1.bf16.msra.mxu1 %v4447_v13  ;;  %v4474_v31 = vld [vmem:[%s5639_s1 + $0xec] ss:$16 sps:$4 sm:$0xff]   ;;  %v4476_v32 = vld [vmem:[%s5639_s1 + $0xe0] ss:$16 sps:$4 sm:$0xff]   ;;  %v4477_v33 = vld [vmem:[%s5639_s1 + $0xe8] ss:$16 sps:$4 sm:$0xff]  }
  0x1a   : > { %535 = vmatprep.subr.bf16.mxu0 %v4448_v14  ;;  %648 = vmatprep.subr.bf16.mxu1 %v4450_v15  ;;  %v4478_v34 = vld [vmem:[%s5638_s0] sm:$0xff]   ;;  %v4480_v36 = vld [vmem:[%s5638_s0 + $0x10] sm:$0xff]   ;;  %v4481_v37 = vld [vmem:[%s5638_s0 + $0x18] sm:$0xff]   ;;  %v302_v43 = vshrl.u32 %v301_v42, 7 }
  0x1b   : > { %v4482_v38 = vld [vmem:[%s5638_s0 + $0x20] sm:$0xff]   ;;  %v4483_v39 = vld [vmem:[%s5638_s0 + $0x28] sm:$0xff]   ;;  %v4484_v40 = vld [vmem:[%s5638_s0 + $0x30] sm:$0xff]  }
  0x1c   : > { %v4485_v41 = vld [vmem:[%s5638_s0 + $0x38] sm:$0xff]   ;;  %v303_v44 = vsub.s32 0, %v302_v43  ;;  %v311_v45 = vsub.s32 2, %v302_v43  ;;  %v299_v46 = vld [vmem:[%s5640_s2] sm:$0xf]  ;;  %v307_v47 = vsub.s32 1, %v302_v43 }
  0x1d   : > { %536 = vmatpush1.bf16.msra.mxu0 %v4452_v16  ;;  %649 = vmatpush1.bf16.msra.mxu1 %v4453_v17  ;;  %v315_v48 = vsub.s32 3, %v302_v43 }
  0x1e   : > { %537 = vmatprep.subr.bf16.mxu0 %v4454_v18  ;;  %650 = vmatprep.subr.bf16.mxu1 %v4456_v19  ;;  %v4719_v49 = vrot.slane %v299_v46, %v303_v44  ;;  %v4721_v50 = vrot.slane %v299_v46, %v311_v45  ;;  %v4723_v51 = vrot.slane %v299_v46, %v307_v47 }
  0x1f   : > { %v4725_v52 = vrot.slane %v299_v46, %v315_v48 }
  0x21   : > { %538 = vmatpush1.bf16.msra.mxu0 %v4458_v20  ;;  %651 = vmatpush1.bf16.msra.mxu1 %v4459_v21 }
  0x22   : > { %539 = vmatprep.subr.bf16.mxu0 %v4460_v22  ;;  %652 = vmatprep.subr.bf16.mxu1 %v4462_v23 }
  0x25   : > { %540 = vmatpush1.bf16.msra.mxu0 %v4464_v24  ;;  %653 = vmatpush1.bf16.msra.mxu1 %v4465_v25 }
  0x26   : > { %541 = vmatprep.subr.bf16.mxu0 %v4466_v26  ;;  %654 = vmatprep.subr.bf16.mxu1 %v4468_v27 }
  0x29   : > { %542 = vmatpush1.bf16.msra.mxu0 %v4470_v28  ;;  %655 = vmatpush1.bf16.msra.mxu1 %v4471_v29 }
  0x2a   : > { %543 = vmatprep.subr.bf16.mxu0 %v4472_v30  ;;  %656 = vmatprep.subr.bf16.mxu1 %v4474_v31 }
  0x2d   : > { %544 = vmatpush1.bf16.msra.mxu0 %v4476_v32  ;;  %657 = vmatpush1.bf16.msra.mxu1 %v4477_v33 }
  0x30   : > { %562 = vmatmul.mubr.bf16.vlgmr.msra.gmra.mrb[0].mxu0 %v4478_v34  ;;  %675 = vmatmul.mubr.bf16.vlgmr.msra.gmra.mrb[0].mxu1 %v4478_v34 }
  0x31   : > { %571 = vmatprep.mubr.bf16.mxu0 %v4527_v3  ;;  %684 = vmatprep.mubr.bf16.mxu1 %v4527_v3 }
  0x38   : > { %572 = vmatmul.mubr.bf16.gmra.mrb[4].mxu0 %v4479_v35  ;;  %685 = vmatmul.mubr.bf16.gmra.mrb[4].mxu1 %v4479_v35 }
  0x39   : > { %581 = vmatprep.mubr.bf16.mxu0 %v4527_v3  ;;  %694 = vmatprep.mubr.bf16.mxu1 %v4527_v3 }
  0x40   : > { %582 = vmatmul.mubr.bf16.gmra.mrb[8].mxu0 %v4480_v36  ;;  %695 = vmatmul.mubr.bf16.gmra.mrb[8].mxu1 %v4480_v36 }
  0x41   : > { %591 = vmatprep.mubr.bf16.mxu0 %v4527_v3  ;;  %704 = vmatprep.mubr.bf16.mxu1 %v4527_v3 }
  0x48   : > { %592 = vmatmul.mubr.bf16.gmra.mrb[12].mxu0 %v4481_v37  ;;  %705 = vmatmul.mubr.bf16.gmra.mrb[12].mxu1 %v4481_v37 }
  0x49   : > { %601 = vmatprep.mubr.bf16.mxu0 %v4527_v3  ;;  %714 = vmatprep.mubr.bf16.mxu1 %v4527_v3 }
  0x50   : > { %602 = vmatmul.mubr.bf16.gmra.mrb[16].mxu0 %v4482_v38  ;;  %715 = vmatmul.mubr.bf16.gmra.mrb[16].mxu1 %v4482_v38 }
  0x51   : > { %611 = vmatprep.mubr.bf16.mxu0 %v4527_v3  ;;  %724 = vmatprep.mubr.bf16.mxu1 %v4527_v3 }
  0x58   : > { %612 = vmatmul.mubr.bf16.gmra.mrb[20].mxu0 %v4483_v39  ;;  %725 = vmatmul.mubr.bf16.gmra.mrb[20].mxu1 %v4483_v39 }
  0x59   : > { %621 = vmatprep.mubr.bf16.mxu0 %v4527_v3  ;;  %734 = vmatprep.mubr.bf16.mxu1 %v4527_v3 }
  0x60   : > { %622 = vmatmul.mubr.bf16.gmra.mrb[24].mxu0 %v4484_v40  ;;  %735 = vmatmul.mubr.bf16.gmra.mrb[24].mxu1 %v4484_v40 }
  0x61   : > { %631 = vmatprep.mubr.bf16.mxu0 %v4527_v3  ;;  %744 = vmatprep.mubr.bf16.mxu1 %v4527_v3 }
  0x68   : > { %632 = vmatmul.mubr.bf16.gmra.mrb[28].mxu0 %v4485_v41  ;;  %745 = vmatmul.mubr.bf16.gmra.mrb[28].mxu1 %v4485_v41 }
 0x103   : > { %v563_v53 = vpop.f32.mrb[0].mxu0  ;;  %v676_v54 = vpop.f32.mrb[0].mxu1 }
 0x104   : > { %v564_v55 = vadd.f32 %v563_v53, %v4719_v49  ;;  %v677_v56 = vadd.f32 %v676_v54, %v4721_v50  ;;  %v565_v57 = vpop.f32.mrb[1].mxu0  ;;  %v678_v58 = vpop.f32.mrb[1].mxu1 }
 0x105   : > { %v566_v59 = vadd.f32 %v565_v57, %v4723_v51  ;;  %v679_v60 = vadd.f32 %v678_v58, %v4725_v52  ;;  %v567_v61 = vpop.f32.mrb[2].mxu0  ;;  %v680_v62 = vpop.f32.mrb[2].mxu1 }
 0x106   : > { %vm755_vm0 = vcmp.ge.f32.partialorder %v564_v55, 0.0  ;;  %v819_v63 = vmul.f32 0.2, %v564_v55  ;;  %vm757_vm1 = vcmp.ge.f32.partialorder %v677_v56, 0.0  ;;  %v821_v0 = vmul.f32 0.2, %v677_v56 }
 0x107   : > { %vm756_vm2 = vcmp.ge.f32.partialorder %v566_v59, 0.0  ;;  %v820_v1 = vmul.f32 0.2, %v566_v59  ;;  %vm758_vm3 = vcmp.ge.f32.partialorder %v679_v60, 0.0  ;;  %v822_v2 = vmul.f32 0.2, %v679_v60 }
 0x108   : > { %v883_v3 = vsel %vm755_vm0, %v564_v55, %v819_v63  ;;  %v885_v4 = vsel %vm757_vm1, %v677_v56, %v821_v0  ;;  %v568_v5 = vadd.f32 %v567_v61, %v4719_v49  ;;  %v681_v6 = vadd.f32 %v680_v62, %v4721_v50  ;;  %v569_v7 = vpop.f32.mrb[3].mxu0  ;;  %v682_v8 = vpop.f32.mrb[3].mxu1 }
 0x109   : > { %v884_v9 = vsel %vm756_vm2, %v566_v59, %v820_v1  ;;  %v886_v10 = vsel %vm758_vm3, %v679_v60, %v822_v2  ;;  %v570_v11 = vadd.f32 %v569_v7, %v4723_v51  ;;  %v683_v12 = vadd.f32 %v682_v8, %v4725_v52 }
 0x10a   : > { %v4388_v13 = vpack.c.bf16 %v884_v9, %v883_v3  ;;  %v4389_v14 = vpack.c.bf16 %v886_v10, %v885_v4  ;;  %vm759_vm4 = vcmp.ge.f32.partialorder %v568_v5, 0.0  ;;  %v823_v15 = vmul.f32 0.2, %v568_v5 }
 0x10b   : > { %vm761_vm5 = vcmp.ge.f32.partialorder %v681_v6, 0.0  ;;  %v825_v16 = vmul.f32 0.2, %v681_v6  ;;  %vm760_vm6 = vcmp.ge.f32.partialorder %v570_v11, 0.0  ;;  %v824_v17 = vmul.f32 0.2, %v570_v11 }
 0x10c   : > { %991 = vst [vmem:[#allocation2] sm:$0xff] %v4388_v13  ;;  %992 = vst [vmem:[#allocation2 + $0x8] sm:$0xff] %v4389_v14  ;;  %v887_v18 = vsel %vm759_vm4, %v568_v5, %v823_v15  ;;  %vm762_vm7 = vcmp.ge.f32.partialorder %v683_v12, 0.0  ;;  %v826_v19 = vmul.f32 0.2, %v683_v12  ;;  %v573_v20 = vpop.f32.mrb[4].mxu0 }
 0x10d   : > { %v686_v21 = vpop.f32.mrb[4].mxu1  ;;  %v889_v22 = vsel %vm761_vm5, %v681_v6, %v825_v16  ;;  %v888_v23 = vsel %vm760_vm6, %v570_v11, %v824_v17  ;;  %v574_v24 = vadd.f32 %v573_v20, %v4719_v49  ;;  %v575_v26 = vpop.f32.mrb[5].mxu0 }
 0x10e   : > { %v687_v25 = vadd.f32 %v686_v21, %v4721_v50  ;;  %v688_v27 = vpop.f32.mrb[5].mxu1  ;;  %v4390_v28 = vpack.c.bf16 %v888_v23, %v887_v18  ;;  %v890_v29 = vsel %vm762_vm7, %v683_v12, %v826_v19  ;;  %v576_v30 = vadd.f32 %v575_v26, %v4723_v51  ;;  %v577_v32 = vpop.f32.mrb[6].mxu0 }
 0x10f   : > { %v689_v31 = vadd.f32 %v688_v27, %v4725_v52  ;;  %v690_v33 = vpop.f32.mrb[6].mxu1  ;;  %v4391_v34 = vpack.c.bf16 %v890_v29, %v889_v22  ;;  %vm763_vm8 = vcmp.ge.f32.partialorder %v574_v24, 0.0  ;;  %v827_v35 = vmul.f32 0.2, %v574_v24  ;;  %v579_v36 = vpop.f32.mrb[7].mxu0 }
 0x110   : > { %vm765_vm9 = vcmp.ge.f32.partialorder %v687_v25, 0.0  ;;  %v692_v37 = vpop.f32.mrb[7].mxu1  ;;  %1001 = vst [vmem:[#allocation2 + $0x10] sm:$0xff] %v4390_v28  ;;  %v829_v38 = vmul.f32 0.2, %v687_v25  ;;  %vm764_vm10 = vcmp.ge.f32.partialorder %v576_v30, 0.0  ;;  %v578_v42 = vadd.f32 %v577_v32, %v4719_v49 }
 0x111   : > { %v828_v39 = vmul.f32 0.2, %v576_v30  ;;  %vm766_vm11 = vcmp.ge.f32.partialorder %v689_v31, 0.0  ;;  %1002 = vst [vmem:[#allocation2 + $0x18] sm:$0xff] %v4391_v34  ;;  %v891_v40 = vsel %vm763_vm8, %v574_v24, %v827_v35  ;;  %v830_v41 = vmul.f32 0.2, %v689_v31 }
 0x112   : > { %v691_v43 = vadd.f32 %v690_v33, %v4721_v50  ;;  %v893_v44 = vsel %vm765_vm9, %v687_v25, %v829_v38  ;;  %v580_v46 = vadd.f32 %v579_v36, %v4723_v51  ;;  %v693_v47 = vadd.f32 %v692_v37, %v4725_v52 }
 0x113   : > { %v892_v45 = vsel %vm764_vm10, %v576_v30, %v828_v39  ;;  %v894_v53 = vsel %vm766_vm11, %v689_v31, %v830_v41  ;;  %vm767_vm12 = vcmp.ge.f32.partialorder %v578_v42, 0.0  ;;  %v831_v54 = vmul.f32 0.2, %v578_v42  ;;  %v583_v55 = vpop.f32.mrb[8].mxu0  ;;  %v696_v56 = vpop.f32.mrb[8].mxu1 }
 0x114   : > { %v4392_v48 = vpack.c.bf16 %v892_v45, %v891_v40  ;;  %v4393_v57 = vpack.c.bf16 %v894_v53, %v893_v44  ;;  %vm769_vm13 = vcmp.ge.f32.partialorder %v691_v43, 0.0  ;;  %v833_v58 = vmul.f32 0.2, %v691_v43  ;;  %v585_v59 = vpop.f32.mrb[9].mxu0  ;;  %v698_v60 = vpop.f32.mrb[9].mxu1 }
 0x115   : > { %vm768_vm14 = vcmp.ge.f32.partialorder %v580_v46, 0.0  ;;  %v895_v61 = vsel %vm767_vm12, %v578_v42, %v831_v54  ;;  %v832_v62 = vmul.f32 0.2, %v580_v46  ;;  %vm770_vm15 = vcmp.ge.f32.partialorder %v693_v47, 0.0  ;;  %v587_v0 = vpop.f32.mrb[10].mxu0  ;;  %v700_v5 = vpop.f32.mrb[10].mxu1 }
 0x116   : > { %1015 = vst [vmem:[#allocation2 + $0x20] sm:$0xff] %v4392_v48  ;;  %v834_v63 = vmul.f32 0.2, %v693_v47  ;;  %1016 = vst [vmem:[#allocation2 + $0x28] sm:$0xff] %v4393_v57  ;;  %v897_v1 = vsel %vm769_vm13, %v691_v43, %v833_v58  ;;  %v584_v2 = vadd.f32 %v583_v55, %v4719_v49  ;;  %v697_v3 = vadd.f32 %v696_v56, %v4721_v50  ;;  %v589_v6 = vpop.f32.mrb[11].mxu0  ;;  %v702_v11 = vpop.f32.mrb[11].mxu1 }
 0x117   : > { %v586_v4 = vadd.f32 %v585_v59, %v4723_v51  ;;  %v896_v7 = vsel %vm768_vm14, %v580_v46, %v832_v62  ;;  %v699_v9 = vadd.f32 %v698_v60, %v4725_v52  ;;  %v588_v10 = vadd.f32 %v587_v0, %v4719_v49 }
 0x118   : > { %v898_v8 = vsel %vm770_vm15, %v693_v47, %v834_v63  ;;  %v4394_v12 = vpack.c.bf16 %v896_v7, %v895_v61  ;;  %vm771_vm0 = vcmp.ge.f32.partialorder %v584_v2, 0.0  ;;  %v835_v14 = vmul.f32 0.2, %v584_v2 }
 0x119   : > { %v4395_v13 = vpack.c.bf16 %v898_v8, %v897_v1  ;;  %vm773_vm1 = vcmp.ge.f32.partialorder %v697_v3, 0.0  ;;  %v837_v15 = vmul.f32 0.2, %v697_v3  ;;  %vm772_vm2 = vcmp.ge.f32.partialorder %v586_v4, 0.0 }
 0x11a   : > { %v836_v16 = vmul.f32 0.2, %v586_v4  ;;  %1025 = vst [vmem:[#allocation2 + $0x30] sm:$0xff] %v4394_v12  ;;  %v899_v17 = vsel %vm771_vm0, %v584_v2, %v835_v14  ;;  %vm774_vm3 = vcmp.ge.f32.partialorder %v699_v9, 0.0  ;;  %v838_v18 = vmul.f32 0.2, %v699_v9 }
 0x11b   : > { %1026 = vst [vmem:[#allocation2 + $0x38] sm:$0xff] %v4395_v13  ;;  %vm775_vm4 = vcmp.ge.f32.partialorder %v588_v10, 0.0  ;;  %v901_v19 = vsel %vm773_vm1, %v697_v3, %v837_v15  ;;  %v839_v21 = vmul.f32 0.2, %v588_v10  ;;  %v701_v22 = vadd.f32 %v700_v5, %v4721_v50  ;;  %v593_v23 = vpop.f32.mrb[12].mxu0  ;;  %v706_v24 = vpop.f32.mrb[12].mxu1 }
 0x11c   : > { %v900_v20 = vsel %vm772_vm2, %v586_v4, %v836_v16  ;;  %v902_v26 = vsel %vm774_vm3, %v699_v9, %v838_v18  ;;  %v590_v27 = vadd.f32 %v589_v6, %v4723_v51  ;;  %v703_v28 = vadd.f32 %v702_v11, %v4725_v52  ;;  %v595_v29 = vpop.f32.mrb[13].mxu0  ;;  %v708_v30 = vpop.f32.mrb[13].mxu1 }
 0x11d   : > { %v4396_v25 = vpack.c.bf16 %v900_v20, %v899_v17  ;;  %v4397_v31 = vpack.c.bf16 %v902_v26, %v901_v19  ;;  %v903_v32 = vsel %vm775_vm4, %v588_v10, %v839_v21  ;;  %vm777_vm5 = vcmp.ge.f32.partialorder %v701_v22, 0.0  ;;  %v597_v34 = vpop.f32.mrb[14].mxu0  ;;  %v710_v35 = vpop.f32.mrb[14].mxu1 }
 0x11e   : > { %v841_v33 = vmul.f32 0.2, %v701_v22  ;;  %vm776_vm6 = vcmp.ge.f32.partialorder %v590_v27, 0.0  ;;  %v840_v36 = vmul.f32 0.2, %v590_v27  ;;  %vm778_vm7 = vcmp.ge.f32.partialorder %v703_v28, 0.0 }
 0x11f   : > { %1039 = vst [vmem:[#allocation2 + $0x40] sm:$0xff] %v4396_v25  ;;  %v842_v37 = vmul.f32 0.2, %v703_v28  ;;  %1040 = vst [vmem:[#allocation2 + $0x48] sm:$0xff] %v4397_v31  ;;  %v594_v39 = vadd.f32 %v593_v23, %v4719_v49  ;;  %v707_v40 = vadd.f32 %v706_v24, %v4721_v50  ;;  %v596_v41 = vadd.f32 %v595_v29, %v4723_v51  ;;  %v599_v42 = vpop.f32.mrb[15].mxu0  ;;  %v712_v43 = vpop.f32.mrb[15].mxu1 }
 0x120   : > { %v905_v38 = vsel %vm777_vm5, %v701_v22, %v841_v33  ;;  %v904_v44 = vsel %vm776_vm6, %v590_v27, %v840_v36  ;;  %v709_v46 = vadd.f32 %v708_v30, %v4725_v52  ;;  %v598_v47 = vadd.f32 %v597_v34, %v4719_v49 }
 0x121   : > { %v906_v45 = vsel %vm778_vm7, %v703_v28, %v842_v37  ;;  %v4398_v48 = vpack.c.bf16 %v904_v44, %v903_v32  ;;  %vm779_vm8 = vcmp.ge.f32.partialorder %v594_v39, 0.0  ;;  %v843_v54 = vmul.f32 0.2, %v594_v39 }
 0x122   : > { %v4399_v53 = vpack.c.bf16 %v906_v45, %v905_v38  ;;  %vm781_vm9 = vcmp.ge.f32.partialorder %v707_v40, 0.0  ;;  %v845_v55 = vmul.f32 0.2, %v707_v40  ;;  %vm780_vm10 = vcmp.ge.f32.partialorder %v596_v41, 0.0 }
 0x123   : > { %v844_v56 = vmul.f32 0.2, %v596_v41  ;;  %1049 = vst [vmem:[#allocation2 + $0x50] sm:$0xff] %v4398_v48  ;;  %v907_v57 = vsel %vm779_vm8, %v594_v39, %v843_v54  ;;  %vm782_vm11 = vcmp.ge.f32.partialorder %v709_v46, 0.0  ;;  %v846_v58 = vmul.f32 0.2, %v709_v46 }
 0x124   : > { %1050 = vst [vmem:[#allocation2 + $0x58] sm:$0xff] %v4399_v53  ;;  %vm783_vm12 = vcmp.ge.f32.partialorder %v598_v47, 0.0  ;;  %v603_v59 = vpop.f32.mrb[16].mxu0  ;;  %v716_v60 = vpop.f32.mrb[16].mxu1  ;;  %v909_v61 = vsel %vm781_vm9, %v707_v40, %v845_v55  ;;  %v847_v63 = vmul.f32 0.2, %v598_v47  ;;  %v711_v0 = vadd.f32 %v710_v35, %v4721_v50 }
 0x125   : > { %v908_v62 = vsel %vm780_vm10, %v596_v41, %v844_v56  ;;  %v605_v1 = vpop.f32.mrb[17].mxu0  ;;  %v718_v2 = vpop.f32.mrb[17].mxu1  ;;  %v910_v4 = vsel %vm782_vm11, %v709_v46, %v846_v58  ;;  %v600_v5 = vadd.f32 %v599_v42, %v4723_v51  ;;  %v713_v6 = vadd.f32 %v712_v43, %v4725_v52 }
 0x126   : > { %v4400_v3 = vpack.c.bf16 %v908_v62, %v907_v57  ;;  %v607_v7 = vpop.f32.mrb[18].mxu0  ;;  %v720_v8 = vpop.f32.mrb[18].mxu1  ;;  %v4401_v9 = vpack.c.bf16 %v910_v4, %v909_v61  ;;  %v911_v10 = vsel %vm783_vm12, %v598_v47, %v847_v63  ;;  %vm785_vm13 = vcmp.ge.f32.partialorder %v711_v0, 0.0 }
 0x127   : > { %v849_v11 = vmul.f32 0.2, %v711_v0  ;;  %v609_v12 = vpop.f32.mrb[19].mxu0  ;;  %v722_v13 = vpop.f32.mrb[19].mxu1  ;;  %vm784_vm14 = vcmp.ge.f32.partialorder %v600_v5, 0.0  ;;  %vm786_vm15 = vcmp.ge.f32.partialorder %v713_v6, 0.0  ;;  %v604_v17 = vadd.f32 %v603_v59, %v4719_v49 }
 0x128   : > { %1063 = vst [vmem:[#allocation2 + $0x60] sm:$0xff] %v4400_v3  ;;  %v848_v14 = vmul.f32 0.2, %v600_v5  ;;  %v850_v15 = vmul.f32 0.2, %v713_v6  ;;  %1064 = vst [vmem:[#allocation2 + $0x68] sm:$0xff] %v4401_v9  ;;  %v717_v18 = vadd.f32 %v716_v60, %v4721_v50  ;;  %v606_v19 = vadd.f32 %v605_v1, %v4723_v51 }
 0x129   : > { %v913_v16 = vsel %vm785_vm13, %v711_v0, %v849_v11  ;;  %v719_v22 = vadd.f32 %v718_v2, %v4725_v52  ;;  %v608_v23 = vadd.f32 %v607_v7, %v4719_v49  ;;  %vm787_vm0 = vcmp.ge.f32.partialorder %v604_v17, 0.0 }
 0x12a   : > { %v912_v20 = vsel %vm784_vm14, %v600_v5, %v848_v14  ;;  %v914_v21 = vsel %vm786_vm15, %v713_v6, %v850_v15  ;;  %v851_v26 = vmul.f32 0.2, %v604_v17  ;;  %vm789_vm1 = vcmp.ge.f32.partialorder %v717_v18, 0.0 }
 0x12b   : > { %v4402_v24 = vpack.c.bf16 %v912_v20, %v911_v10  ;;  %v4403_v25 = vpack.c.bf16 %v914_v21, %v913_v16  ;;  %v853_v27 = vmul.f32 0.2, %v717_v18  ;;  %vm788_vm2 = vcmp.ge.f32.partialorder %v606_v19, 0.0  ;;  %v613_v31 = vpop.f32.mrb[20].mxu0  ;;  %v726_v32 = vpop.f32.mrb[20].mxu1 }
 0x12c   : > { %v852_v28 = vmul.f32 0.2, %v606_v19  ;;  %v915_v29 = vsel %vm787_vm0, %v604_v17, %v851_v26  ;;  %vm790_vm3 = vcmp.ge.f32.partialorder %v719_v22, 0.0  ;;  %v854_v30 = vmul.f32 0.2, %v719_v22  ;;  %v615_v37 = vpop.f32.mrb[21].mxu0 }
 0x12d   : > { %1073 = vst [vmem:[#allocation2 + $0x70] sm:$0xff] %v4402_v24  ;;  %1074 = vst [vmem:[#allocation2 + $0x78] sm:$0xff] %v4403_v25  ;;  %vm791_vm4 = vcmp.ge.f32.partialorder %v608_v23, 0.0  ;;  %v917_v33 = vsel %vm789_vm1, %v717_v18, %v853_v27  ;;  %v855_v35 = vmul.f32 0.2, %v608_v23  ;;  %v721_v36 = vadd.f32 %v720_v8, %v4721_v50  ;;  %v728_v38 = vpop.f32.mrb[21].mxu1 }
 0x12e   : > { %v916_v34 = vsel %vm788_vm2, %v606_v19, %v852_v28  ;;  %v918_v40 = vsel %vm790_vm3, %v719_v22, %v854_v30  ;;  %v610_v41 = vadd.f32 %v609_v12, %v4723_v51  ;;  %v723_v42 = vadd.f32 %v722_v13, %v4725_v52  ;;  %v617_v43 = vpop.f32.mrb[22].mxu0  ;;  %v730_v44 = vpop.f32.mrb[22].mxu1 }
 0x12f   : > { %v4404_v39 = vpack.c.bf16 %v916_v34, %v915_v29  ;;  %v4405_v45 = vpack.c.bf16 %v918_v40, %v917_v33  ;;  %v919_v46 = vsel %vm791_vm4, %v608_v23, %v855_v35  ;;  %vm793_vm5 = vcmp.ge.f32.partialorder %v721_v36, 0.0  ;;  %v619_v48 = vpop.f32.mrb[23].mxu0  ;;  %v732_v53 = vpop.f32.mrb[23].mxu1 }
 0x130   : > { %v857_v47 = vmul.f32 0.2, %v721_v36  ;;  %vm792_vm6 = vcmp.ge.f32.partialorder %v610_v41, 0.0  ;;  %v856_v54 = vmul.f32 0.2, %v610_v41  ;;  %vm794_vm7 = vcmp.ge.f32.partialorder %v723_v42, 0.0 }
 0x131   : > { %1087 = vst [vmem:[#allocation2 + $0x80] sm:$0xff] %v4404_v39  ;;  %v858_v55 = vmul.f32 0.2, %v723_v42  ;;  %1088 = vst [vmem:[#allocation2 + $0x88] sm:$0xff] %v4405_v45  ;;  %v614_v57 = vadd.f32 %v613_v31, %v4719_v49  ;;  %v727_v58 = vadd.f32 %v726_v32, %v4721_v50  ;;  %v616_v59 = vadd.f32 %v615_v37, %v4723_v51 }
 0x132   : > { %v921_v56 = vsel %vm793_vm5, %v721_v36, %v857_v47  ;;  %v920_v60 = vsel %vm792_vm6, %v610_v41, %v856_v54  ;;  %v729_v62 = vadd.f32 %v728_v38, %v4725_v52  ;;  %v618_v63 = vadd.f32 %v617_v43, %v4719_v49 }
 0x133   : > { %v922_v61 = vsel %vm794_vm7, %v723_v42, %v858_v55  ;;  %v4406_v0 = vpack.c.bf16 %v920_v60, %v919_v46  ;;  %vm795_vm8 = vcmp.ge.f32.partialorder %v614_v57, 0.0  ;;  %v859_v2 = vmul.f32 0.2, %v614_v57  ;;  %v623_v3 = vpop.f32.mrb[24].mxu0  ;;  %v736_v4 = vpop.f32.mrb[24].mxu1 }
 0x134   : > { %v4407_v1 = vpack.c.bf16 %v922_v61, %v921_v56  ;;  %vm797_vm9 = vcmp.ge.f32.partialorder %v727_v58, 0.0  ;;  %v861_v5 = vmul.f32 0.2, %v727_v58  ;;  %vm796_vm10 = vcmp.ge.f32.partialorder %v616_v59, 0.0  ;;  %v625_v9 = vpop.f32.mrb[25].mxu0  ;;  %v738_v10 = vpop.f32.mrb[25].mxu1 }
 0x135   : > { %v860_v6 = vmul.f32 0.2, %v616_v59  ;;  %1097 = vst [vmem:[#allocation2 + $0x90] sm:$0xff] %v4406_v0  ;;  %v923_v7 = vsel %vm795_vm8, %v614_v57, %v859_v2  ;;  %vm798_vm11 = vcmp.ge.f32.partialorder %v729_v62, 0.0  ;;  %v862_v8 = vmul.f32 0.2, %v729_v62 }
 0x136   : > { %1098 = vst [vmem:[#allocation2 + $0x98] sm:$0xff] %v4407_v1  ;;  %vm799_vm12 = vcmp.ge.f32.partialorder %v618_v63, 0.0  ;;  %v925_v11 = vsel %vm797_vm9, %v727_v58, %v861_v5  ;;  %v863_v13 = vmul.f32 0.2, %v618_v63  ;;  %v731_v14 = vadd.f32 %v730_v44, %v4721_v50  ;;  %v627_v15 = vpop.f32.mrb[26].mxu0  ;;  %v740_v16 = vpop.f32.mrb[26].mxu1 }
 0x137   : > { %v924_v12 = vsel %vm796_vm10, %v616_v59, %v860_v6  ;;  %v926_v18 = vsel %vm798_vm11, %v729_v62, %v862_v8  ;;  %v620_v19 = vadd.f32 %v619_v48, %v4723_v51  ;;  %v733_v20 = vadd.f32 %v732_v53, %v4725_v52  ;;  %v629_v21 = vpop.f32.mrb[27].mxu0  ;;  %v742_v22 = vpop.f32.mrb[27].mxu1 }
 0x138   : > { %v4408_v17 = vpack.c.bf16 %v924_v12, %v923_v7  ;;  %v4409_v23 = vpack.c.bf16 %v926_v18, %v925_v11  ;;  %v927_v24 = vsel %vm799_vm12, %v618_v63, %v863_v13  ;;  %vm801_vm13 = vcmp.ge.f32.partialorder %v731_v14, 0.0 }
 0x139   : > { %v865_v25 = vmul.f32 0.2, %v731_v14  ;;  %vm800_vm14 = vcmp.ge.f32.partialorder %v620_v19, 0.0  ;;  %v864_v26 = vmul.f32 0.2, %v620_v19  ;;  %vm802_vm15 = vcmp.ge.f32.partialorder %v733_v20, 0.0 }
 0x13a   : > { %1111 = vst [vmem:[#allocation2 + $0xa0] sm:$0xff] %v4408_v17  ;;  %v866_v27 = vmul.f32 0.2, %v733_v20  ;;  %1112 = vst [vmem:[#allocation2 + $0xa8] sm:$0xff] %v4409_v23  ;;  %v624_v29 = vadd.f32 %v623_v3, %v4719_v49  ;;  %v737_v30 = vadd.f32 %v736_v4, %v4721_v50  ;;  %v626_v31 = vadd.f32 %v625_v9, %v4723_v51 }
 0x13b   : > { %v929_v28 = vsel %vm801_vm13, %v731_v14, %v865_v25  ;;  %v928_v32 = vsel %vm800_vm14, %v620_v19, %v864_v26  ;;  %v739_v34 = vadd.f32 %v738_v10, %v4725_v52  ;;  %v628_v35 = vadd.f32 %v627_v15, %v4719_v49  ;;  %v633_v36 = vpop.f32.mrb[28].mxu0  ;;  %v746_v37 = vpop.f32.mrb[28].mxu1 }
 0x13c   : > { %v930_v33 = vsel %vm802_vm15, %v733_v20, %v866_v27  ;;  %v4410_v38 = vpack.c.bf16 %v928_v32, %v927_v24  ;;  %vm803_vm0 = vcmp.ge.f32.partialorder %v624_v29, 0.0  ;;  %v867_v40 = vmul.f32 0.2, %v624_v29  ;;  %v635_v41 = vpop.f32.mrb[29].mxu0  ;;  %v748_v42 = vpop.f32.mrb[29].mxu1 }
 0x13d   : > { %v4411_v39 = vpack.c.bf16 %v930_v33, %v929_v28  ;;  %vm805_vm1 = vcmp.ge.f32.partialorder %v737_v30, 0.0  ;;  %v869_v43 = vmul.f32 0.2, %v737_v30  ;;  %vm804_vm2 = vcmp.ge.f32.partialorder %v626_v31, 0.0  ;;  %v637_v47 = vpop.f32.mrb[30].mxu0  ;;  %v750_v48 = vpop.f32.mrb[30].mxu1 }
 0x13e   : > { %v868_v44 = vmul.f32 0.2, %v626_v31  ;;  %1121 = vst [vmem:[#allocation2 + $0xb0] sm:$0xff] %v4410_v38  ;;  %v931_v45 = vsel %vm803_vm0, %v624_v29, %v867_v40  ;;  %vm806_vm3 = vcmp.ge.f32.partialorder %v739_v34, 0.0  ;;  %v870_v46 = vmul.f32 0.2, %v739_v34 }
 0x13f   : > { %1122 = vst [vmem:[#allocation2 + $0xb8] sm:$0xff] %v4411_v39  ;;  %vm807_vm4 = vcmp.ge.f32.partialorder %v628_v35, 0.0  ;;  %v933_v53 = vsel %vm805_vm1, %v737_v30, %v869_v43  ;;  %v871_v55 = vmul.f32 0.2, %v628_v35  ;;  %v741_v56 = vadd.f32 %v740_v16, %v4721_v50  ;;  %v639_v57 = vpop.f32.mrb[31].mxu0  ;;  %v752_v58 = vpop.f32.mrb[31].mxu1 }
 0x140   : > { %v932_v54 = vsel %vm804_vm2, %v626_v31, %v868_v44  ;;  %v934_v60 = vsel %vm806_vm3, %v739_v34, %v870_v46  ;;  %v630_v61 = vadd.f32 %v629_v21, %v4723_v51  ;;  %v743_v62 = vadd.f32 %v742_v22, %v4725_v52 }
 0x141   : > { %v4412_v59 = vpack.c.bf16 %v932_v54, %v931_v45  ;;  %v4413_v63 = vpack.c.bf16 %v934_v60, %v933_v53  ;;  %v935_v0 = vsel %vm807_vm4, %v628_v35, %v871_v55  ;;  %vm809_vm5 = vcmp.ge.f32.partialorder %v741_v56, 0.0 }
 0x142   : > { %v873_v1 = vmul.f32 0.2, %v741_v56  ;;  %vm808_vm6 = vcmp.ge.f32.partialorder %v630_v61, 0.0  ;;  %v872_v2 = vmul.f32 0.2, %v630_v61  ;;  %vm810_vm7 = vcmp.ge.f32.partialorder %v743_v62, 0.0 }
 0x143   : > { %1135 = vst [vmem:[#allocation2 + $0xc0] sm:$0xff] %v4412_v59  ;;  %v874_v3 = vmul.f32 0.2, %v743_v62  ;;  %1136 = vst [vmem:[#allocation2 + $0xc8] sm:$0xff] %v4413_v63  ;;  %v634_v5 = vadd.f32 %v633_v36, %v4719_v49  ;;  %v747_v6 = vadd.f32 %v746_v37, %v4721_v50  ;;  %v636_v7 = vadd.f32 %v635_v41, %v4723_v51 }
 0x144   : > { %v937_v4 = vsel %vm809_vm5, %v741_v56, %v873_v1  ;;  %v936_v8 = vsel %vm808_vm6, %v630_v61, %v872_v2  ;;  %v749_v10 = vadd.f32 %v748_v42, %v4725_v52  ;;  %v638_v11 = vadd.f32 %v637_v47, %v4719_v49 }
 0x145   : > { %v938_v9 = vsel %vm810_vm7, %v743_v62, %v874_v3  ;;  %v4414_v12 = vpack.c.bf16 %v936_v8, %v935_v0  ;;  %vm811_vm8 = vcmp.ge.f32.partialorder %v634_v5, 0.0  ;;  %v875_v14 = vmul.f32 0.2, %v634_v5 }
 0x146   : > { %v4415_v13 = vpack.c.bf16 %v938_v9, %v937_v4  ;;  %vm813_vm9 = vcmp.ge.f32.partialorder %v747_v6, 0.0  ;;  %v877_v15 = vmul.f32 0.2, %v747_v6  ;;  %vm812_vm10 = vcmp.ge.f32.partialorder %v636_v7, 0.0 }
 0x147   : > { %v876_v16 = vmul.f32 0.2, %v636_v7  ;;  %1145 = vst [vmem:[#allocation2 + $0xd0] sm:$0xff] %v4414_v12  ;;  %v939_v17 = vsel %vm811_vm8, %v634_v5, %v875_v14  ;;  %vm814_vm11 = vcmp.ge.f32.partialorder %v749_v10, 0.0  ;;  %v878_v18 = vmul.f32 0.2, %v749_v10 }
 0x148   : > { %1146 = vst [vmem:[#allocation2 + $0xd8] sm:$0xff] %v4415_v13  ;;  %vm815_vm12 = vcmp.ge.f32.partialorder %v638_v11, 0.0  ;;  %v941_v19 = vsel %vm813_vm9, %v747_v6, %v877_v15  ;;  %v879_v21 = vmul.f32 0.2, %v638_v11  ;;  %v751_v22 = vadd.f32 %v750_v48, %v4721_v50 }
 0x149   : > { %v940_v20 = vsel %vm812_vm10, %v636_v7, %v876_v16  ;;  %v942_v23 = vsel %vm814_vm11, %v749_v10, %v878_v18  ;;  %v640_v24 = vadd.f32 %v639_v57, %v4723_v51  ;;  %v753_v25 = vadd.f32 %v752_v58, %v4725_v52 }
 0x14a   : > { %v4416_v49 = vpack.c.bf16 %v940_v20, %v939_v17  ;;  %v4417_v26 = vpack.c.bf16 %v942_v23, %v941_v19  ;;  %v943_v27 = vsel %vm815_vm12, %v638_v11, %v879_v21  ;;  %vm817_vm13 = vcmp.ge.f32.partialorder %v751_v22, 0.0 }
 0x14b   : > { %v881_v28 = vmul.f32 0.2, %v751_v22  ;;  %vm816_vm14 = vcmp.ge.f32.partialorder %v640_v24, 0.0  ;;  %v880_v29 = vmul.f32 0.2, %v640_v24  ;;  %vm818_vm15 = vcmp.ge.f32.partialorder %v753_v25, 0.0 }
 0x14c   : > { %1159 = vst [vmem:[#allocation2 + $0xe0] sm:$0xff] %v4416_v49  ;;  %v882_v30 = vmul.f32 0.2, %v753_v25  ;;  %1160 = vst [vmem:[#allocation2 + $0xe8] sm:$0xff] %v4417_v26 }
 0x14d   : > { %v945_v31 = vsel %vm817_vm13, %v751_v22, %v881_v28  ;;  %v944_v32 = vsel %vm816_vm14, %v640_v24, %v880_v29 }
 0x14e   : > { %v946_v33 = vsel %vm818_vm15, %v753_v25, %v882_v30  ;;  %v4418_v50 = vpack.c.bf16 %v944_v32, %v943_v27 }
 0x14f   : > { %v4419_v34 = vpack.c.bf16 %v946_v33, %v945_v31 }
 0x150   : > { %1169 = vst [vmem:[#allocation2 + $0xf0] sm:$0xff] %v4418_v50 }
 0x151   : > { %1170 = vst [vmem:[#allocation2 + $0xf8] sm:$0xff] %v4419_v34 }
 0x152 PF: > { %v1193_v51 = vld [vmem:[%s4577_s27 + $0x8] sm:$0xff]  ;;  %v1192_v35 = vld [vmem:[%s4577_s27] sm:$0xff]  ;;  %s4350_s25 = sshll.u32 %s4569_s22, 12  ;;  %p4384_p5 = scmp.ne.s32.totalorder %s4569_s22, 1 }
 0x153   : > { %v1225_v52 = vld [vmem:[%s4577_s27 + $0x108] sm:$0xff]  ;;  %v1705_v36 = vunpack.c.l.s8.bf16 %v1193_v51  ;;  %v1709_v37 = vunpack.c.h.s8.bf16 %v1193_v51  ;;  %v1224_v40 = vld [vmem:[%s4577_s27 + $0x100] sm:$0xff]  ;;  %v1704_v41 = vunpack.c.l.s8.bf16 %v1192_v35  ;;  %v1708_v45 = vunpack.c.h.s8.bf16 %v1192_v35  ;;  %s1172_s26 = sshra.s32 %s4350_s25, 7 }
 0x154   : > { %v1769_v38 = vunpack.c.l.s8.bf16 %v1225_v52  ;;  %v1773_v39 = vunpack.c.h.s8.bf16 %v1225_v52  ;;  %v1768_v42 = vunpack.c.l.s8.bf16 %v1224_v40  ;;  %v1197_v43 = vld [vmem:[%s4577_s27 + $0x28] sm:$0xff]  ;;  %v1772_v46 = vunpack.c.h.s8.bf16 %v1224_v40  ;;  %v1196_v53 = vld [vmem:[%s4577_s27 + $0x20] sm:$0xff]  ;;  %s4351_s28 = sshll.u32 %s1172_s26, 2 }
 0x155   : > { %v1229_v44 = vld [vmem:[%s4577_s27 + $0x128] sm:$0xff]  ;;  %2844 = vmatprep.subr.bf16.mxu0 %v1705_v36  ;;  %v1713_v47 = vunpack.c.l.s8.bf16 %v1197_v43  ;;  %v1228_v54 = vld [vmem:[%s4577_s27 + $0x120] sm:$0xff]  ;;  %v1712_v55 = vunpack.c.l.s8.bf16 %v1196_v53  ;;  %v1717_v57 = vunpack.c.h.s8.bf16 %v1197_v43  ;;  %v1716_v61 = vunpack.c.h.s8.bf16 %v1196_v53  ;;  %s4808_s29 = scalar_lea.vmem [#allocation2], %s4351_s28 }
 0x156   : > { %2885 = vmatprep.subr.bf16.mxu1 %v1769_v38  ;;  %2845 = vmatpush1.bf16.msra.mxu0 %v1704_v41  ;;  %v1777_v48 = vunpack.c.l.s8.bf16 %v1229_v44  ;;  %v1776_v56 = vunpack.c.l.s8.bf16 %v1228_v54  ;;  %v1781_v58 = vunpack.c.h.s8.bf16 %v1229_v44  ;;  %v1201_v59 = vld [vmem:[%s4577_s27 + $0x48] sm:$0xff]  ;;  %v1780_v62 = vunpack.c.h.s8.bf16 %v1228_v54  ;;  %v1200_v1 = vld [vmem:[%s4577_s27 + $0x40] sm:$0xff] }
 0x157   : > { %2886 = vmatpush1.bf16.msra.mxu1 %v1768_v42  ;;  %2846 = vmatprep.subr.bf16.mxu0 %v1709_v37  ;;  %v1233_v60 = vld [vmem:[%s4577_s27 + $0x148] sm:$0xff]  ;;  %v1721_v63 = vunpack.c.l.s8.bf16 %v1201_v59  ;;  %v1232_v2 = vld [vmem:[%s4577_s27 + $0x140] sm:$0xff]  ;;  %v1720_v5 = vunpack.c.l.s8.bf16 %v1200_v1  ;;  %v1725_v7 = vunpack.c.h.s8.bf16 %v1201_v59  ;;  %v1724_v13 = vunpack.c.h.s8.bf16 %v1200_v1 }
 0x158   : > { %2887 = vmatprep.subr.bf16.mxu1 %v1773_v39  ;;  %v1785_v0 = vunpack.c.l.s8.bf16 %v1233_v60  ;;  %v4811_v3 = vld [vmem:[%s4808_s29] sm:$0xff]  ;;  %v4814_v4 = vld [vmem:[%s4808_s29 + $0x8] sm:$0xff]  ;;  %v1784_v6 = vunpack.c.l.s8.bf16 %v1232_v2  ;;  %v1789_v8 = vunpack.c.h.s8.bf16 %v1233_v60  ;;  %v1788_v14 = vunpack.c.h.s8.bf16 %v1232_v2 }
 0x159   : > { %v4818_v9 = vcombine.high %v4811_v3, %v4811_v3  ;;  %v1205_v10 = vld [vmem:[%s4577_s27 + $0x68] sm:$0xff]  ;;  %v4824_v12 = vcombine.high %v4814_v4, %v4814_v4  ;;  %v1204_v17 = vld [vmem:[%s4577_s27 + $0x60] sm:$0xff] }
 0x15a   : > { %2847 = vmatpush1.bf16.msra.mxu0 %v1708_v45  ;;  %v1237_v11 = vld [vmem:[%s4577_s27 + $0x168] sm:$0xff]  ;;  %v1729_v15 = vunpack.c.l.s8.bf16 %v1205_v10  ;;  %v1236_v18 = vld [vmem:[%s4577_s27 + $0x160] sm:$0xff]  ;;  %v1728_v19 = vunpack.c.l.s8.bf16 %v1204_v17  ;;  %v1733_v21 = vunpack.c.h.s8.bf16 %v1205_v10  ;;  %v1732_v24 = vunpack.c.h.s8.bf16 %v1204_v17 }
 0x15b   : > { %2888 = vmatpush1.bf16.msra.mxu1 %v1772_v46  ;;  %2848 = vmatprep.subr.bf16.mxu0 %v1713_v47  ;;  %v1793_v16 = vunpack.c.l.s8.bf16 %v1237_v11  ;;  %v1792_v20 = vunpack.c.l.s8.bf16 %v1236_v18  ;;  %v1797_v22 = vunpack.c.h.s8.bf16 %v1237_v11  ;;  %v1209_v49 = vld [vmem:[%s4577_s27 + $0x88] sm:$0xff]  ;;  %v1796_v25 = vunpack.c.h.s8.bf16 %v1236_v18  ;;  %v1208_v28 = vld [vmem:[%s4577_s27 + $0x80] sm:$0xff] }
 0x15c   : > { %2889 = vmatprep.subr.bf16.mxu1 %v1777_v48  ;;  %2876 = vmatprep.mubr.bf16.mxu0 %v4818_v9  ;;  %v1241_v23 = vld [vmem:[%s4577_s27 + $0x188] sm:$0xff]  ;;  %v1737_v26 = vunpack.c.l.s8.bf16 %v1209_v49  ;;  %v1240_v29 = vld [vmem:[%s4577_s27 + $0x180] sm:$0xff]  ;;  %v1736_v30 = vunpack.c.l.s8.bf16 %v1208_v28  ;;  %v1741_v32 = vunpack.c.h.s8.bf16 %v1209_v49  ;;  %v1740_v51 = vunpack.c.h.s8.bf16 %v1208_v28 }
 0x15d   : > { %2917 = vmatprep.mubr.bf16.mxu1 %v4824_v12  ;;  %v1801_v27 = vunpack.c.l.s8.bf16 %v1241_v23  ;;  %v1800_v31 = vunpack.c.l.s8.bf16 %v1240_v29  ;;  %v1805_v33 = vunpack.c.h.s8.bf16 %v1241_v23  ;;  %v1213_v50 = vld [vmem:[%s4577_s27 + $0xa8] sm:$0xff]  ;;  %v1804_v52 = vunpack.c.h.s8.bf16 %v1240_v29  ;;  %v1212_v37 = vld [vmem:[%s4577_s27 + $0xa0] sm:$0xff] }
 0x15e   : > { %2849 = vmatpush1.bf16.msra.mxu0 %v1712_v55  ;;  %v1245_v34 = vld [vmem:[%s4577_s27 + $0x1a8] sm:$0xff]  ;;  %v1745_v35 = vunpack.c.l.s8.bf16 %v1213_v50  ;;  %v1244_v38 = vld [vmem:[%s4577_s27 + $0x1a0] sm:$0xff]  ;;  %v1744_v39 = vunpack.c.l.s8.bf16 %v1212_v37  ;;  %v1749_v41 = vunpack.c.h.s8.bf16 %v1213_v50  ;;  %v1748_v45 = vunpack.c.h.s8.bf16 %v1212_v37 }
 0x15f   : > { %2890 = vmatpush1.bf16.msra.mxu1 %v1776_v56  ;;  %2850 = vmatprep.subr.bf16.mxu0 %v1717_v57  ;;  %v1809_v36 = vunpack.c.l.s8.bf16 %v1245_v34  ;;  %v1808_v40 = vunpack.c.l.s8.bf16 %v1244_v38  ;;  %v1813_v42 = vunpack.c.h.s8.bf16 %v1245_v34  ;;  %v1217_v43 = vld [vmem:[%s4577_s27 + $0xc8] sm:$0xff]  ;;  %v1812_v46 = vunpack.c.h.s8.bf16 %v1244_v38  ;;  %v1216_v53 = vld [vmem:[%s4577_s27 + $0xc0] sm:$0xff] }
 0x160   : > { %2891 = vmatprep.subr.bf16.mxu1 %v1781_v58  ;;  %v1249_v44 = vld [vmem:[%s4577_s27 + $0x1c8] sm:$0xff]  ;;  %v1753_v47 = vunpack.c.l.s8.bf16 %v1217_v43  ;;  %v1248_v54 = vld [vmem:[%s4577_s27 + $0x1c0] sm:$0xff]  ;;  %v1752_v55 = vunpack.c.l.s8.bf16 %v1216_v53  ;;  %v1757_v57 = vunpack.c.h.s8.bf16 %v1217_v43 }
 0x161   : > { %v1817_v48 = vunpack.c.l.s8.bf16 %v1249_v44  ;;  %v1816_v56 = vunpack.c.l.s8.bf16 %v1248_v54  ;;  %v1821_v58 = vunpack.c.h.s8.bf16 %v1249_v44  ;;  %v1221_v59 = vld [vmem:[%s4577_s27 + $0xe8] sm:$0xff]  ;;  %v1220_v1 = vld [vmem:[%s4577_s27 + $0xe0] sm:$0xff] }
 0x162   : > { %2851 = vmatpush1.bf16.msra.mxu0 %v1716_v61  ;;  %v1253_v60 = vld [vmem:[%s4577_s27 + $0x1e8] sm:$0xff]  ;;  %v1756_v61 = vunpack.c.h.s8.bf16 %v1216_v53  ;;  %v1252_v2 = vld [vmem:[%s4577_s27 + $0x1e0] sm:$0xff] }
 0x163   : > { %2892 = vmatpush1.bf16.msra.mxu1 %v1780_v62  ;;  %2852 = vmatprep.subr.bf16.mxu0 %v1721_v63  ;;  %v1820_v62 = vunpack.c.h.s8.bf16 %v1248_v54  ;;  %v1761_v63 = vunpack.c.l.s8.bf16 %v1221_v59  ;;  %v1257_v10 = vld [vmem:[%s4577_s27 + $0x208] sm:$0xff]  ;;  %v1256_v17 = vld [vmem:[%s4577_s27 + $0x200] sm:$0xff] }
 0x164   : > { %2893 = vmatprep.subr.bf16.mxu1 %v1785_v0  ;;  %v1825_v0 = vunpack.c.l.s8.bf16 %v1253_v60  ;;  %v1289_v11 = vld [vmem:[%s4577_s27 + $0x308] sm:$0xff]  ;;  %v1288_v18 = vld [vmem:[%s4577_s27 + $0x300] sm:$0xff]  ;;  %v1832_v49 = vunpack.c.l.s8.bf16 %v1256_v17  ;;  %v1836_v28 = vunpack.c.h.s8.bf16 %v1256_v17 }
 0x165   : > { %v1896_v23 = vunpack.c.l.s8.bf16 %v1288_v18  ;;  %v1900_v29 = vunpack.c.h.s8.bf16 %v1288_v18 }
 0x166   : > { %2853 = vmatpush1.bf16.msra.mxu0 %v1720_v5  ;;  %v1760_v5 = vunpack.c.l.s8.bf16 %v1220_v1 }
 0x167   : > { %2894 = vmatpush1.bf16.msra.mxu1 %v1784_v6  ;;  %2854 = vmatprep.subr.bf16.mxu0 %v1725_v7  ;;  %v1824_v6 = vunpack.c.l.s8.bf16 %v1252_v2  ;;  %v1765_v7 = vunpack.c.h.s8.bf16 %v1221_v59 }
 0x168   : > { %2895 = vmatprep.subr.bf16.mxu1 %v1789_v8  ;;  %v1829_v8 = vunpack.c.h.s8.bf16 %v1253_v60 }
 0x16a   : > { %2855 = vmatpush1.bf16.msra.mxu0 %v1724_v13  ;;  %v1764_v13 = vunpack.c.h.s8.bf16 %v1220_v1 }
 0x16b   : > { %2896 = vmatpush1.bf16.msra.mxu1 %v1788_v14  ;;  %2856 = vmatprep.subr.bf16.mxu0 %v1729_v15  ;;  %v1828_v14 = vunpack.c.h.s8.bf16 %v1252_v2  ;;  %v1833_v15 = vunpack.c.l.s8.bf16 %v1257_v10 }
 0x16c   : > { %2897 = vmatprep.subr.bf16.mxu1 %v1793_v16  ;;  %v1897_v16 = vunpack.c.l.s8.bf16 %v1289_v11 }
 0x16e   : > { %2857 = vmatpush1.bf16.msra.mxu0 %v1728_v19  ;;  %v4852_v19 = vcombine.low %v4811_v3, %v4811_v3  ;;  %v1261_v3 = vld [vmem:[%s4577_s27 + $0x228] sm:$0xff] }
 0x16f   : > { %2898 = vmatpush1.bf16.msra.mxu1 %v1792_v20  ;;  %2858 = vmatprep.subr.bf16.mxu0 %v1733_v21  ;;  %v4856_v20 = vcombine.low %v4814_v4, %v4814_v4  ;;  %v4859_v21 = vld [vmem:[%s4808_s29 + $0x10] sm:$0xff] }
 0x170   : > { %2899 = vmatprep.subr.bf16.mxu1 %v1797_v22  ;;  %v4862_v22 = vld [vmem:[%s4808_s29 + $0x18] sm:$0xff]  ;;  %v4868_v4 = vcombine.high %v4859_v21, %v4859_v21 }
 0x172   : > { %2859 = vmatpush1.bf16.msra.mxu0 %v1732_v24  ;;  %v1837_v24 = vunpack.c.h.s8.bf16 %v1257_v10 }
 0x173   : > { %2900 = vmatpush1.bf16.msra.mxu1 %v1796_v25  ;;  %2860 = vmatprep.subr.bf16.mxu0 %v1737_v26  ;;  %v1901_v25 = vunpack.c.h.s8.bf16 %v1289_v11  ;;  %v1293_v26 = vld [vmem:[%s4577_s27 + $0x328] sm:$0xff] }
 0x174   : > { %2901 = vmatprep.subr.bf16.mxu1 %v1801_v27  ;;  %v4872_v27 = vcombine.high %v4862_v22, %v4862_v22 }
 0x176   : > { %2861 = vmatpush1.bf16.msra.mxu0 %v1736_v30  ;;  %v1841_v30 = vunpack.c.l.s8.bf16 %v1261_v3 }
 0x177   : > { %2902 = vmatpush1.bf16.msra.mxu1 %v1800_v31  ;;  %2862 = vmatprep.subr.bf16.mxu0 %v1741_v32  ;;  %v1905_v31 = vunpack.c.l.s8.bf16 %v1293_v26  ;;  %v1260_v32 = vld [vmem:[%s4577_s27 + $0x220] sm:$0xff] }
 0x178   : > { %2903 = vmatprep.subr.bf16.mxu1 %v1805_v33  ;;  %v1292_v33 = vld [vmem:[%s4577_s27 + $0x320] sm:$0xff]  ;;  %v1840_v50 = vunpack.c.l.s8.bf16 %v1260_v32  ;;  %v1844_v37 = vunpack.c.h.s8.bf16 %v1260_v32 }
 0x179   : > { %v1904_v34 = vunpack.c.l.s8.bf16 %v1292_v33  ;;  %v1908_v38 = vunpack.c.h.s8.bf16 %v1292_v33 }
 0x17a   : > { %2863 = vmatpush1.bf16.msra.mxu0 %v1740_v51  ;;  %v1845_v51 = vunpack.c.h.s8.bf16 %v1261_v3 }
 0x17b   : > { %2904 = vmatpush1.bf16.msra.mxu1 %v1804_v52  ;;  %2864 = vmatprep.subr.bf16.mxu0 %v1745_v35  ;;  %v1909_v52 = vunpack.c.h.s8.bf16 %v1293_v26  ;;  %v1265_v35 = vld [vmem:[%s4577_s27 + $0x248] sm:$0xff] }
 0x17c   : > { %2905 = vmatprep.subr.bf16.mxu1 %v1809_v36  ;;  %v1297_v36 = vld [vmem:[%s4577_s27 + $0x348] sm:$0xff] }
 0x17e   : > { %2865 = vmatpush1.bf16.msra.mxu0 %v1744_v39  ;;  %v1849_v39 = vunpack.c.l.s8.bf16 %v1265_v35 }
 0x17f   : > { %2906 = vmatpush1.bf16.msra.mxu1 %v1808_v40  ;;  %2866 = vmatprep.subr.bf16.mxu0 %v1749_v41  ;;  %v1913_v40 = vunpack.c.l.s8.bf16 %v1297_v36  ;;  %v1264_v41 = vld [vmem:[%s4577_s27 + $0x240] sm:$0xff] }
 0x180   : > { %2907 = vmatprep.subr.bf16.mxu1 %v1813_v42  ;;  %v1296_v42 = vld [vmem:[%s4577_s27 + $0x340] sm:$0xff]  ;;  %v1848_v43 = vunpack.c.l.s8.bf16 %v1264_v41  ;;  %v1852_v53 = vunpack.c.h.s8.bf16 %v1264_v41 }
 0x181   : > { %v1912_v44 = vunpack.c.l.s8.bf16 %v1296_v42  ;;  %v1916_v54 = vunpack.c.h.s8.bf16 %v1296_v42 }
 0x182   : > { %2867 = vmatpush1.bf16.msra.mxu0 %v1748_v45  ;;  %v1853_v45 = vunpack.c.h.s8.bf16 %v1265_v35 }
 0x183   : > { %2908 = vmatpush1.bf16.msra.mxu1 %v1812_v46  ;;  %2868 = vmatprep.subr.bf16.mxu0 %v1753_v47  ;;  %v1917_v46 = vunpack.c.h.s8.bf16 %v1297_v36  ;;  %v1269_v47 = vld [vmem:[%s4577_s27 + $0x268] sm:$0xff] }
 0x184   : > { %2909 = vmatprep.subr.bf16.mxu1 %v1817_v48  ;;  %v1301_v48 = vld [vmem:[%s4577_s27 + $0x368] sm:$0xff] }
 0x186   : > { %2869 = vmatpush1.bf16.msra.mxu0 %v1752_v55  ;;  %v1857_v55 = vunpack.c.l.s8.bf16 %v1269_v47 }
 0x187   : > { %2910 = vmatpush1.bf16.msra.mxu1 %v1816_v56  ;;  %2870 = vmatprep.subr.bf16.mxu0 %v1757_v57  ;;  %v1921_v56 = vunpack.c.l.s8.bf16 %v1301_v48  ;;  %v1268_v57 = vld [vmem:[%s4577_s27 + $0x260] sm:$0xff] }
 0x188   : > { %2911 = vmatprep.subr.bf16.mxu1 %v1821_v58  ;;  %v1300_v58 = vld [vmem:[%s4577_s27 + $0x360] sm:$0xff]  ;;  %v1856_v59 = vunpack.c.l.s8.bf16 %v1268_v57  ;;  %v1860_v1 = vunpack.c.h.s8.bf16 %v1268_v57 }
 0x189   : > { %v1920_v60 = vunpack.c.l.s8.bf16 %v1300_v58  ;;  %v1924_v2 = vunpack.c.h.s8.bf16 %v1300_v58 }
 0x18a   : > { %2871 = vmatpush1.bf16.msra.mxu0 %v1756_v61  ;;  %v1861_v61 = vunpack.c.h.s8.bf16 %v1269_v47 }
 0x18b   : > { %2912 = vmatpush1.bf16.msra.mxu1 %v1820_v62  ;;  %2872 = vmatprep.subr.bf16.mxu0 %v1761_v63  ;;  %v1925_v62 = vunpack.c.h.s8.bf16 %v1301_v48  ;;  %v1273_v63 = vld [vmem:[%s4577_s27 + $0x288] sm:$0xff] }
 0x18c   : > { %2913 = vmatprep.subr.bf16.mxu1 %v1825_v0  ;;  %v1305_v0 = vld [vmem:[%s4577_s27 + $0x388] sm:$0xff] }
 0x18e   : > { %2873 = vmatpush1.bf16.msra.mxu0 %v1760_v5  ;;  %v1865_v5 = vunpack.c.l.s8.bf16 %v1273_v63 }
 0x18f   : > { %2914 = vmatpush1.bf16.msra.mxu1 %v1824_v6  ;;  %2874 = vmatprep.subr.bf16.mxu0 %v1765_v7  ;;  %v1929_v6 = vunpack.c.l.s8.bf16 %v1305_v0  ;;  %v1272_v7 = vld [vmem:[%s4577_s27 + $0x280] sm:$0xff] }
 0x190   : > { %2915 = vmatprep.subr.bf16.mxu1 %v1829_v8  ;;  %v1304_v8 = vld [vmem:[%s4577_s27 + $0x380] sm:$0xff]  ;;  %v1864_v10 = vunpack.c.l.s8.bf16 %v1272_v7  ;;  %v1868_v17 = vunpack.c.h.s8.bf16 %v1272_v7 }
 0x191   : > { %v1928_v11 = vunpack.c.l.s8.bf16 %v1304_v8  ;;  %v1932_v18 = vunpack.c.h.s8.bf16 %v1304_v8 }
 0x192   : > { %2875 = vmatpush1.bf16.msra.mxu0 %v1764_v13  ;;  %v1869_v13 = vunpack.c.h.s8.bf16 %v1273_v63  ;;  %v4910_v63 = vcombine.low %v4859_v21, %v4859_v21  ;;  %v1325_v21 = vld [vmem:[%s4577_s27 + $0x428] sm:$0xff] }
 0x193   : > { %2916 = vmatpush1.bf16.msra.mxu1 %v1828_v14  ;;  %2926 = vmatprep.subr.bf16.mxu0 %v1833_v15  ;;  %v1933_v14 = vunpack.c.h.s8.bf16 %v1305_v0  ;;  %v1277_v15 = vld [vmem:[%s4577_s27 + $0x2a8] sm:$0xff]  ;;  %v4914_v0 = vcombine.low %v4862_v22, %v4862_v22 }
 0x194   : > { %2967 = vmatprep.subr.bf16.mxu1 %v1897_v16  ;;  %v1309_v16 = vld [vmem:[%s4577_s27 + $0x3a8] sm:$0xff] }
 0x195   : > { %2877 = vmatmul.mubr.bf16.vlgmr.msra.gmra.mrb[0].mxu0 %v4852_v19 }
 0x196   : > { %2918 = vmatmul.mubr.bf16.vlgmr.msra.gmra.mrb[0].mxu1 %v4856_v20  ;;  %2927 = vmatpush1.bf16.msra.mxu0 %v1832_v49  ;;  %v1873_v49 = vunpack.c.l.s8.bf16 %v1277_v15 }
 0x197   : > { %2968 = vmatpush1.bf16.msra.mxu1 %v1896_v23  ;;  %2928 = vmatprep.subr.bf16.mxu0 %v1837_v24  ;;  %v1937_v23 = vunpack.c.l.s8.bf16 %v1309_v16  ;;  %v1276_v24 = vld [vmem:[%s4577_s27 + $0x2a0] sm:$0xff] }
 0x198   : > { %2969 = vmatprep.subr.bf16.mxu1 %v1901_v25  ;;  %2958 = vmatprep.mubr.bf16.mxu0 %v4868_v4  ;;  %v1308_v25 = vld [vmem:[%s4577_s27 + $0x3a0] sm:$0xff]  ;;  %v1872_v3 = vunpack.c.l.s8.bf16 %v1276_v24  ;;  %v1876_v32 = vunpack.c.h.s8.bf16 %v1276_v24  ;;  %v1973_v24 = vunpack.c.h.s8.bf16 %v1325_v21 }
 0x199   : > { %2999 = vmatprep.mubr.bf16.mxu1 %v4872_v27  ;;  %v1936_v26 = vunpack.c.l.s8.bf16 %v1308_v25  ;;  %v1940_v33 = vunpack.c.h.s8.bf16 %v1308_v25 }
 0x19a   : > { %2929 = vmatpush1.bf16.msra.mxu0 %v1836_v28  ;;  %v1877_v28 = vunpack.c.h.s8.bf16 %v1277_v15  ;;  %v1969_v15 = vunpack.c.l.s8.bf16 %v1325_v21 }
 0x19b   : > { %2970 = vmatpush1.bf16.msra.mxu1 %v1900_v29  ;;  %2930 = vmatprep.subr.bf16.mxu0 %v1841_v30  ;;  %v1941_v29 = vunpack.c.h.s8.bf16 %v1309_v16  ;;  %v1281_v30 = vld [vmem:[%s4577_s27 + $0x2c8] sm:$0xff] }
 0x19c   : > { %2971 = vmatprep.subr.bf16.mxu1 %v1905_v31  ;;  %v1313_v31 = vld [vmem:[%s4577_s27 + $0x3c8] sm:$0xff] }
 0x19e   : > { %2931 = vmatpush1.bf16.msra.mxu0 %v1840_v50  ;;  %v1881_v50 = vunpack.c.l.s8.bf16 %v1281_v30 }
 0x19f   : > { %2972 = vmatpush1.bf16.msra.mxu1 %v1904_v34  ;;  %2932 = vmatprep.subr.bf16.mxu0 %v1845_v51  ;;  %v1945_v34 = vunpack.c.l.s8.bf16 %v1313_v31  ;;  %v1280_v51 = vld [vmem:[%s4577_s27 + $0x2c0] sm:$0xff] }
 0x1a0   : > { %2973 = vmatprep.subr.bf16.mxu1 %v1909_v52  ;;  %v1312_v52 = vld [vmem:[%s4577_s27 + $0x3c0] sm:$0xff]  ;;  %v1880_v35 = vunpack.c.l.s8.bf16 %v1280_v51  ;;  %v1884_v41 = vunpack.c.h.s8.bf16 %v1280_v51 }
 0x1a1   : > { %v1944_v36 = vunpack.c.l.s8.bf16 %v1312_v52  ;;  %v1948_v42 = vunpack.c.h.s8.bf16 %v1312_v52 }
 0x1a2   : > { %2933 = vmatpush1.bf16.msra.mxu0 %v1844_v37  ;;  %v1885_v37 = vunpack.c.h.s8.bf16 %v1281_v30 }
 0x1a3   : > { %2974 = vmatpush1.bf16.msra.mxu1 %v1908_v38  ;;  %2934 = vmatprep.subr.bf16.mxu0 %v1849_v39  ;;  %v1949_v38 = vunpack.c.h.s8.bf16 %v1313_v31  ;;  %v1285_v39 = vld [vmem:[%s4577_s27 + $0x2e8] sm:$0xff] }
 0x1a4   : > { %2975 = vmatprep.subr.bf16.mxu1 %v1913_v40  ;;  %v1317_v40 = vld [vmem:[%s4577_s27 + $0x3e8] sm:$0xff] }
 0x1a6   : > { %2935 = vmatpush1.bf16.msra.mxu0 %v1848_v43  ;;  %v1889_v43 = vunpack.c.l.s8.bf16 %v1285_v39 }
 0x1a7   : > { %2976 = vmatpush1.bf16.msra.mxu1 %v1912_v44  ;;  %2936 = vmatprep.subr.bf16.mxu0 %v1853_v45  ;;  %v1953_v44 = vunpack.c.l.s8.bf16 %v1317_v40  ;;  %v1284_v45 = vld [vmem:[%s4577_s27 + $0x2e0] sm:$0xff] }
 0x1a8   : > { %2977 = vmatprep.subr.bf16.mxu1 %v1917_v46  ;;  %v1316_v46 = vld [vmem:[%s4577_s27 + $0x3e0] sm:$0xff]  ;;  %v1888_v47 = vunpack.c.l.s8.bf16 %v1284_v45  ;;  %v1892_v57 = vunpack.c.h.s8.bf16 %v1284_v45 }
 0x1a9   : > { %v1952_v48 = vunpack.c.l.s8.bf16 %v1316_v46  ;;  %v1956_v58 = vunpack.c.h.s8.bf16 %v1316_v46 }
 0x1aa   : > { %2937 = vmatpush1.bf16.msra.mxu0 %v1852_v53  ;;  %v1893_v53 = vunpack.c.h.s8.bf16 %v1285_v39 }
 0x1ab   : > { %2978 = vmatpush1.bf16.msra.mxu1 %v1916_v54  ;;  %2938 = vmatprep.subr.bf16.mxu0 %v1857_v55  ;;  %v1957_v54 = vunpack.c.h.s8.bf16 %v1317_v40  ;;  %v1321_v55 = vld [vmem:[%s4577_s27 + $0x408] sm:$0xff] }
 0x1ac   : > { %2979 = vmatprep.subr.bf16.mxu1 %v1921_v56  ;;  %v1353_v56 = vld [vmem:[%s4577_s27 + $0x508] sm:$0xff]  ;;  %v1965_v7 = vunpack.c.h.s8.bf16 %v1321_v55 }
 0x1ad   : > { %v2029_v8 = vunpack.c.h.s8.bf16 %v1353_v56 }
 0x1ae   : > { %2939 = vmatpush1.bf16.msra.mxu0 %v1856_v59  ;;  %v1961_v59 = vunpack.c.l.s8.bf16 %v1321_v55 }
 0x1af   : > { %2980 = vmatpush1.bf16.msra.mxu1 %v1920_v60  ;;  %2940 = vmatprep.subr.bf16.mxu0 %v1861_v61  ;;  %v2025_v60 = vunpack.c.l.s8.bf16 %v1353_v56  ;;  %v1320_v61 = vld [vmem:[%s4577_s27 + $0x400] sm:$0xff] }
 0x1b0   : > { %2981 = vmatprep.subr.bf16.mxu1 %v1925_v62  ;;  %v1352_v62 = vld [vmem:[%s4577_s27 + $0x500] sm:$0xff] }
 0x1b2   : > { %2941 = vmatpush1.bf16.msra.mxu0 %v1860_v1  ;;  %v4917_v1 = vld [vmem:[%s4808_s29 + $0x20] sm:$0xff] }
 0x1b3   : > { %2982 = vmatpush1.bf16.msra.mxu1 %v1924_v2  ;;  %2942 = vmatprep.subr.bf16.mxu0 %v1865_v5  ;;  %v4920_v2 = vld [vmem:[%s4808_s29 + $0x28] sm:$0xff]  ;;  %v1960_v5 = vunpack.c.l.s8.bf16 %v1320_v61  ;;  %v4926_v22 = vcombine.high %v4917_v1, %v4917_v1 }
 0x1b4   : > { %2983 = vmatprep.subr.bf16.mxu1 %v1929_v6  ;;  %v2024_v6 = vunpack.c.l.s8.bf16 %v1352_v62 }
 0x1b6   : > { %2943 = vmatpush1.bf16.msra.mxu0 %v1864_v10  ;;  %v1357_v10 = vld [vmem:[%s4577_s27 + $0x528] sm:$0xff] }
 0x1b7   : > { %2984 = vmatpush1.bf16.msra.mxu1 %v1928_v11  ;;  %2944 = vmatprep.subr.bf16.mxu0 %v1869_v13  ;;  %v4930_v11 = vcombine.high %v4920_v2, %v4920_v2  ;;  %v1964_v13 = vunpack.c.h.s8.bf16 %v1320_v61  ;;  %v2033_v16 = vunpack.c.l.s8.bf16 %v1357_v10  ;;  %v2037_v25 = vunpack.c.h.s8.bf16 %v1357_v10 }
 0x1b8   : > { %2985 = vmatprep.subr.bf16.mxu1 %v1933_v14  ;;  %v2028_v14 = vunpack.c.h.s8.bf16 %v1352_v62 }
 0x1ba   : > { %2945 = vmatpush1.bf16.msra.mxu0 %v1868_v17  ;;  %v1324_v17 = vld [vmem:[%s4577_s27 + $0x420] sm:$0xff] }
 0x1bb   : > { %2986 = vmatpush1.bf16.msra.mxu1 %v1932_v18  ;;  %2946 = vmatprep.subr.bf16.mxu0 %v1873_v49  ;;  %v1356_v18 = vld [vmem:[%s4577_s27 + $0x520] sm:$0xff]  ;;  %v1968_v49 = vunpack.c.l.s8.bf16 %v1324_v17 }
 0x1bc   : > { %2987 = vmatprep.subr.bf16.mxu1 %v1937_v23  ;;  %v2032_v23 = vunpack.c.l.s8.bf16 %v1356_v18 }
 0x1be   : > { %2947 = vmatpush1.bf16.msra.mxu0 %v1872_v3  ;;  %v1329_v3 = vld [vmem:[%s4577_s27 + $0x448] sm:$0xff] }
 0x1bf   : > { %2988 = vmatpush1.bf16.msra.mxu1 %v1936_v26  ;;  %2948 = vmatprep.subr.bf16.mxu0 %v1877_v28  ;;  %v1361_v26 = vld [vmem:[%s4577_s27 + $0x548] sm:$0xff]  ;;  %v1972_v28 = vunpack.c.h.s8.bf16 %v1324_v17  ;;  %v1977_v30 = vunpack.c.l.s8.bf16 %v1329_v3  ;;  %v1981_v51 = vunpack.c.h.s8.bf16 %v1329_v3 }
 0x1c0   : > { %2989 = vmatprep.subr.bf16.mxu1 %v1941_v29  ;;  %v2036_v29 = vunpack.c.h.s8.bf16 %v1356_v18  ;;  %v2041_v31 = vunpack.c.l.s8.bf16 %v1361_v26  ;;  %v2045_v52 = vunpack.c.h.s8.bf16 %v1361_v26 }
 0x1c2   : > { %2949 = vmatpush1.bf16.msra.mxu0 %v1876_v32  ;;  %v1328_v32 = vld [vmem:[%s4577_s27 + $0x440] sm:$0xff] }
 0x1c3   : > { %2990 = vmatpush1.bf16.msra.mxu1 %v1940_v33  ;;  %2950 = vmatprep.subr.bf16.mxu0 %v1881_v50  ;;  %v1360_v33 = vld [vmem:[%s4577_s27 + $0x540] sm:$0xff]  ;;  %v1976_v50 = vunpack.c.l.s8.bf16 %v1328_v32 }
 0x1c4   : > { %2991 = vmatprep.subr.bf16.mxu1 %v1945_v34  ;;  %v2040_v34 = vunpack.c.l.s8.bf16 %v1360_v33 }
 0x1c6   : > { %2951 = vmatpush1.bf16.msra.mxu0 %v1880_v35  ;;  %v1333_v35 = vld [vmem:[%s4577_s27 + $0x468] sm:$0xff] }
 0x1c7   : > { %2992 = vmatpush1.bf16.msra.mxu1 %v1944_v36  ;;  %2952 = vmatprep.subr.bf16.mxu0 %v1885_v37  ;;  %v1365_v36 = vld [vmem:[%s4577_s27 + $0x568] sm:$0xff]  ;;  %v1980_v37 = vunpack.c.h.s8.bf16 %v1328_v32  ;;  %v1985_v39 = vunpack.c.l.s8.bf16 %v1333_v35  ;;  %v1989_v45 = vunpack.c.h.s8.bf16 %v1333_v35 }
 0x1c8   : > { %2993 = vmatprep.subr.bf16.mxu1 %v1949_v38  ;;  %v2044_v38 = vunpack.c.h.s8.bf16 %v1360_v33  ;;  %v2049_v40 = vunpack.c.l.s8.bf16 %v1365_v36  ;;  %v2053_v46 = vunpack.c.h.s8.bf16 %v1365_v36 }
 0x1ca   : > { %2953 = vmatpush1.bf16.msra.mxu0 %v1884_v41  ;;  %v1332_v41 = vld [vmem:[%s4577_s27 + $0x460] sm:$0xff] }
 0x1cb   : > { %2994 = vmatpush1.bf16.msra.mxu1 %v1948_v42  ;;  %2954 = vmatprep.subr.bf16.mxu0 %v1889_v43  ;;  %v1364_v42 = vld [vmem:[%s4577_s27 + $0x560] sm:$0xff]  ;;  %v1984_v43 = vunpack.c.l.s8.bf16 %v1332_v41 }
 0x1cc   : > { %2995 = vmatprep.subr.bf16.mxu1 %v1953_v44  ;;  %v2048_v44 = vunpack.c.l.s8.bf16 %v1364_v42 }
 0x1ce   : > { %2955 = vmatpush1.bf16.msra.mxu0 %v1888_v47  ;;  %v1337_v47 = vld [vmem:[%s4577_s27 + $0x488] sm:$0xff] }
 0x1cf   : > { %2996 = vmatpush1.bf16.msra.mxu1 %v1952_v48  ;;  %2956 = vmatprep.subr.bf16.mxu0 %v1893_v53  ;;  %v1369_v48 = vld [vmem:[%s4577_s27 + $0x588] sm:$0xff]  ;;  %v1988_v53 = vunpack.c.h.s8.bf16 %v1332_v41  ;;  %v1993_v55 = vunpack.c.l.s8.bf16 %v1337_v47  ;;  %v1997_v61 = vunpack.c.h.s8.bf16 %v1337_v47 }
 0x1d0   : > { %2997 = vmatprep.subr.bf16.mxu1 %v1957_v54  ;;  %v2052_v54 = vunpack.c.h.s8.bf16 %v1364_v42  ;;  %v2057_v56 = vunpack.c.l.s8.bf16 %v1369_v48  ;;  %v2061_v62 = vunpack.c.h.s8.bf16 %v1369_v48 }
 0x1d2   : > { %2957 = vmatpush1.bf16.msra.mxu0 %v1892_v57  ;;  %v1336_v57 = vld [vmem:[%s4577_s27 + $0x480] sm:$0xff] }
 0x1d3   : > { %2998 = vmatpush1.bf16.msra.mxu1 %v1956_v58  ;;  %3008 = vmatprep.subr.bf16.mxu0 %v1961_v59  ;;  %v1368_v58 = vld [vmem:[%s4577_s27 + $0x580] sm:$0xff]  ;;  %v1992_v59 = vunpack.c.l.s8.bf16 %v1336_v57 }
 0x1d4   : > { %3049 = vmatprep.subr.bf16.mxu1 %v2025_v60  ;;  %v2056_v60 = vunpack.c.l.s8.bf16 %v1368_v58 }
 0x1d5   : > { %2959 = vmatmul.mubr.bf16.vlgmr.msra.gmra.mrb[4].mxu0 %v4910_v63 }
 0x1d6   : > { %3000 = vmatmul.mubr.bf16.vlgmr.msra.gmra.mrb[4].mxu1 %v4914_v0  ;;  %3009 = vmatpush1.bf16.msra.mxu0 %v1960_v5  ;;  %v1341_v5 = vld [vmem:[%s4577_s27 + $0x4a8] sm:$0xff] }
 0x1d7   : > { %3050 = vmatpush1.bf16.msra.mxu1 %v2024_v6  ;;  %3010 = vmatprep.subr.bf16.mxu0 %v1965_v7  ;;  %v1373_v6 = vld [vmem:[%s4577_s27 + $0x5a8] sm:$0xff]  ;;  %v1996_v7 = vunpack.c.h.s8.bf16 %v1336_v57  ;;  %v2001_v21 = vunpack.c.l.s8.bf16 %v1341_v5  ;;  %v2005_v17 = vunpack.c.h.s8.bf16 %v1341_v5  ;;  %v4975_v57 = vld [vmem:[%s4808_s29 + $0x30] sm:$0xff] }
 0x1d8   : > { %3051 = vmatprep.subr.bf16.mxu1 %v2029_v8  ;;  %3040 = vmatprep.mubr.bf16.mxu0 %v4926_v22  ;;  %v2060_v8 = vunpack.c.h.s8.bf16 %v1368_v58  ;;  %v2065_v10 = vunpack.c.l.s8.bf16 %v1373_v6  ;;  %v2069_v18 = vunpack.c.h.s8.bf16 %v1373_v6  ;;  %v4978_v58 = vld [vmem:[%s4808_s29 + $0x38] sm:$0xff]  ;;  %v1421_v5 = vld [vmem:[%s4577_s27 + $0x728] sm:$0xff] }
 0x1d9   : > { %3081 = vmatprep.mubr.bf16.mxu1 %v4930_v11  ;;  %v4988_v6 = vcombine.high %v4978_v58, %v4978_v58 }
 0x1da   : > { %3011 = vmatpush1.bf16.msra.mxu0 %v1964_v13  ;;  %v1340_v13 = vld [vmem:[%s4577_s27 + $0x4a0] sm:$0xff] }
 0x1db   : > { %3052 = vmatpush1.bf16.msra.mxu1 %v2028_v14  ;;  %3012 = vmatprep.subr.bf16.mxu0 %v1969_v15  ;;  %v1372_v14 = vld [vmem:[%s4577_s27 + $0x5a0] sm:$0xff]  ;;  %v2000_v15 = vunpack.c.l.s8.bf16 %v1340_v13 }
 0x1dc   : > { %3053 = vmatprep.subr.bf16.mxu1 %v2033_v16  ;;  %v2064_v16 = vunpack.c.l.s8.bf16 %v1372_v14 }
 0x1de   : > { %3013 = vmatpush1.bf16.msra.mxu0 %v1968_v49  ;;  %v1345_v49 = vld [vmem:[%s4577_s27 + $0x4c8] sm:$0xff] }
 0x1df   : > { %3054 = vmatpush1.bf16.msra.mxu1 %v2032_v23  ;;  %3014 = vmatprep.subr.bf16.mxu0 %v1973_v24  ;;  %v1377_v23 = vld [vmem:[%s4577_s27 + $0x5c8] sm:$0xff]  ;;  %v2004_v24 = vunpack.c.h.s8.bf16 %v1340_v13  ;;  %v2009_v3 = vunpack.c.l.s8.bf16 %v1345_v49  ;;  %v2013_v32 = vunpack.c.h.s8.bf16 %v1345_v49  ;;  %v1388_v13 = vld [vmem:[%s4577_s27 + $0x620] sm:$0xff] }
 0x1e0   : > { %3055 = vmatprep.subr.bf16.mxu1 %v2037_v25  ;;  %v2068_v25 = vunpack.c.h.s8.bf16 %v1372_v14  ;;  %v2073_v26 = vunpack.c.l.s8.bf16 %v1377_v23  ;;  %v2077_v33 = vunpack.c.h.s8.bf16 %v1377_v23  ;;  %v1420_v14 = vld [vmem:[%s4577_s27 + $0x720] sm:$0xff]  ;;  %v1393_v49 = vld [vmem:[%s4577_s27 + $0x648] sm:$0xff] }
 0x1e1   : > { %v1425_v23 = vld [vmem:[%s4577_s27 + $0x748] sm:$0xff] }
 0x1e2   : > { %3015 = vmatpush1.bf16.msra.mxu0 %v1972_v28  ;;  %v1344_v28 = vld [vmem:[%s4577_s27 + $0x4c0] sm:$0xff] }
 0x1e3   : > { %3056 = vmatpush1.bf16.msra.mxu1 %v2036_v29  ;;  %3016 = vmatprep.subr.bf16.mxu0 %v1977_v30  ;;  %v1376_v29 = vld [vmem:[%s4577_s27 + $0x5c0] sm:$0xff]  ;;  %v2008_v30 = vunpack.c.l.s8.bf16 %v1344_v28 }
 0x1e4   : > { %3057 = vmatprep.subr.bf16.mxu1 %v2041_v31  ;;  %v2072_v31 = vunpack.c.l.s8.bf16 %v1376_v29 }
 0x1e6   : > { %3017 = vmatpush1.bf16.msra.mxu0 %v1976_v50  ;;  %v1349_v50 = vld [vmem:[%s4577_s27 + $0x4e8] sm:$0xff] }
 0x1e7   : > { %3058 = vmatpush1.bf16.msra.mxu1 %v2040_v34  ;;  %3018 = vmatprep.subr.bf16.mxu0 %v1981_v51  ;;  %v1381_v34 = vld [vmem:[%s4577_s27 + $0x5e8] sm:$0xff]  ;;  %v2012_v51 = vunpack.c.h.s8.bf16 %v1344_v28  ;;  %v2017_v35 = vunpack.c.l.s8.bf16 %v1349_v50  ;;  %v2021_v41 = vunpack.c.h.s8.bf16 %v1349_v50  ;;  %v1392_v28 = vld [vmem:[%s4577_s27 + $0x640] sm:$0xff] }
 0x1e8   : > { %3059 = vmatprep.subr.bf16.mxu1 %v2045_v52  ;;  %v2076_v52 = vunpack.c.h.s8.bf16 %v1376_v29  ;;  %v2081_v36 = vunpack.c.l.s8.bf16 %v1381_v34  ;;  %v2085_v42 = vunpack.c.h.s8.bf16 %v1381_v34  ;;  %v1424_v29 = vld [vmem:[%s4577_s27 + $0x740] sm:$0xff]  ;;  %v1397_v50 = vld [vmem:[%s4577_s27 + $0x668] sm:$0xff] }
 0x1e9   : > { %v1429_v34 = vld [vmem:[%s4577_s27 + $0x768] sm:$0xff] }
 0x1ea   : > { %3019 = vmatpush1.bf16.msra.mxu0 %v1980_v37  ;;  %v1348_v37 = vld [vmem:[%s4577_s27 + $0x4e0] sm:$0xff] }
 0x1eb   : > { %3060 = vmatpush1.bf16.msra.mxu1 %v2044_v38  ;;  %3020 = vmatprep.subr.bf16.mxu0 %v1985_v39  ;;  %v1380_v38 = vld [vmem:[%s4577_s27 + $0x5e0] sm:$0xff]  ;;  %v2016_v39 = vunpack.c.l.s8.bf16 %v1348_v37 }
 0x1ec   : > { %3061 = vmatprep.subr.bf16.mxu1 %v2049_v40  ;;  %v2080_v40 = vunpack.c.l.s8.bf16 %v1380_v38 }
 0x1ee   : > { %3021 = vmatpush1.bf16.msra.mxu0 %v1984_v43  ;;  %v1385_v43 = vld [vmem:[%s4577_s27 + $0x608] sm:$0xff] }
 0x1ef   : > { %3062 = vmatpush1.bf16.msra.mxu1 %v2048_v44  ;;  %3022 = vmatprep.subr.bf16.mxu0 %v1989_v45  ;;  %v1417_v44 = vld [vmem:[%s4577_s27 + $0x708] sm:$0xff]  ;;  %v2020_v45 = vunpack.c.h.s8.bf16 %v1348_v37  ;;  %v2089_v47 = vunpack.c.l.s8.bf16 %v1385_v43  ;;  %v1396_v37 = vld [vmem:[%s4577_s27 + $0x660] sm:$0xff] }
 0x1f0   : > { %3063 = vmatprep.subr.bf16.mxu1 %v2053_v46  ;;  %v2084_v46 = vunpack.c.h.s8.bf16 %v1380_v38  ;;  %v2153_v48 = vunpack.c.l.s8.bf16 %v1417_v44  ;;  %v1428_v38 = vld [vmem:[%s4577_s27 + $0x760] sm:$0xff] }
 0x1f2   : > { %3023 = vmatpush1.bf16.msra.mxu0 %v1988_v53  ;;  %v1384_v53 = vld [vmem:[%s4577_s27 + $0x600] sm:$0xff] }
 0x1f3   : > { %3064 = vmatpush1.bf16.msra.mxu1 %v2052_v54  ;;  %3024 = vmatprep.subr.bf16.mxu0 %v1993_v55  ;;  %v1416_v54 = vld [vmem:[%s4577_s27 + $0x700] sm:$0xff]  ;;  %v4968_v55 = vcombine.low %v4917_v1, %v4917_v1  ;;  %v1389_v1 = vld [vmem:[%s4577_s27 + $0x628] sm:$0xff] }
 0x1f4   : > { %3065 = vmatprep.subr.bf16.mxu1 %v2057_v56  ;;  %v4972_v56 = vcombine.low %v4920_v2, %v4920_v2  ;;  %v4984_v2 = vcombine.high %v4975_v57, %v4975_v57 }
 0x1f6   : > { %3025 = vmatpush1.bf16.msra.mxu0 %v1992_v59  ;;  %v2088_v59 = vunpack.c.l.s8.bf16 %v1384_v53 }
 0x1f7   : > { %3066 = vmatpush1.bf16.msra.mxu1 %v2056_v60  ;;  %3026 = vmatprep.subr.bf16.mxu0 %v1997_v61  ;;  %v2152_v60 = vunpack.c.l.s8.bf16 %v1416_v54  ;;  %v2093_v61 = vunpack.c.h.s8.bf16 %v1385_v43  ;;  %v1401_v43 = vld [vmem:[%s4577_s27 + $0x688] sm:$0xff] }
 0x1f8   : > { %3067 = vmatprep.subr.bf16.mxu1 %v2061_v62  ;;  %v2157_v62 = vunpack.c.h.s8.bf16 %v1417_v44  ;;  %v1433_v44 = vld [vmem:[%s4577_s27 + $0x788] sm:$0xff] }
 0x1fa   : > { %3027 = vmatpush1.bf16.msra.mxu0 %v1996_v7  ;;  %v2092_v7 = vunpack.c.h.s8.bf16 %v1384_v53  ;;  %v1400_v53 = vld [vmem:[%s4577_s27 + $0x680] sm:$0xff] }
 0x1fb   : > { %3068 = vmatpush1.bf16.msra.mxu1 %v2060_v8  ;;  %3028 = vmatprep.subr.bf16.mxu0 %v2001_v21  ;;  %v2156_v8 = vunpack.c.h.s8.bf16 %v1416_v54  ;;  %v2097_v21 = vunpack.c.l.s8.bf16 %v1389_v1  ;;  %v1432_v54 = vld [vmem:[%s4577_s27 + $0x780] sm:$0xff] }
 0x1fc   : > { %3069 = vmatprep.subr.bf16.mxu1 %v2065_v10  ;;  %v2161_v10 = vunpack.c.l.s8.bf16 %v1421_v5 }
 0x1fe   : > { %3029 = vmatpush1.bf16.msra.mxu0 %v2000_v15  ;;  %v2096_v15 = vunpack.c.l.s8.bf16 %v1388_v13 }
 0x1ff   : > { %3070 = vmatpush1.bf16.msra.mxu1 %v2064_v16  ;;  %3030 = vmatprep.subr.bf16.mxu0 %v2005_v17  ;;  %v2160_v16 = vunpack.c.l.s8.bf16 %v1420_v14  ;;  %v2101_v17 = vunpack.c.h.s8.bf16 %v1389_v1  ;;  %v1405_v1 = vld [vmem:[%s4577_s27 + $0x6a8] sm:$0xff] }
 0x200   : > { %3071 = vmatprep.subr.bf16.mxu1 %v2069_v18  ;;  %v2165_v18 = vunpack.c.h.s8.bf16 %v1421_v5  ;;  %v1437_v5 = vld [vmem:[%s4577_s27 + $0x7a8] sm:$0xff] }
 0x202   : > { %3031 = vmatpush1.bf16.msra.mxu0 %v2004_v24  ;;  %v2100_v24 = vunpack.c.h.s8.bf16 %v1388_v13  ;;  %v1404_v13 = vld [vmem:[%s4577_s27 + $0x6a0] sm:$0xff] }
 0x203   : > { %3072 = vmatpush1.bf16.msra.mxu1 %v2068_v25  ;;  %3032 = vmatprep.subr.bf16.mxu0 %v2009_v3  ;;  %v2164_v25 = vunpack.c.h.s8.bf16 %v1420_v14  ;;  %v2105_v3 = vunpack.c.l.s8.bf16 %v1393_v49  ;;  %v1436_v14 = vld [vmem:[%s4577_s27 + $0x7a0] sm:$0xff] }
 0x204   : > { %3073 = vmatprep.subr.bf16.mxu1 %v2073_v26  ;;  %v2169_v26 = vunpack.c.l.s8.bf16 %v1425_v23 }
 0x206   : > { %3033 = vmatpush1.bf16.msra.mxu0 %v2008_v30  ;;  %v2104_v30 = vunpack.c.l.s8.bf16 %v1392_v28 }
 0x207   : > { %3074 = vmatpush1.bf16.msra.mxu1 %v2072_v31  ;;  %3034 = vmatprep.subr.bf16.mxu0 %v2013_v32  ;;  %v2168_v31 = vunpack.c.l.s8.bf16 %v1424_v29  ;;  %v2109_v32 = vunpack.c.h.s8.bf16 %v1393_v49  ;;  %v1409_v49 = vld [vmem:[%s4577_s27 + $0x6c8] sm:$0xff] }
 0x208   : > { %3075 = vmatprep.subr.bf16.mxu1 %v2077_v33  ;;  %v2173_v33 = vunpack.c.h.s8.bf16 %v1425_v23  ;;  %v1441_v23 = vld [vmem:[%s4577_s27 + $0x7c8] sm:$0xff] }
 0x20a   : > { %3035 = vmatpush1.bf16.msra.mxu0 %v2012_v51  ;;  %v2108_v51 = vunpack.c.h.s8.bf16 %v1392_v28  ;;  %v1408_v28 = vld [vmem:[%s4577_s27 + $0x6c0] sm:$0xff] }
 0x20b   : > { %3076 = vmatpush1.bf16.msra.mxu1 %v2076_v52  ;;  %3036 = vmatprep.subr.bf16.mxu0 %v2017_v35  ;;  %v2172_v52 = vunpack.c.h.s8.bf16 %v1424_v29  ;;  %v2113_v35 = vunpack.c.l.s8.bf16 %v1397_v50  ;;  %v1440_v29 = vld [vmem:[%s4577_s27 + $0x7c0] sm:$0xff] }
 0x20c   : > { %3077 = vmatprep.subr.bf16.mxu1 %v2081_v36  ;;  %v2177_v36 = vunpack.c.l.s8.bf16 %v1429_v34 }
 0x20e   : > { %3037 = vmatpush1.bf16.msra.mxu0 %v2016_v39  ;;  %v2112_v39 = vunpack.c.l.s8.bf16 %v1396_v37 }
 0x20f   : > { %3078 = vmatpush1.bf16.msra.mxu1 %v2080_v40  ;;  %3038 = vmatprep.subr.bf16.mxu0 %v2021_v41  ;;  %v2176_v40 = vunpack.c.l.s8.bf16 %v1428_v38  ;;  %v2117_v41 = vunpack.c.h.s8.bf16 %v1397_v50  ;;  %v1413_v50 = vld [vmem:[%s4577_s27 + $0x6e8] sm:$0xff] }
 0x210   : > { %3079 = vmatprep.subr.bf16.mxu1 %v2085_v42  ;;  %v2181_v42 = vunpack.c.h.s8.bf16 %v1429_v34  ;;  %v1445_v34 = vld [vmem:[%s4577_s27 + $0x7e8] sm:$0xff] }
 0x212   : > { %3039 = vmatpush1.bf16.msra.mxu0 %v2020_v45  ;;  %v2116_v45 = vunpack.c.h.s8.bf16 %v1396_v37  ;;  %v1412_v37 = vld [vmem:[%s4577_s27 + $0x6e0] sm:$0xff] }
 0x213   : > { %3080 = vmatpush1.bf16.msra.mxu1 %v2084_v46  ;;  %3090 = vmatprep.subr.bf16.mxu0 %v2089_v47  ;;  %v2180_v46 = vunpack.c.h.s8.bf16 %v1428_v38  ;;  %v2121_v47 = vunpack.c.l.s8.bf16 %v1401_v43  ;;  %v1444_v38 = vld [vmem:[%s4577_s27 + $0x7e0] sm:$0xff] }
 0x214   : > { %3131 = vmatprep.subr.bf16.mxu1 %v2153_v48  ;;  %v2185_v48 = vunpack.c.l.s8.bf16 %v1433_v44 }
 0x215   : > { %3041 = vmatmul.mubr.bf16.vlgmr.msra.gmra.mrb[8].mxu0 %v4968_v55 }
 0x216   : > { %3082 = vmatmul.mubr.bf16.vlgmr.msra.gmra.mrb[8].mxu1 %v4972_v56  ;;  %3091 = vmatpush1.bf16.msra.mxu0 %v2088_v59  ;;  %v2120_v59 = vunpack.c.l.s8.bf16 %v1400_v53 }
 0x217   : > { %3132 = vmatpush1.bf16.msra.mxu1 %v2152_v60  ;;  %3092 = vmatprep.subr.bf16.mxu0 %v2093_v61  ;;  %v2184_v60 = vunpack.c.l.s8.bf16 %v1432_v54  ;;  %v2125_v61 = vunpack.c.h.s8.bf16 %v1401_v43  ;;  %v1449_v43 = vld [vmem:[%s4577_s27 + $0x808] sm:$0xff] }
 0x218   : > { %3133 = vmatprep.subr.bf16.mxu1 %v2157_v62  ;;  %3122 = vmatprep.mubr.bf16.mxu0 %v4984_v2  ;;  %v2189_v62 = vunpack.c.h.s8.bf16 %v1433_v44  ;;  %v1481_v44 = vld [vmem:[%s4577_s27 + $0x908] sm:$0xff] }
 0x219   : > { %3163 = vmatprep.mubr.bf16.mxu1 %v4988_v6 }
 0x21a   : > { %3093 = vmatpush1.bf16.msra.mxu0 %v2092_v7  ;;  %v2124_v7 = vunpack.c.h.s8.bf16 %v1400_v53  ;;  %v1448_v53 = vld [vmem:[%s4577_s27 + $0x800] sm:$0xff] }
 0x21b   : > { %3134 = vmatpush1.bf16.msra.mxu1 %v2156_v8  ;;  %3094 = vmatprep.subr.bf16.mxu0 %v2097_v21  ;;  %v2188_v8 = vunpack.c.h.s8.bf16 %v1432_v54  ;;  %v2129_v21 = vunpack.c.l.s8.bf16 %v1405_v1  ;;  %v1480_v54 = vld [vmem:[%s4577_s27 + $0x900] sm:$0xff] }
 0x21c   : > { %3135 = vmatprep.subr.bf16.mxu1 %v2161_v10  ;;  %v2193_v10 = vunpack.c.l.s8.bf16 %v1437_v5 }
 0x21e   : > { %3095 = vmatpush1.bf16.msra.mxu0 %v2096_v15  ;;  %v2128_v15 = vunpack.c.l.s8.bf16 %v1404_v13 }
 0x21f   : > { %3136 = vmatpush1.bf16.msra.mxu1 %v2160_v16  ;;  %3096 = vmatprep.subr.bf16.mxu0 %v2101_v17  ;;  %v2192_v16 = vunpack.c.l.s8.bf16 %v1436_v14  ;;  %v2133_v17 = vunpack.c.h.s8.bf16 %v1405_v1  ;;  %v2216_v1 = vunpack.c.l.s8.bf16 %v1448_v53 }
 0x220   : > { %3137 = vmatprep.subr.bf16.mxu1 %v2165_v18  ;;  %v2197_v18 = vunpack.c.h.s8.bf16 %v1437_v5  ;;  %v2280_v5 = vunpack.c.l.s8.bf16 %v1480_v54 }
 0x222   : > { %3097 = vmatpush1.bf16.msra.mxu0 %v2100_v24  ;;  %v2132_v24 = vunpack.c.h.s8.bf16 %v1404_v13  ;;  %v2220_v13 = vunpack.c.h.s8.bf16 %v1448_v53 }
 0x223   : > { %3138 = vmatpush1.bf16.msra.mxu1 %v2164_v25  ;;  %3098 = vmatprep.subr.bf16.mxu0 %v2105_v3  ;;  %v2196_v25 = vunpack.c.h.s8.bf16 %v1436_v14  ;;  %v2137_v3 = vunpack.c.l.s8.bf16 %v1409_v49  ;;  %v2284_v14 = vunpack.c.h.s8.bf16 %v1480_v54 }
 0x224   : > { %3139 = vmatprep.subr.bf16.mxu1 %v2169_v26  ;;  %v2201_v26 = vunpack.c.l.s8.bf16 %v1441_v23 }
 0x226   : > { %3099 = vmatpush1.bf16.msra.mxu0 %v2104_v30  ;;  %v2136_v30 = vunpack.c.l.s8.bf16 %v1408_v28 }
 0x227   : > { %3140 = vmatpush1.bf16.msra.mxu1 %v2168_v31  ;;  %3100 = vmatprep.subr.bf16.mxu0 %v2109_v32  ;;  %v2200_v31 = vunpack.c.l.s8.bf16 %v1440_v29  ;;  %v2141_v32 = vunpack.c.h.s8.bf16 %v1409_v49 }
 0x228   : > { %3141 = vmatprep.subr.bf16.mxu1 %v2173_v33  ;;  %v2205_v33 = vunpack.c.h.s8.bf16 %v1441_v23 }
 0x22a   : > { %3101 = vmatpush1.bf16.msra.mxu0 %v2108_v51  ;;  %v2140_v51 = vunpack.c.h.s8.bf16 %v1408_v28 }
 0x22b   : > { %3142 = vmatpush1.bf16.msra.mxu1 %v2172_v52  ;;  %3102 = vmatprep.subr.bf16.mxu0 %v2113_v35  ;;  %v2204_v52 = vunpack.c.h.s8.bf16 %v1440_v29  ;;  %v2145_v35 = vunpack.c.l.s8.bf16 %v1413_v50 }
 0x22c   : > { %3143 = vmatprep.subr.bf16.mxu1 %v2177_v36  ;;  %v2209_v36 = vunpack.c.l.s8.bf16 %v1445_v34 }
 0x22e   : > { %3103 = vmatpush1.bf16.msra.mxu0 %v2112_v39  ;;  %v2144_v39 = vunpack.c.l.s8.bf16 %v1412_v37 }
 0x22f   : > { %3144 = vmatpush1.bf16.msra.mxu1 %v2176_v40  ;;  %3104 = vmatprep.subr.bf16.mxu0 %v2117_v41  ;;  %v2208_v40 = vunpack.c.l.s8.bf16 %v1444_v38  ;;  %v2149_v41 = vunpack.c.h.s8.bf16 %v1413_v50 }
 0x230   : > { %3145 = vmatprep.subr.bf16.mxu1 %v2181_v42  ;;  %v2213_v42 = vunpack.c.h.s8.bf16 %v1445_v34 }
 0x232   : > { %3105 = vmatpush1.bf16.msra.mxu0 %v2116_v45  ;;  %v2148_v45 = vunpack.c.h.s8.bf16 %v1412_v37 }
 0x233   : > { %3146 = vmatpush1.bf16.msra.mxu1 %v2180_v46  ;;  %3106 = vmatprep.subr.bf16.mxu0 %v2121_v47  ;;  %v2212_v46 = vunpack.c.h.s8.bf16 %v1444_v38  ;;  %v2217_v47 = vunpack.c.l.s8.bf16 %v1449_v43 }
 0x234   : > { %3147 = vmatprep.subr.bf16.mxu1 %v2185_v48  ;;  %v2281_v48 = vunpack.c.l.s8.bf16 %v1481_v44 }
 0x236   : > { %3107 = vmatpush1.bf16.msra.mxu0 %v2120_v59  ;;  %v5026_v59 = vcombine.low %v4975_v57, %v4975_v57  ;;  %v1453_v57 = vld [vmem:[%s4577_s27 + $0x828] sm:$0xff] }
 0x237   : > { %3148 = vmatpush1.bf16.msra.mxu1 %v2184_v60  ;;  %3108 = vmatprep.subr.bf16.mxu0 %v2125_v61  ;;  %v5030_v60 = vcombine.low %v4978_v58, %v4978_v58  ;;  %v5033_v61 = vld [vmem:[%s4808_s29 + $0x40] sm:$0xff] }
 0x238   : > { %3149 = vmatprep.subr.bf16.mxu1 %v2189_v62  ;;  %v5036_v62 = vld [vmem:[%s4808_s29 + $0x48] sm:$0xff]  ;;  %v5042_v58 = vcombine.high %v5033_v61, %v5033_v61 }
 0x23a   : > { %3109 = vmatpush1.bf16.msra.mxu0 %v2124_v7  ;;  %v2221_v7 = vunpack.c.h.s8.bf16 %v1449_v43 }
 0x23b   : > { %3150 = vmatpush1.bf16.msra.mxu1 %v2188_v8  ;;  %3110 = vmatprep.subr.bf16.mxu0 %v2129_v21  ;;  %v2285_v8 = vunpack.c.h.s8.bf16 %v1481_v44  ;;  %v1485_v21 = vld [vmem:[%s4577_s27 + $0x928] sm:$0xff] }
 0x23c   : > { %3151 = vmatprep.subr.bf16.mxu1 %v2193_v10  ;;  %v5046_v10 = vcombine.high %v5036_v62, %v5036_v62 }
 0x23e   : > { %3111 = vmatpush1.bf16.msra.mxu0 %v2128_v15  ;;  %v2225_v15 = vunpack.c.l.s8.bf16 %v1453_v57 }
 0x23f   : > { %3152 = vmatpush1.bf16.msra.mxu1 %v2192_v16  ;;  %3112 = vmatprep.subr.bf16.mxu0 %v2133_v17  ;;  %v2289_v16 = vunpack.c.l.s8.bf16 %v1485_v21  ;;  %v1452_v17 = vld [vmem:[%s4577_s27 + $0x820] sm:$0xff] }
 0x240   : > { %3153 = vmatprep.subr.bf16.mxu1 %v2197_v18  ;;  %v1484_v18 = vld [vmem:[%s4577_s27 + $0x920] sm:$0xff]  ;;  %v2224_v49 = vunpack.c.l.s8.bf16 %v1452_v17  ;;  %v2228_v28 = vunpack.c.h.s8.bf16 %v1452_v17 }
 0x241   : > { %v2288_v23 = vunpack.c.l.s8.bf16 %v1484_v18  ;;  %v2292_v29 = vunpack.c.h.s8.bf16 %v1484_v18 }
 0x242   : > { %3113 = vmatpush1.bf16.msra.mxu0 %v2132_v24  ;;  %v2229_v24 = vunpack.c.h.s8.bf16 %v1453_v57 }
 0x243   : > { %3154 = vmatpush1.bf16.msra.mxu1 %v2196_v25  ;;  %3114 = vmatprep.subr.bf16.mxu0 %v2137_v3  ;;  %v2293_v25 = vunpack.c.h.s8.bf16 %v1485_v21  ;;  %v1457_v3 = vld [vmem:[%s4577_s27 + $0x848] sm:$0xff] }
 0x244   : > { %3155 = vmatprep.subr.bf16.mxu1 %v2201_v26  ;;  %v1489_v26 = vld [vmem:[%s4577_s27 + $0x948] sm:$0xff] }
 0x246   : > { %3115 = vmatpush1.bf16.msra.mxu0 %v2136_v30  ;;  %v2233_v30 = vunpack.c.l.s8.bf16 %v1457_v3 }
 0x247   : > { %3156 = vmatpush1.bf16.msra.mxu1 %v2200_v31  ;;  %3116 = vmatprep.subr.bf16.mxu0 %v2141_v32  ;;  %v2297_v31 = vunpack.c.l.s8.bf16 %v1489_v26  ;;  %v1456_v32 = vld [vmem:[%s4577_s27 + $0x840] sm:$0xff] }
 0x248   : > { %3157 = vmatprep.subr.bf16.mxu1 %v2205_v33  ;;  %v1488_v33 = vld [vmem:[%s4577_s27 + $0x940] sm:$0xff]  ;;  %v2232_v50 = vunpack.c.l.s8.bf16 %v1456_v32  ;;  %v2236_v37 = vunpack.c.h.s8.bf16 %v1456_v32 }
 0x249   : > { %v2296_v34 = vunpack.c.l.s8.bf16 %v1488_v33  ;;  %v2300_v38 = vunpack.c.h.s8.bf16 %v1488_v33 }
 0x24a   : > { %3117 = vmatpush1.bf16.msra.mxu0 %v2140_v51  ;;  %v2237_v51 = vunpack.c.h.s8.bf16 %v1457_v3 }
 0x24b   : > { %3158 = vmatpush1.bf16.msra.mxu1 %v2204_v52  ;;  %3118 = vmatprep.subr.bf16.mxu0 %v2145_v35  ;;  %v2301_v52 = vunpack.c.h.s8.bf16 %v1489_v26  ;;  %v1461_v35 = vld [vmem:[%s4577_s27 + $0x868] sm:$0xff] }
 0x24c   : > { %3159 = vmatprep.subr.bf16.mxu1 %v2209_v36  ;;  %v1493_v36 = vld [vmem:[%s4577_s27 + $0x968] sm:$0xff]  ;;  %v2245_v57 = vunpack.c.h.s8.bf16 %v1461_v35 }
 0x24d   : > { %v2309_v21 = vunpack.c.h.s8.bf16 %v1493_v36 }
 0x24e   : > { %3119 = vmatpush1.bf16.msra.mxu0 %v2144_v39  ;;  %v2241_v39 = vunpack.c.l.s8.bf16 %v1461_v35 }
 0x24f   : > { %3160 = vmatpush1.bf16.msra.mxu1 %v2208_v40  ;;  %3120 = vmatprep.subr.bf16.mxu0 %v2149_v41  ;;  %v2305_v40 = vunpack.c.l.s8.bf16 %v1493_v36  ;;  %v1460_v41 = vld [vmem:[%s4577_s27 + $0x860] sm:$0xff] }
 0x250   : > { %3161 = vmatprep.subr.bf16.mxu1 %v2213_v42  ;;  %v1492_v42 = vld [vmem:[%s4577_s27 + $0x960] sm:$0xff] }
 0x252   : > { %3121 = vmatpush1.bf16.msra.mxu0 %v2148_v45 }
 0x253   : > { %3162 = vmatpush1.bf16.msra.mxu1 %v2212_v46  ;;  %3172 = vmatprep.subr.bf16.mxu0 %v2217_v47 }
 0x254   : > { %3213 = vmatprep.subr.bf16.mxu1 %v2281_v48 }
 0x255   : > { %3123 = vmatmul.mubr.bf16.vlgmr.msra.gmra.mrb[12].mxu0 %v5026_v59 }
 0x256   : > { %3164 = vmatmul.mubr.bf16.vlgmr.msra.gmra.mrb[12].mxu1 %v5030_v60  ;;  %3173 = vmatpush1.bf16.msra.mxu0 %v2216_v1  ;;  %v2240_v1 = vunpack.c.l.s8.bf16 %v1460_v41 }
 0x257   : > { %3214 = vmatpush1.bf16.msra.mxu1 %v2280_v5  ;;  %3174 = vmatprep.subr.bf16.mxu0 %v2221_v7  ;;  %v2304_v5 = vunpack.c.l.s8.bf16 %v1492_v42 }
 0x258   : > { %3215 = vmatprep.subr.bf16.mxu1 %v2285_v8  ;;  %3204 = vmatprep.mubr.bf16.mxu0 %v5042_v58 }
 0x259   : > { %3245 = vmatprep.mubr.bf16.mxu1 %v5046_v10 }
 0x25a   : > { %3175 = vmatpush1.bf16.msra.mxu0 %v2220_v13  ;;  %v1465_v13 = vld [vmem:[%s4577_s27 + $0x888] sm:$0xff] }
 0x25b   : > { %3216 = vmatpush1.bf16.msra.mxu1 %v2284_v14  ;;  %3176 = vmatprep.subr.bf16.mxu0 %v2225_v15  ;;  %v1497_v14 = vld [vmem:[%s4577_s27 + $0x988] sm:$0xff]  ;;  %v2244_v15 = vunpack.c.h.s8.bf16 %v1460_v41  ;;  %v2249_v17 = vunpack.c.l.s8.bf16 %v1465_v13  ;;  %v2253_v3 = vunpack.c.h.s8.bf16 %v1465_v13  ;;  %v1476_v13 = vld [vmem:[%s4577_s27 + $0x8e0] sm:$0xff] }
 0x25c   : > { %3217 = vmatprep.subr.bf16.mxu1 %v2289_v16  ;;  %v2308_v16 = vunpack.c.h.s8.bf16 %v1492_v42  ;;  %v2313_v18 = vunpack.c.l.s8.bf16 %v1497_v14  ;;  %v2317_v26 = vunpack.c.h.s8.bf16 %v1497_v14  ;;  %v1508_v14 = vld [vmem:[%s4577_s27 + $0x9e0] sm:$0xff] }
 0x25e   : > { %3177 = vmatpush1.bf16.msra.mxu0 %v2224_v49  ;;  %v1464_v49 = vld [vmem:[%s4577_s27 + $0x880] sm:$0xff] }
 0x25f   : > { %3218 = vmatpush1.bf16.msra.mxu1 %v2288_v23  ;;  %3178 = vmatprep.subr.bf16.mxu0 %v2229_v24  ;;  %v1496_v23 = vld [vmem:[%s4577_s27 + $0x980] sm:$0xff]  ;;  %v2248_v24 = vunpack.c.l.s8.bf16 %v1464_v49 }
 0x260   : > { %3219 = vmatprep.subr.bf16.mxu1 %v2293_v25  ;;  %v2312_v25 = vunpack.c.l.s8.bf16 %v1496_v23 }
 0x262   : > { %3179 = vmatpush1.bf16.msra.mxu0 %v2228_v28  ;;  %v1469_v28 = vld [vmem:[%s4577_s27 + $0x8a8] sm:$0xff] }
 0x263   : > { %3220 = vmatpush1.bf16.msra.mxu1 %v2292_v29  ;;  %3180 = vmatprep.subr.bf16.mxu0 %v2233_v30  ;;  %v1501_v29 = vld [vmem:[%s4577_s27 + $0x9a8] sm:$0xff]  ;;  %v2252_v30 = vunpack.c.h.s8.bf16 %v1464_v49  ;;  %v2257_v32 = vunpack.c.l.s8.bf16 %v1469_v28  ;;  %v2261_v35 = vunpack.c.h.s8.bf16 %v1469_v28  ;;  %v1512_v28 = vld [vmem:[%s4577_s27 + $0xa00] sm:$0xff] }
 0x264   : > { %3221 = vmatprep.subr.bf16.mxu1 %v2297_v31  ;;  %v2316_v31 = vunpack.c.h.s8.bf16 %v1496_v23  ;;  %v2321_v33 = vunpack.c.l.s8.bf16 %v1501_v29  ;;  %v2325_v36 = vunpack.c.h.s8.bf16 %v1501_v29  ;;  %v1513_v49 = vld [vmem:[%s4577_s27 + $0xa08] sm:$0xff]  ;;  %v1544_v29 = vld [vmem:[%s4577_s27 + $0xb00] sm:$0xff] }
 0x265   : > { %v1545_v23 = vld [vmem:[%s4577_s27 + $0xb08] sm:$0xff] }
 0x266   : > { %3181 = vmatpush1.bf16.msra.mxu0 %v2232_v50  ;;  %v1468_v50 = vld [vmem:[%s4577_s27 + $0x8a0] sm:$0xff] }
 0x267   : > { %3222 = vmatpush1.bf16.msra.mxu1 %v2296_v34  ;;  %3182 = vmatprep.subr.bf16.mxu0 %v2237_v51  ;;  %v1500_v34 = vld [vmem:[%s4577_s27 + $0x9a0] sm:$0xff]  ;;  %v2256_v51 = vunpack.c.l.s8.bf16 %v1468_v50 }
 0x268   : > { %3223 = vmatprep.subr.bf16.mxu1 %v2301_v52  ;;  %v2878_v43 = vpop.f32.mrb[0].mxu0  ;;  %v2320_v52 = vunpack.c.l.s8.bf16 %v1500_v34 }
 0x269   : > { %v2919_v44 = vpop.f32.mrb[0].mxu1  ;;  %v2880_v46 = vpop.f32.mrb[1].mxu0 }
 0x26a   : > { %v5062_v45 = vadd.f32 %v2919_v44, %v2878_v43  ;;  %v2921_v47 = vpop.f32.mrb[1].mxu1  ;;  %v2882_v53 = vpop.f32.mrb[2].mxu0  ;;  %3183 = vmatpush1.bf16.msra.mxu0 %v2236_v37  ;;  %v1473_v37 = vld [vmem:[%s4577_s27 + $0x8c8] sm:$0xff]  ;;  %v1472_v43 = vld [vmem:[%s4577_s27 + $0x8c0] sm:$0xff] }
 0x26b   : > { %v5064_v48 = vadd.f32 %v2921_v47, %v2880_v46  ;;  %v2923_v54 = vpop.f32.mrb[2].mxu1  ;;  %3224 = vmatpush1.bf16.msra.mxu1 %v2300_v38  ;;  %v2883_v7 = vpop.f32.mrb[3].mxu0  ;;  %3184 = vmatprep.subr.bf16.mxu0 %v2241_v39  ;;  %v1505_v38 = vld [vmem:[%s4577_s27 + $0x9c8] sm:$0xff]  ;;  %v2260_v39 = vunpack.c.h.s8.bf16 %v1468_v50  ;;  %v2265_v41 = vunpack.c.l.s8.bf16 %v1473_v37  ;;  %v1504_v44 = vld [vmem:[%s4577_s27 + $0x9c0] sm:$0xff]  ;;  %v2264_v46 = vunpack.c.l.s8.bf16 %v1472_v43 }
 0x26c   : > { %v2924_v8 = vpop.f32.mrb[3].mxu1  ;;  %3225 = vmatprep.subr.bf16.mxu1 %v2305_v40  ;;  %v2324_v40 = vunpack.c.h.s8.bf16 %v1500_v34  ;;  %v2329_v42 = vunpack.c.l.s8.bf16 %v1505_v38  ;;  %v2328_v47 = vunpack.c.l.s8.bf16 %v1504_v44  ;;  %v2269_v53 = vunpack.c.h.s8.bf16 %v1473_v37 }
 0x26d   : > { %v2333_v54 = vunpack.c.h.s8.bf16 %v1505_v38  ;;  %v2268_v7 = vunpack.c.h.s8.bf16 %v1472_v43  ;;  %v2332_v8 = vunpack.c.h.s8.bf16 %v1504_v44  ;;  %v2344_v50 = vunpack.c.l.s8.bf16 %v1512_v28 }
 0x26e   : > { %3185 = vmatpush1.bf16.msra.mxu0 %v2240_v1  ;;  %v1477_v1 = vld [vmem:[%s4577_s27 + $0x8e8] sm:$0xff]  ;;  %v2408_v34 = vunpack.c.l.s8.bf16 %v1544_v29  ;;  %v2348_v37 = vunpack.c.h.s8.bf16 %v1512_v28  ;;  %v2412_v38 = vunpack.c.h.s8.bf16 %v1544_v29 }
 0x26f   : > { %3226 = vmatpush1.bf16.msra.mxu1 %v2304_v5  ;;  %3186 = vmatprep.subr.bf16.mxu0 %v2245_v57  ;;  %v1509_v5 = vld [vmem:[%s4577_s27 + $0x9e8] sm:$0xff]  ;;  %v2273_v57 = vunpack.c.l.s8.bf16 %v1477_v1 }
 0x270   : > { %3227 = vmatprep.subr.bf16.mxu1 %v2309_v21  ;;  %v2337_v21 = vunpack.c.l.s8.bf16 %v1509_v5 }
 0x272   : > { %3187 = vmatpush1.bf16.msra.mxu0 %v2244_v15  ;;  %v2272_v15 = vunpack.c.l.s8.bf16 %v1476_v13 }
 0x273   : > { %3228 = vmatpush1.bf16.msra.mxu1 %v2308_v16  ;;  %3188 = vmatprep.subr.bf16.mxu0 %v2249_v17  ;;  %v2336_v16 = vunpack.c.l.s8.bf16 %v1508_v14  ;;  %v2277_v17 = vunpack.c.h.s8.bf16 %v1477_v1 }
 0x274   : > { %3229 = vmatprep.subr.bf16.mxu1 %v2313_v18  ;;  %v2341_v18 = vunpack.c.h.s8.bf16 %v1509_v5 }
 0x276   : > { %3189 = vmatpush1.bf16.msra.mxu0 %v2248_v24  ;;  %v2276_v24 = vunpack.c.h.s8.bf16 %v1476_v13 }
 0x277   : > { %3230 = vmatpush1.bf16.msra.mxu1 %v2312_v25  ;;  %3190 = vmatprep.subr.bf16.mxu0 %v2253_v3  ;;  %v2340_v25 = vunpack.c.h.s8.bf16 %v1508_v14  ;;  %v2345_v3 = vunpack.c.l.s8.bf16 %v1513_v49 }
 0x278   : > { %3231 = vmatprep.subr.bf16.mxu1 %v2317_v26  ;;  %v2409_v26 = vunpack.c.l.s8.bf16 %v1545_v23 }
 0x27a   : > { %3191 = vmatpush1.bf16.msra.mxu0 %v2252_v30  ;;  %v5088_v30 = vcombine.low %v5033_v61, %v5033_v61  ;;  %v1517_v61 = vld [vmem:[%s4577_s27 + $0xa28] sm:$0xff] }
 0x27b   : > { %3232 = vmatpush1.bf16.msra.mxu1 %v2316_v31  ;;  %3192 = vmatprep.subr.bf16.mxu0 %v2257_v32  ;;  %v5092_v31 = vcombine.low %v5036_v62, %v5036_v62  ;;  %v5095_v32 = vld [vmem:[%s4808_s29 + $0x50] sm:$0xff] }
 0x27c   : > { %3233 = vmatprep.subr.bf16.mxu1 %v2321_v33  ;;  %v5098_v33 = vld [vmem:[%s4808_s29 + $0x58] sm:$0xff]  ;;  %v5104_v62 = vcombine.high %v5095_v32, %v5095_v32 }
 0x27e   : > { %3193 = vmatpush1.bf16.msra.mxu0 %v2256_v51  ;;  %v2349_v51 = vunpack.c.h.s8.bf16 %v1513_v49 }
 0x27f   : > { %3234 = vmatpush1.bf16.msra.mxu1 %v2320_v52  ;;  %3194 = vmatprep.subr.bf16.mxu0 %v2261_v35  ;;  %v2413_v52 = vunpack.c.h.s8.bf16 %v1545_v23  ;;  %v1549_v35 = vld [vmem:[%s4577_s27 + $0xb28] sm:$0xff] }
 0x280   : > { %3235 = vmatprep.subr.bf16.mxu1 %v2325_v36  ;;  %v5108_v36 = vcombine.high %v5098_v33, %v5098_v33 }
 0x282   : > { %3195 = vmatpush1.bf16.msra.mxu0 %v2260_v39  ;;  %v2353_v39 = vunpack.c.l.s8.bf16 %v1517_v61 }
 0x283   : > { %3236 = vmatpush1.bf16.msra.mxu1 %v2324_v40  ;;  %3196 = vmatprep.subr.bf16.mxu0 %v2265_v41  ;;  %v2417_v40 = vunpack.c.l.s8.bf16 %v1549_v35  ;;  %v1516_v41 = vld [vmem:[%s4577_s27 + $0xa20] sm:$0xff] }
 0x284   : > { %3237 = vmatprep.subr.bf16.mxu1 %v2329_v42  ;;  %v1548_v42 = vld [vmem:[%s4577_s27 + $0xb20] sm:$0xff]  ;;  %v2352_v43 = vunpack.c.l.s8.bf16 %v1516_v41  ;;  %v2356_v1 = vunpack.c.h.s8.bf16 %v1516_v41 }
 0x285   : > { %v2416_v44 = vunpack.c.l.s8.bf16 %v1548_v42  ;;  %v2420_v5 = vunpack.c.h.s8.bf16 %v1548_v42 }
 0x286   : > { %3197 = vmatpush1.bf16.msra.mxu0 %v2264_v46  ;;  %v2357_v46 = vunpack.c.h.s8.bf16 %v1517_v61 }
 0x287   : > { %3238 = vmatpush1.bf16.msra.mxu1 %v2328_v47  ;;  %3198 = vmatprep.subr.bf16.mxu0 %v2269_v53  ;;  %v2421_v47 = vunpack.c.h.s8.bf16 %v1549_v35  ;;  %v1521_v53 = vld [vmem:[%s4577_s27 + $0xa48] sm:$0xff] }
 0x288   : > { %3239 = vmatprep.subr.bf16.mxu1 %v2333_v54  ;;  %v1553_v54 = vld [vmem:[%s4577_s27 + $0xb48] sm:$0xff] }
 0x28a   : > { %3199 = vmatpush1.bf16.msra.mxu0 %v2268_v7  ;;  %v2361_v7 = vunpack.c.l.s8.bf16 %v1521_v53 }
 0x28b   : > { %3240 = vmatpush1.bf16.msra.mxu1 %v2332_v8  ;;  %3200 = vmatprep.subr.bf16.mxu0 %v2273_v57  ;;  %v2425_v8 = vunpack.c.l.s8.bf16 %v1553_v54  ;;  %v1520_v57 = vld [vmem:[%s4577_s27 + $0xa40] sm:$0xff] }
 0x28c   : > { %3241 = vmatprep.subr.bf16.mxu1 %v2337_v21  ;;  %v1552_v21 = vld [vmem:[%s4577_s27 + $0xb40] sm:$0xff]  ;;  %v2360_v13 = vunpack.c.l.s8.bf16 %v1520_v57  ;;  %v2364_v49 = vunpack.c.h.s8.bf16 %v1520_v57 }
 0x28d   : > { %v2424_v14 = vunpack.c.l.s8.bf16 %v1552_v21  ;;  %v2428_v23 = vunpack.c.h.s8.bf16 %v1552_v21 }
 0x28e   : > { %3201 = vmatpush1.bf16.msra.mxu0 %v2272_v15  ;;  %v2365_v15 = vunpack.c.h.s8.bf16 %v1521_v53 }
 0x28f   : > { %3242 = vmatpush1.bf16.msra.mxu1 %v2336_v16  ;;  %3202 = vmatprep.subr.bf16.mxu0 %v2277_v17  ;;  %v2429_v16 = vunpack.c.h.s8.bf16 %v1553_v54  ;;  %v1525_v17 = vld [vmem:[%s4577_s27 + $0xa68] sm:$0xff] }
 0x290   : > { %3243 = vmatprep.subr.bf16.mxu1 %v2341_v18  ;;  %v1557_v18 = vld [vmem:[%s4577_s27 + $0xb68] sm:$0xff] }
 0x291   : > { %v2437_v42 = vunpack.c.h.s8.bf16 %v1557_v18 }
 0x292   : > { %3203 = vmatpush1.bf16.msra.mxu0 %v2276_v24  ;;  %v2369_v24 = vunpack.c.l.s8.bf16 %v1525_v17 }
 0x293   : > { %3244 = vmatpush1.bf16.msra.mxu1 %v2340_v25  ;;  %3254 = vmatprep.subr.bf16.mxu0 %v2345_v3  ;;  %v2433_v25 = vunpack.c.l.s8.bf16 %v1557_v18  ;;  %v1524_v3 = vld [vmem:[%s4577_s27 + $0xa60] sm:$0xff] }
 0x294   : > { %3295 = vmatprep.subr.bf16.mxu1 %v2409_v26  ;;  %v1556_v26 = vld [vmem:[%s4577_s27 + $0xb60] sm:$0xff] }
 0x295   : > { %3205 = vmatmul.mubr.bf16.vlgmr.msra.gmra.mrb[16].mxu0 %v5088_v30 }
 0x296   : > { %3246 = vmatmul.mubr.bf16.vlgmr.msra.gmra.mrb[16].mxu1 %v5092_v31  ;;  %3255 = vmatpush1.bf16.msra.mxu0 %v2344_v50 }
 0x297   : > { %3296 = vmatpush1.bf16.msra.mxu1 %v2408_v34  ;;  %3256 = vmatprep.subr.bf16.mxu0 %v2349_v51 }
 0x298   : > { %3297 = vmatprep.subr.bf16.mxu1 %v2413_v52  ;;  %3286 = vmatprep.mubr.bf16.mxu0 %v5104_v62 }
 0x299   : > { %3327 = vmatprep.mubr.bf16.mxu1 %v5108_v36 }
 0x29a   : > { %3257 = vmatpush1.bf16.msra.mxu0 %v2348_v37  ;;  %v2368_v37 = vunpack.c.l.s8.bf16 %v1524_v3 }
 0x29b   : > { %3298 = vmatpush1.bf16.msra.mxu1 %v2412_v38  ;;  %3258 = vmatprep.subr.bf16.mxu0 %v2353_v39  ;;  %v2432_v38 = vunpack.c.l.s8.bf16 %v1556_v26 }
 0x29c   : > { %3299 = vmatprep.subr.bf16.mxu1 %v2417_v40 }
 0x29e   : > { %3259 = vmatpush1.bf16.msra.mxu0 %v2352_v43 }
 0x29f   : > { %3300 = vmatpush1.bf16.msra.mxu1 %v2416_v44  ;;  %3260 = vmatprep.subr.bf16.mxu0 %v2357_v46  ;;  %v1561_v44 = vld [vmem:[%s4577_s27 + $0xb88] sm:$0xff]  ;;  %v2372_v46 = vunpack.c.h.s8.bf16 %v1524_v3 }
 0x2a0   : > { %3301 = vmatprep.subr.bf16.mxu1 %v2421_v47  ;;  %v2436_v47 = vunpack.c.h.s8.bf16 %v1556_v26  ;;  %v2441_v54 = vunpack.c.l.s8.bf16 %v1561_v44  ;;  %v2445_v21 = vunpack.c.h.s8.bf16 %v1561_v44 }
 0x2a2   : > { %3261 = vmatpush1.bf16.msra.mxu0 %v2356_v1  ;;  %v1528_v1 = vld [vmem:[%s4577_s27 + $0xa80] sm:$0xff] }
 0x2a3   : > { %3302 = vmatpush1.bf16.msra.mxu1 %v2420_v5  ;;  %3262 = vmatprep.subr.bf16.mxu0 %v2361_v7  ;;  %v1560_v5 = vld [vmem:[%s4577_s27 + $0xb80] sm:$0xff]  ;;  %v2376_v7 = vunpack.c.l.s8.bf16 %v1528_v1 }
 0x2a4   : > { %3303 = vmatprep.subr.bf16.mxu1 %v2425_v8  ;;  %v2440_v8 = vunpack.c.l.s8.bf16 %v1560_v5 }
 0x2a6   : > { %3263 = vmatpush1.bf16.msra.mxu0 %v2360_v13  ;;  %v1533_v13 = vld [vmem:[%s4577_s27 + $0xaa8] sm:$0xff] }
 0x2a7   : > { %3304 = vmatpush1.bf16.msra.mxu1 %v2424_v14  ;;  %3264 = vmatprep.subr.bf16.mxu0 %v2365_v15  ;;  %v1565_v14 = vld [vmem:[%s4577_s27 + $0xba8] sm:$0xff]  ;;  %v2380_v15 = vunpack.c.h.s8.bf16 %v1528_v1  ;;  %v2389_v3 = vunpack.c.h.s8.bf16 %v1533_v13 }
 0x2a8   : > { %3305 = vmatprep.subr.bf16.mxu1 %v2429_v16  ;;  %v2960_v28 = vpop.f32.mrb[4].mxu0  ;;  %v2444_v16 = vunpack.c.h.s8.bf16 %v1560_v5  ;;  %v2449_v18 = vunpack.c.l.s8.bf16 %v1565_v14  ;;  %v2453_v26 = vunpack.c.h.s8.bf16 %v1565_v14 }
 0x2a9   : > { %v3001_v29 = vpop.f32.mrb[4].mxu1  ;;  %v2961_v50 = vadd.f32 %v2960_v28, %v5062_v45  ;;  %v2962_v34 = vpop.f32.mrb[5].mxu0  ;;  %v2373_v45 = vunpack.c.h.s8.bf16 %v1525_v17  ;;  %v2385_v17 = vunpack.c.l.s8.bf16 %v1533_v13  ;;  %v1537_v28 = vld [vmem:[%s4577_s27 + $0xac8] sm:$0xff] }
 0x2aa   : > { %v3003_v51 = vpop.f32.mrb[5].mxu1  ;;  %v2963_v52 = vadd.f32 %v2962_v34, %v5064_v48  ;;  %v2964_v61 = vpop.f32.mrb[6].mxu0  ;;  %3265 = vmatpush1.bf16.msra.mxu0 %v2364_v49  ;;  %v1529_v48 = vld [vmem:[%s4577_s27 + $0xa88] sm:$0xff]  ;;  %v1532_v49 = vld [vmem:[%s4577_s27 + $0xaa0] sm:$0xff] }
 0x2ab   : > { %v3005_v35 = vpop.f32.mrb[6].mxu1  ;;  %3306 = vmatpush1.bf16.msra.mxu1 %v2428_v23  ;;  %v5126_v39 = vadd.f32 %v3001_v29, %v2961_v50  ;;  %v2965_v40 = vpop.f32.mrb[7].mxu0  ;;  %3266 = vmatprep.subr.bf16.mxu0 %v2369_v24  ;;  %v2377_v53 = vunpack.c.l.s8.bf16 %v1529_v48  ;;  %v2381_v57 = vunpack.c.h.s8.bf16 %v1529_v48  ;;  %v1564_v23 = vld [vmem:[%s4577_s27 + $0xba0] sm:$0xff]  ;;  %v2384_v24 = vunpack.c.l.s8.bf16 %v1532_v49  ;;  %v1569_v29 = vld [vmem:[%s4577_s27 + $0xbc8] sm:$0xff] }
 0x2ac   : > { %v3006_v41 = vpop.f32.mrb[7].mxu1  ;;  %3307 = vmatprep.subr.bf16.mxu1 %v2433_v25  ;;  %v5128_v43 = vadd.f32 %v3003_v51, %v2963_v52  ;;  %v2448_v25 = vunpack.c.l.s8.bf16 %v1564_v23  ;;  %v2388_v50 = vunpack.c.h.s8.bf16 %v1532_v49  ;;  %v2452_v34 = vunpack.c.h.s8.bf16 %v1564_v23  ;;  %v1536_v61 = vld [vmem:[%s4577_s27 + $0xac0] sm:$0xff] }
 0x2ad   : > { %v2393_v51 = vunpack.c.l.s8.bf16 %v1537_v28  ;;  %v2457_v52 = vunpack.c.l.s8.bf16 %v1569_v29  ;;  %v1568_v35 = vld [vmem:[%s4577_s27 + $0xbc0] sm:$0xff]  ;;  %v2397_v40 = vunpack.c.h.s8.bf16 %v1537_v28  ;;  %v2461_v41 = vunpack.c.h.s8.bf16 %v1569_v29 }
 0x2ae   : > { %3267 = vmatpush1.bf16.msra.mxu0 %v2368_v37  ;;  %v2392_v37 = vunpack.c.l.s8.bf16 %v1536_v61  ;;  %v2396_v48 = vunpack.c.h.s8.bf16 %v1536_v61  ;;  %v2460_v44 = vunpack.c.h.s8.bf16 %v1568_v35  ;;  %v5152_v49 = vcombine.low %v5095_v32, %v5095_v32  ;;  %v1581_v32 = vld [vmem:[%s4577_s27 + $0xc28] sm:$0xff] }
 0x2af   : > { %3308 = vmatpush1.bf16.msra.mxu1 %v2432_v38  ;;  %3268 = vmatprep.subr.bf16.mxu0 %v2373_v45  ;;  %v2456_v38 = vunpack.c.l.s8.bf16 %v1568_v35  ;;  %v1541_v45 = vld [vmem:[%s4577_s27 + $0xae8] sm:$0xff]  ;;  %v5156_v23 = vcombine.low %v5098_v33, %v5098_v33  ;;  %v2481_v61 = vunpack.c.l.s8.bf16 %v1581_v32 }
 0x2b0   : > { %3309 = vmatprep.subr.bf16.mxu1 %v2437_v42  ;;  %v1573_v42 = vld [vmem:[%s4577_s27 + $0xbe8] sm:$0xff] }
 0x2b2   : > { %3269 = vmatpush1.bf16.msra.mxu0 %v2372_v46  ;;  %v2401_v46 = vunpack.c.l.s8.bf16 %v1541_v45 }
 0x2b3   : > { %3310 = vmatpush1.bf16.msra.mxu1 %v2436_v47  ;;  %3270 = vmatprep.subr.bf16.mxu0 %v2377_v53  ;;  %v2465_v47 = vunpack.c.l.s8.bf16 %v1573_v42  ;;  %v1540_v53 = vld [vmem:[%s4577_s27 + $0xae0] sm:$0xff] }
 0x2b4   : > { %3311 = vmatprep.subr.bf16.mxu1 %v2441_v54  ;;  %v1572_v54 = vld [vmem:[%s4577_s27 + $0xbe0] sm:$0xff]  ;;  %v2400_v1 = vunpack.c.l.s8.bf16 %v1540_v53  ;;  %v2404_v13 = vunpack.c.h.s8.bf16 %v1540_v53 }
 0x2b5   : > { %v2464_v5 = vunpack.c.l.s8.bf16 %v1572_v54  ;;  %v2468_v14 = vunpack.c.h.s8.bf16 %v1572_v54 }
 0x2b6   : > { %3271 = vmatpush1.bf16.msra.mxu0 %v2376_v7  ;;  %v2405_v7 = vunpack.c.h.s8.bf16 %v1541_v45  ;;  %v2485_v45 = vunpack.c.h.s8.bf16 %v1581_v32 }
 0x2b7   : > { %3312 = vmatpush1.bf16.msra.mxu1 %v2440_v8  ;;  %3272 = vmatprep.subr.bf16.mxu0 %v2381_v57  ;;  %v2469_v8 = vunpack.c.h.s8.bf16 %v1573_v42  ;;  %v1577_v57 = vld [vmem:[%s4577_s27 + $0xc08] sm:$0xff] }
 0x2b8   : > { %3313 = vmatprep.subr.bf16.mxu1 %v2445_v21  ;;  %v1609_v21 = vld [vmem:[%s4577_s27 + $0xd08] sm:$0xff]  ;;  %v2477_v28 = vunpack.c.h.s8.bf16 %v1577_v57 }
 0x2b9   : > { %v2541_v29 = vunpack.c.h.s8.bf16 %v1609_v21 }
 0x2ba   : > { %3273 = vmatpush1.bf16.msra.mxu0 %v2380_v15  ;;  %v2473_v15 = vunpack.c.l.s8.bf16 %v1577_v57 }
 0x2bb   : > { %3314 = vmatpush1.bf16.msra.mxu1 %v2444_v16  ;;  %3274 = vmatprep.subr.bf16.mxu0 %v2385_v17  ;;  %v2537_v16 = vunpack.c.l.s8.bf16 %v1609_v21  ;;  %v1576_v17 = vld [vmem:[%s4577_s27 + $0xc00] sm:$0xff] }
 0x2bc   : > { %3315 = vmatprep.subr.bf16.mxu1 %v2449_v18  ;;  %v1608_v18 = vld [vmem:[%s4577_s27 + $0xd00] sm:$0xff] }
 0x2be   : > { %3275 = vmatpush1.bf16.msra.mxu0 %v2384_v24  ;;  %v5159_v24 = vld [vmem:[%s4808_s29 + $0x60] sm:$0xff] }
 0x2bf   : > { %3316 = vmatpush1.bf16.msra.mxu1 %v2448_v25  ;;  %3276 = vmatprep.subr.bf16.mxu0 %v2389_v3  ;;  %v5162_v25 = vld [vmem:[%s4808_s29 + $0x68] sm:$0xff]  ;;  %v2472_v3 = vunpack.c.l.s8.bf16 %v1576_v17  ;;  %v5168_v33 = vcombine.high %v5159_v24, %v5159_v24 }
 0x2c0   : > { %3317 = vmatprep.subr.bf16.mxu1 %v2453_v26  ;;  %v2536_v26 = vunpack.c.l.s8.bf16 %v1608_v18 }
 0x2c2   : > { %3277 = vmatpush1.bf16.msra.mxu0 %v2388_v50  ;;  %v1613_v50 = vld [vmem:[%s4577_s27 + $0xd28] sm:$0xff] }
 0x2c3   : > { %3318 = vmatpush1.bf16.msra.mxu1 %v2452_v34  ;;  %3278 = vmatprep.subr.bf16.mxu0 %v2393_v51  ;;  %v5172_v34 = vcombine.high %v5162_v25, %v5162_v25  ;;  %v2476_v51 = vunpack.c.h.s8.bf16 %v1576_v17  ;;  %v2545_v35 = vunpack.c.l.s8.bf16 %v1613_v50  ;;  %v2549_v42 = vunpack.c.h.s8.bf16 %v1613_v50 }
 0x2c4   : > { %3319 = vmatprep.subr.bf16.mxu1 %v2457_v52  ;;  %v2540_v52 = vunpack.c.h.s8.bf16 %v1608_v18 }
 0x2c6   : > { %3279 = vmatpush1.bf16.msra.mxu0 %v2392_v37  ;;  %v1580_v37 = vld [vmem:[%s4577_s27 + $0xc20] sm:$0xff] }
 0x2c7   : > { %3320 = vmatpush1.bf16.msra.mxu1 %v2456_v38  ;;  %3280 = vmatprep.subr.bf16.mxu0 %v2397_v40  ;;  %v1612_v38 = vld [vmem:[%s4577_s27 + $0xd20] sm:$0xff]  ;;  %v2480_v40 = vunpack.c.l.s8.bf16 %v1580_v37 }
 0x2c8   : > { %3321 = vmatprep.subr.bf16.mxu1 %v2461_v41  ;;  %v2544_v41 = vunpack.c.l.s8.bf16 %v1612_v38 }
 0x2ca   : > { %3281 = vmatpush1.bf16.msra.mxu0 %v2396_v48  ;;  %v1585_v48 = vld [vmem:[%s4577_s27 + $0xc48] sm:$0xff] }
 0x2cb   : > { %3322 = vmatpush1.bf16.msra.mxu1 %v2460_v44  ;;  %3282 = vmatprep.subr.bf16.mxu0 %v2401_v46  ;;  %v1617_v44 = vld [vmem:[%s4577_s27 + $0xd48] sm:$0xff]  ;;  %v2484_v46 = vunpack.c.h.s8.bf16 %v1580_v37  ;;  %v2489_v53 = vunpack.c.l.s8.bf16 %v1585_v48  ;;  %v2493_v57 = vunpack.c.h.s8.bf16 %v1585_v48 }
 0x2cc   : > { %3323 = vmatprep.subr.bf16.mxu1 %v2465_v47  ;;  %v2548_v47 = vunpack.c.h.s8.bf16 %v1612_v38  ;;  %v2553_v54 = vunpack.c.l.s8.bf16 %v1617_v44  ;;  %v2557_v21 = vunpack.c.h.s8.bf16 %v1617_v44  ;;  %v1625_v44 = vld [vmem:[%s4577_s27 + $0xd88] sm:$0xff] }
 0x2ce   : > { %3283 = vmatpush1.bf16.msra.mxu0 %v2400_v1  ;;  %v1584_v1 = vld [vmem:[%s4577_s27 + $0xc40] sm:$0xff] }
 0x2cf   : > { %3324 = vmatpush1.bf16.msra.mxu1 %v2464_v5  ;;  %3284 = vmatprep.subr.bf16.mxu0 %v2405_v7  ;;  %v1616_v5 = vld [vmem:[%s4577_s27 + $0xd40] sm:$0xff]  ;;  %v2488_v7 = vunpack.c.l.s8.bf16 %v1584_v1 }
 0x2d0   : > { %3325 = vmatprep.subr.bf16.mxu1 %v2469_v8  ;;  %v2552_v8 = vunpack.c.l.s8.bf16 %v1616_v5 }
 0x2d2   : > { %3285 = vmatpush1.bf16.msra.mxu0 %v2404_v13  ;;  %v1589_v13 = vld [vmem:[%s4577_s27 + $0xc68] sm:$0xff] }
 0x2d3   : > { %3326 = vmatpush1.bf16.msra.mxu1 %v2468_v14  ;;  %3336 = vmatprep.subr.bf16.mxu0 %v2473_v15  ;;  %v1621_v14 = vld [vmem:[%s4577_s27 + $0xd68] sm:$0xff]  ;;  %v2492_v15 = vunpack.c.h.s8.bf16 %v1584_v1  ;;  %v2497_v17 = vunpack.c.l.s8.bf16 %v1589_v13  ;;  %v1592_v1 = vld [vmem:[%s4577_s27 + $0xc80] sm:$0xff] }
 0x2d4   : > { %3377 = vmatprep.subr.bf16.mxu1 %v2537_v16  ;;  %v2556_v16 = vunpack.c.h.s8.bf16 %v1616_v5  ;;  %v2561_v18 = vunpack.c.l.s8.bf16 %v1621_v14  ;;  %v1624_v5 = vld [vmem:[%s4577_s27 + $0xd80] sm:$0xff] }
 0x2d5   : > { %3287 = vmatmul.mubr.bf16.vlgmr.msra.gmra.mrb[20].mxu0 %v5152_v49 }
 0x2d6   : > { %3328 = vmatmul.mubr.bf16.vlgmr.msra.gmra.mrb[20].mxu1 %v5156_v23  ;;  %3337 = vmatpush1.bf16.msra.mxu0 %v2472_v3  ;;  %v1588_v3 = vld [vmem:[%s4577_s27 + $0xc60] sm:$0xff] }
 0x2d7   : > { %3378 = vmatpush1.bf16.msra.mxu1 %v2536_v26  ;;  %3338 = vmatprep.subr.bf16.mxu0 %v2477_v28  ;;  %v1620_v26 = vld [vmem:[%s4577_s27 + $0xd60] sm:$0xff]  ;;  %v2496_v37 = vunpack.c.l.s8.bf16 %v1588_v3 }
 0x2d8   : > { %3379 = vmatprep.subr.bf16.mxu1 %v2541_v29  ;;  %3368 = vmatprep.mubr.bf16.mxu0 %v5168_v33  ;;  %v2560_v38 = vunpack.c.l.s8.bf16 %v1620_v26 }
 0x2d9   : > { %3409 = vmatprep.mubr.bf16.mxu1 %v5172_v34 }
 0x2da   : > { %3339 = vmatpush1.bf16.msra.mxu0 %v2476_v51 }
 0x2db   : > { %3380 = vmatpush1.bf16.msra.mxu1 %v2540_v52  ;;  %3340 = vmatprep.subr.bf16.mxu0 %v2481_v61 }
 0x2dc   : > { %3381 = vmatprep.subr.bf16.mxu1 %v2545_v35 }
 0x2de   : > { %3341 = vmatpush1.bf16.msra.mxu0 %v2480_v40 }
 0x2df   : > { %3382 = vmatpush1.bf16.msra.mxu1 %v2544_v41  ;;  %3342 = vmatprep.subr.bf16.mxu0 %v2485_v45 }
 0x2e0   : > { %3383 = vmatprep.subr.bf16.mxu1 %v2549_v42  ;;  %v2565_v42 = vunpack.c.h.s8.bf16 %v1621_v14  ;;  %v1629_v14 = vld [vmem:[%s4577_s27 + $0xda8] sm:$0xff] }
 0x2e2   : > { %3343 = vmatpush1.bf16.msra.mxu0 %v2484_v46  ;;  %v2500_v46 = vunpack.c.h.s8.bf16 %v1588_v3  ;;  %v1596_v3 = vld [vmem:[%s4577_s27 + $0xca0] sm:$0xff] }
 0x2e3   : > { %3384 = vmatpush1.bf16.msra.mxu1 %v2548_v47  ;;  %3344 = vmatprep.subr.bf16.mxu0 %v2489_v53  ;;  %v2564_v47 = vunpack.c.h.s8.bf16 %v1620_v26  ;;  %v1628_v26 = vld [vmem:[%s4577_s27 + $0xda0] sm:$0xff] }
 0x2e4   : > { %3385 = vmatprep.subr.bf16.mxu1 %v2553_v54  ;;  %v2569_v54 = vunpack.c.l.s8.bf16 %v1625_v44 }
 0x2e6   : > { %3345 = vmatpush1.bf16.msra.mxu0 %v2488_v7  ;;  %v2504_v7 = vunpack.c.l.s8.bf16 %v1592_v1 }
 0x2e7   : > { %3386 = vmatpush1.bf16.msra.mxu1 %v2552_v8  ;;  %3346 = vmatprep.subr.bf16.mxu0 %v2493_v57  ;;  %v2568_v8 = vunpack.c.l.s8.bf16 %v1624_v5 }
 0x2e8   : > { %3387 = vmatprep.subr.bf16.mxu1 %v2557_v21  ;;  %v3042_v28 = vpop.f32.mrb[8].mxu0  ;;  %v2573_v21 = vunpack.c.h.s8.bf16 %v1625_v44 }
 0x2e9   : > { %v3083_v29 = vpop.f32.mrb[8].mxu1  ;;  %v3043_v32 = vadd.f32 %v3042_v28, %v5126_v39  ;;  %v3044_v50 = vpop.f32.mrb[9].mxu0  ;;  %v2501_v39 = vunpack.c.h.s8.bf16 %v1589_v13  ;;  %v1597_v13 = vld [vmem:[%s4577_s27 + $0xca8] sm:$0xff]  ;;  %v2512_v28 = vunpack.c.l.s8.bf16 %v1596_v3 }
 0x2ea   : > { %v3085_v51 = vpop.f32.mrb[9].mxu1  ;;  %v3045_v52 = vadd.f32 %v3044_v50, %v5128_v43  ;;  %v3046_v61 = vpop.f32.mrb[10].mxu0  ;;  %3347 = vmatpush1.bf16.msra.mxu0 %v2492_v15  ;;  %v1593_v43 = vld [vmem:[%s4577_s27 + $0xc88] sm:$0xff]  ;;  %v2508_v15 = vunpack.c.h.s8.bf16 %v1592_v1  ;;  %v2581_v50 = vunpack.c.h.s8.bf16 %v1629_v14 }
 0x2eb   : > { %v3087_v35 = vpop.f32.mrb[10].mxu1  ;;  %3388 = vmatpush1.bf16.msra.mxu1 %v2556_v16  ;;  %v5190_v40 = vadd.f32 %v3083_v29, %v3043_v32  ;;  %v3047_v41 = vpop.f32.mrb[11].mxu0  ;;  %3348 = vmatprep.subr.bf16.mxu0 %v2497_v17  ;;  %v2505_v53 = vunpack.c.l.s8.bf16 %v1593_v43  ;;  %v2509_v57 = vunpack.c.h.s8.bf16 %v1593_v43  ;;  %v2572_v16 = vunpack.c.h.s8.bf16 %v1624_v5 }
 0x2ec   : > { %v3088_v45 = vpop.f32.mrb[11].mxu1  ;;  %3389 = vmatprep.subr.bf16.mxu1 %v2561_v18  ;;  %v5192_v48 = vadd.f32 %v3085_v51, %v3045_v52  ;;  %v2513_v17 = vunpack.c.l.s8.bf16 %v1597_v13  ;;  %v2577_v18 = vunpack.c.l.s8.bf16 %v1629_v14  ;;  %v2576_v29 = vunpack.c.l.s8.bf16 %v1628_v26  ;;  %v1601_v51 = vld [vmem:[%s4577_s27 + $0xcc8] sm:$0xff]  ;;  %v1600_v41 = vld [vmem:[%s4577_s27 + $0xcc0] sm:$0xff] }
 0x2ed   : > { %v2517_v32 = vunpack.c.h.s8.bf16 %v1597_v13  ;;  %v1633_v52 = vld [vmem:[%s4577_s27 + $0xdc8] sm:$0xff]  ;;  %v2516_v61 = vunpack.c.h.s8.bf16 %v1596_v3  ;;  %v2580_v35 = vunpack.c.h.s8.bf16 %v1628_v26  ;;  %v1632_v45 = vld [vmem:[%s4577_s27 + $0xdc0] sm:$0xff]  ;;  %v2525_v43 = vunpack.c.h.s8.bf16 %v1601_v51 }
 0x2ee   : > { %3349 = vmatpush1.bf16.msra.mxu0 %v2496_v37  ;;  %v2521_v37 = vunpack.c.l.s8.bf16 %v1601_v51  ;;  %v2589_v44 = vunpack.c.h.s8.bf16 %v1633_v52  ;;  %v5223_v51 = vld [vmem:[%s4808_s29 + $0x70] sm:$0xff] }
 0x2ef   : > { %3390 = vmatpush1.bf16.msra.mxu1 %v2560_v38  ;;  %3350 = vmatprep.subr.bf16.mxu0 %v2501_v39  ;;  %v2585_v38 = vunpack.c.l.s8.bf16 %v1633_v52  ;;  %v2520_v39 = vunpack.c.l.s8.bf16 %v1600_v41  ;;  %v5226_v52 = vld [vmem:[%s4808_s29 + $0x78] sm:$0xff] }
 0x2f0   : > { %3391 = vmatprep.subr.bf16.mxu1 %v2565_v42  ;;  %v2584_v42 = vunpack.c.l.s8.bf16 %v1632_v45 }
 0x2f2   : > { %3351 = vmatpush1.bf16.msra.mxu0 %v2500_v46  ;;  %v1605_v46 = vld [vmem:[%s4577_s27 + $0xce8] sm:$0xff] }
 0x2f3   : > { %3392 = vmatpush1.bf16.msra.mxu1 %v2564_v47  ;;  %3352 = vmatprep.subr.bf16.mxu0 %v2505_v53  ;;  %v1637_v47 = vld [vmem:[%s4577_s27 + $0xde8] sm:$0xff]  ;;  %v2524_v53 = vunpack.c.h.s8.bf16 %v1600_v41  ;;  %v2529_v1 = vunpack.c.l.s8.bf16 %v1605_v46  ;;  %v2533_v13 = vunpack.c.h.s8.bf16 %v1605_v46  ;;  %v1644_v46 = vld [vmem:[%s4577_s27 + $0xe20] sm:$0xff] }
 0x2f4   : > { %3393 = vmatprep.subr.bf16.mxu1 %v2569_v54  ;;  %v2588_v54 = vunpack.c.h.s8.bf16 %v1632_v45  ;;  %v2593_v5 = vunpack.c.l.s8.bf16 %v1637_v47  ;;  %v2597_v14 = vunpack.c.h.s8.bf16 %v1637_v47  ;;  %v1677_v41 = vld [vmem:[%s4577_s27 + $0xf28] sm:$0xff]  ;;  %v5236_v45 = vcombine.high %v5226_v52, %v5226_v52  ;;  %v1676_v47 = vld [vmem:[%s4577_s27 + $0xf20] sm:$0xff] }
 0x2f6   : > { %3353 = vmatpush1.bf16.msra.mxu0 %v2504_v7  ;;  %v1604_v7 = vld [vmem:[%s4577_s27 + $0xce0] sm:$0xff] }
 0x2f7   : > { %3394 = vmatpush1.bf16.msra.mxu1 %v2568_v8  ;;  %3354 = vmatprep.subr.bf16.mxu0 %v2509_v57  ;;  %v1636_v8 = vld [vmem:[%s4577_s27 + $0xde0] sm:$0xff]  ;;  %v2528_v57 = vunpack.c.l.s8.bf16 %v1604_v7 }
 0x2f8   : > { %3395 = vmatprep.subr.bf16.mxu1 %v2573_v21  ;;  %v2592_v21 = vunpack.c.l.s8.bf16 %v1636_v8 }
 0x2fa   : > { %3355 = vmatpush1.bf16.msra.mxu0 %v2508_v15  ;;  %v1641_v15 = vld [vmem:[%s4577_s27 + $0xe08] sm:$0xff] }
 0x2fb   : > { %3396 = vmatpush1.bf16.msra.mxu1 %v2572_v16  ;;  %3356 = vmatprep.subr.bf16.mxu0 %v2513_v17  ;;  %v1673_v16 = vld [vmem:[%s4577_s27 + $0xf08] sm:$0xff]  ;;  %v2532_v17 = vunpack.c.h.s8.bf16 %v1604_v7  ;;  %v2601_v3 = vunpack.c.l.s8.bf16 %v1641_v15 }
 0x2fc   : > { %3397 = vmatprep.subr.bf16.mxu1 %v2577_v18  ;;  %v2596_v18 = vunpack.c.h.s8.bf16 %v1636_v8  ;;  %v2665_v26 = vunpack.c.l.s8.bf16 %v1673_v16  ;;  %v1649_v7 = vld [vmem:[%s4577_s27 + $0xe48] sm:$0xff] }
 0x2fd   : > { %v1681_v8 = vld [vmem:[%s4577_s27 + $0xf48] sm:$0xff] }
 0x2fe   : > { %3357 = vmatpush1.bf16.msra.mxu0 %v2512_v28  ;;  %v1640_v28 = vld [vmem:[%s4577_s27 + $0xe00] sm:$0xff] }
 0x2ff   : > { %3398 = vmatpush1.bf16.msra.mxu1 %v2576_v29  ;;  %3358 = vmatprep.subr.bf16.mxu0 %v2517_v32  ;;  %v1672_v29 = vld [vmem:[%s4577_s27 + $0xf00] sm:$0xff]  ;;  %v5216_v32 = vcombine.low %v5159_v24, %v5159_v24  ;;  %v1645_v24 = vld [vmem:[%s4577_s27 + $0xe28] sm:$0xff] }
 0x300   : > { %3399 = vmatprep.subr.bf16.mxu1 %v2581_v50  ;;  %v5220_v50 = vcombine.low %v5162_v25, %v5162_v25  ;;  %v5232_v25 = vcombine.high %v5223_v51, %v5223_v51 }
 0x302   : > { %3359 = vmatpush1.bf16.msra.mxu0 %v2516_v61  ;;  %v2600_v61 = vunpack.c.l.s8.bf16 %v1640_v28 }
 0x303   : > { %3400 = vmatpush1.bf16.msra.mxu1 %v2580_v35  ;;  %3360 = vmatprep.subr.bf16.mxu0 %v2521_v37  ;;  %v2664_v35 = vunpack.c.l.s8.bf16 %v1672_v29  ;;  %v2605_v37 = vunpack.c.h.s8.bf16 %v1641_v15  ;;  %v1648_v15 = vld [vmem:[%s4577_s27 + $0xe40] sm:$0xff] }
 0x304   : > { %3401 = vmatprep.subr.bf16.mxu1 %v2585_v38  ;;  %v2669_v38 = vunpack.c.h.s8.bf16 %v1673_v16  ;;  %v1680_v16 = vld [vmem:[%s4577_s27 + $0xf40] sm:$0xff] }
 0x306   : > { %3361 = vmatpush1.bf16.msra.mxu0 %v2520_v39  ;;  %v2604_v39 = vunpack.c.h.s8.bf16 %v1640_v28  ;;  %v1653_v28 = vld [vmem:[%s4577_s27 + $0xe68] sm:$0xff] }
 0x307   : > { %3402 = vmatpush1.bf16.msra.mxu1 %v2584_v42  ;;  %3362 = vmatprep.subr.bf16.mxu0 %v2525_v43  ;;  %v2668_v42 = vunpack.c.h.s8.bf16 %v1672_v29  ;;  %v2609_v43 = vunpack.c.l.s8.bf16 %v1645_v24  ;;  %v1685_v29 = vld [vmem:[%s4577_s27 + $0xf68] sm:$0xff] }
 0x308   : > { %3403 = vmatprep.subr.bf16.mxu1 %v2589_v44  ;;  %v2673_v44 = vunpack.c.l.s8.bf16 %v1677_v41 }
 0x30a   : > { %3363 = vmatpush1.bf16.msra.mxu0 %v2524_v53  ;;  %v2608_v53 = vunpack.c.l.s8.bf16 %v1644_v46 }
 0x30b   : > { %3404 = vmatpush1.bf16.msra.mxu1 %v2588_v54  ;;  %3364 = vmatprep.subr.bf16.mxu0 %v2529_v1  ;;  %v2672_v54 = vunpack.c.l.s8.bf16 %v1676_v47  ;;  %v2613_v1 = vunpack.c.h.s8.bf16 %v1645_v24  ;;  %v1652_v24 = vld [vmem:[%s4577_s27 + $0xe60] sm:$0xff] }
 0x30c   : > { %3405 = vmatprep.subr.bf16.mxu1 %v2593_v5  ;;  %v2677_v5 = vunpack.c.h.s8.bf16 %v1677_v41  ;;  %v1684_v41 = vld [vmem:[%s4577_s27 + $0xf60] sm:$0xff] }
 0x30e   : > { %3365 = vmatpush1.bf16.msra.mxu0 %v2528_v57  ;;  %v2612_v57 = vunpack.c.h.s8.bf16 %v1644_v46 }
 0x30f   : > { %3406 = vmatpush1.bf16.msra.mxu1 %v2592_v21  ;;  %3366 = vmatprep.subr.bf16.mxu0 %v2533_v13  ;;  %v2676_v21 = vunpack.c.h.s8.bf16 %v1676_v47  ;;  %v2617_v13 = vunpack.c.l.s8.bf16 %v1649_v7 }
 0x310   : > { %3407 = vmatprep.subr.bf16.mxu1 %v2597_v14  ;;  %v2681_v14 = vunpack.c.l.s8.bf16 %v1681_v8 }
 0x312   : > { %3367 = vmatpush1.bf16.msra.mxu0 %v2532_v17  ;;  %v2616_v17 = vunpack.c.l.s8.bf16 %v1648_v15 }
 0x313   : > { %3408 = vmatpush1.bf16.msra.mxu1 %v2596_v18  ;;  %3418 = vmatprep.subr.bf16.mxu0 %v2601_v3  ;;  %v2680_v18 = vunpack.c.l.s8.bf16 %v1680_v16  ;;  %v2621_v3 = vunpack.c.h.s8.bf16 %v1649_v7 }
 0x314   : > { %3459 = vmatprep.subr.bf16.mxu1 %v2665_v26  ;;  %v2685_v26 = vunpack.c.h.s8.bf16 %v1681_v8 }
 0x315   : > { %3369 = vmatmul.mubr.bf16.vlgmr.msra.gmra.mrb[24].mxu0 %v5216_v32 }
 0x316   : > { %3410 = vmatmul.mubr.bf16.vlgmr.msra.gmra.mrb[24].mxu1 %v5220_v50  ;;  %3419 = vmatpush1.bf16.msra.mxu0 %v2600_v61  ;;  %v2620_v61 = vunpack.c.h.s8.bf16 %v1648_v15  ;;  %v2628_v15 = vunpack.c.h.s8.bf16 %v1652_v24 }
 0x317   : > { %3460 = vmatpush1.bf16.msra.mxu1 %v2664_v35  ;;  %3420 = vmatprep.subr.bf16.mxu0 %v2605_v37  ;;  %v2684_v35 = vunpack.c.h.s8.bf16 %v1680_v16  ;;  %v2625_v37 = vunpack.c.l.s8.bf16 %v1653_v28  ;;  %v2692_v16 = vunpack.c.h.s8.bf16 %v1684_v41 }
 0x318   : > { %3461 = vmatprep.subr.bf16.mxu1 %v2669_v38  ;;  %3450 = vmatprep.mubr.bf16.mxu0 %v5232_v25  ;;  %v2689_v38 = vunpack.c.l.s8.bf16 %v1685_v29 }
 0x319   : > { %3491 = vmatprep.mubr.bf16.mxu1 %v5236_v45 }
 0x31a   : > { %3421 = vmatpush1.bf16.msra.mxu0 %v2604_v39 }
 0x31b   : > { %3462 = vmatpush1.bf16.msra.mxu1 %v2668_v42  ;;  %3422 = vmatprep.subr.bf16.mxu0 %v2609_v43 }
 0x31c   : > { %3463 = vmatprep.subr.bf16.mxu1 %v2673_v44 }
 0x31e   : > { %3423 = vmatpush1.bf16.msra.mxu0 %v2608_v53 }
 0x31f   : > { %3464 = vmatpush1.bf16.msra.mxu1 %v2672_v54  ;;  %3424 = vmatprep.subr.bf16.mxu0 %v2613_v1  ;;  %v2624_v1 = vunpack.c.l.s8.bf16 %v1652_v24 }
 0x320   : > { %3465 = vmatprep.subr.bf16.mxu1 %v2677_v5  ;;  %v2688_v5 = vunpack.c.l.s8.bf16 %v1684_v41 }
 0x322   : > { %3425 = vmatpush1.bf16.msra.mxu0 %v2612_v57 }
 0x323   : > { %3466 = vmatpush1.bf16.msra.mxu1 %v2676_v21  ;;  %3426 = vmatprep.subr.bf16.mxu0 %v2617_v13  ;;  %v2693_v21 = vunpack.c.h.s8.bf16 %v1685_v29 }
 0x324   : > { %3467 = vmatprep.subr.bf16.mxu1 %v2681_v14  ;;  %v1689_v14 = vld [vmem:[%s4577_s27 + $0xf88] sm:$0xff] }
 0x326   : > { %3427 = vmatpush1.bf16.msra.mxu0 %v2616_v17 }
 0x327   : > { %3468 = vmatpush1.bf16.msra.mxu1 %v2680_v18  ;;  %3428 = vmatprep.subr.bf16.mxu0 %v2621_v3  ;;  %v2697_v18 = vunpack.c.l.s8.bf16 %v1689_v14  ;;  %v1656_v3 = vld [vmem:[%s4577_s27 + $0xe80] sm:$0xff] }
 0x328   : > { %3469 = vmatprep.subr.bf16.mxu1 %v2685_v26  ;;  %v3124_v39 = vpop.f32.mrb[12].mxu0  ;;  %v1688_v26 = vld [vmem:[%s4577_s27 + $0xf80] sm:$0xff]  ;;  %v2636_v24 = vunpack.c.h.s8.bf16 %v1656_v3 }
 0x329   : > { %v3165_v42 = vpop.f32.mrb[12].mxu1  ;;  %v3125_v43 = vadd.f32 %v3124_v39, %v5190_v40  ;;  %v3126_v44 = vpop.f32.mrb[13].mxu0  ;;  %v2629_v40 = vunpack.c.h.s8.bf16 %v1653_v28  ;;  %v2632_v28 = vunpack.c.l.s8.bf16 %v1656_v3  ;;  %v2696_v29 = vunpack.c.l.s8.bf16 %v1688_v26  ;;  %v1669_v3 = vld [vmem:[%s4577_s27 + $0xee8] sm:$0xff] }
 0x32a   : > { %v3167_v46 = vpop.f32.mrb[13].mxu1  ;;  %v3127_v47 = vadd.f32 %v3126_v44, %v5192_v48  ;;  %v3128_v53 = vpop.f32.mrb[14].mxu0  ;;  %3429 = vmatpush1.bf16.msra.mxu0 %v2620_v61  ;;  %v1657_v48 = vld [vmem:[%s4577_s27 + $0xe88] sm:$0xff]  ;;  %v2700_v41 = vunpack.c.h.s8.bf16 %v1688_v26  ;;  %v1692_v44 = vld [vmem:[%s4577_s27 + $0xfa0] sm:$0xff] }
 0x32b   : > { %v3169_v54 = vpop.f32.mrb[14].mxu1  ;;  %3470 = vmatpush1.bf16.msra.mxu1 %v2684_v35  ;;  %v5254_v7 = vadd.f32 %v3165_v42, %v3125_v43  ;;  %v3129_v8 = vpop.f32.mrb[15].mxu0  ;;  %3430 = vmatprep.subr.bf16.mxu0 %v2625_v37  ;;  %v2633_v17 = vunpack.c.l.s8.bf16 %v1657_v48  ;;  %v2637_v61 = vunpack.c.h.s8.bf16 %v1657_v48  ;;  %v2701_v35 = vunpack.c.h.s8.bf16 %v1689_v14  ;;  %v1661_v37 = vld [vmem:[%s4577_s27 + $0xea8] sm:$0xff]  ;;  %v1660_v43 = vld [vmem:[%s4577_s27 + $0xea0] sm:$0xff] }
 0x32c   : > { %v3170_v57 = vpop.f32.mrb[15].mxu1  ;;  %3471 = vmatprep.subr.bf16.mxu1 %v2689_v38  ;;  %v5256_v13 = vadd.f32 %v3167_v46, %v3127_v47  ;;  %v1693_v38 = vld [vmem:[%s4577_s27 + $0xfa8] sm:$0xff]  ;;  %v2641_v39 = vunpack.c.l.s8.bf16 %v1661_v37  ;;  %v2640_v46 = vunpack.c.l.s8.bf16 %v1660_v43  ;;  %v2704_v47 = vunpack.c.l.s8.bf16 %v1692_v44  ;;  %v1664_v48 = vld [vmem:[%s4577_s27 + $0xec0] sm:$0xff] }
 0x32d   : > { %v2705_v42 = vunpack.c.l.s8.bf16 %v1693_v38  ;;  %v2645_v53 = vunpack.c.h.s8.bf16 %v1661_v37  ;;  %v2709_v54 = vunpack.c.h.s8.bf16 %v1693_v38  ;;  %v2644_v8 = vunpack.c.h.s8.bf16 %v1660_v43  ;;  %v1696_v14 = vld [vmem:[%s4577_s27 + $0xfc0] sm:$0xff]  ;;  %v1701_v26 = vld [vmem:[%s4577_s27 + $0xfe8] sm:$0xff]  ;;  %v1195_v43 = vld [vmem:[%s4577_s27 + $0x18] sm:$0xff] }
 0x32e   : > { %3431 = vmatpush1.bf16.msra.mxu0 %v2624_v1  ;;  %v1665_v1 = vld [vmem:[%s4577_s27 + $0xec8] sm:$0xff]  ;;  %v2708_v57 = vunpack.c.h.s8.bf16 %v1692_v44  ;;  %v1668_v37 = vld [vmem:[%s4577_s27 + $0xee0] sm:$0xff]  ;;  %v1227_v44 = vld [vmem:[%s4577_s27 + $0x118] sm:$0xff] }
 0x32f   : > { %3472 = vmatpush1.bf16.msra.mxu1 %v2688_v5  ;;  %3432 = vmatprep.subr.bf16.mxu0 %v2629_v40  ;;  %v1697_v5 = vld [vmem:[%s4577_s27 + $0xfc8] sm:$0xff]  ;;  %v2649_v40 = vunpack.c.l.s8.bf16 %v1665_v1  ;;  %v1700_v38 = vld [vmem:[%s4577_s27 + $0xfe0] sm:$0xff] }
 0x330   : > { %3473 = vmatprep.subr.bf16.mxu1 %v2693_v21  ;;  %v2713_v21 = vunpack.c.l.s8.bf16 %v1697_v5 }
 0x332   : > { %3433 = vmatpush1.bf16.msra.mxu0 %v2628_v15  ;;  %v2648_v15 = vunpack.c.l.s8.bf16 %v1664_v48 }
 0x333   : > { %3474 = vmatpush1.bf16.msra.mxu1 %v2692_v16  ;;  %3434 = vmatprep.subr.bf16.mxu0 %v2633_v17  ;;  %v2712_v16 = vunpack.c.l.s8.bf16 %v1696_v14  ;;  %v2653_v17 = vunpack.c.h.s8.bf16 %v1665_v1  ;;  %v1194_v1 = vld [vmem:[%s4577_s27 + $0x10] sm:$0xff] }
 0x334   : > { %3475 = vmatprep.subr.bf16.mxu1 %v2697_v18  ;;  %v2717_v18 = vunpack.c.h.s8.bf16 %v1697_v5  ;;  %v1226_v5 = vld [vmem:[%s4577_s27 + $0x110] sm:$0xff] }
 0x336   : > { %3435 = vmatpush1.bf16.msra.mxu0 %v2632_v28  ;;  %v2652_v28 = vunpack.c.h.s8.bf16 %v1664_v48  ;;  %v1711_v48 = vunpack.c.h.s8.bf16 %v1195_v43 }
 0x337   : > { %3476 = vmatpush1.bf16.msra.mxu1 %v2696_v29  ;;  %3436 = vmatprep.subr.bf16.mxu0 %v2637_v61  ;;  %v2716_v29 = vunpack.c.h.s8.bf16 %v1696_v14  ;;  %v2657_v61 = vunpack.c.l.s8.bf16 %v1669_v3  ;;  %v1775_v14 = vunpack.c.h.s8.bf16 %v1227_v44 }
 0x338   : > { %3477 = vmatprep.subr.bf16.mxu1 %v2701_v35  ;;  %v2721_v35 = vunpack.c.l.s8.bf16 %v1701_v26 }
 0x33a   : > { %3437 = vmatpush1.bf16.msra.mxu0 %v2636_v24  ;;  %v2656_v24 = vunpack.c.l.s8.bf16 %v1668_v37 }
 0x33b   : > { %3478 = vmatpush1.bf16.msra.mxu1 %v2700_v41  ;;  %3438 = vmatprep.subr.bf16.mxu0 %v2641_v39  ;;  %v2720_v41 = vunpack.c.l.s8.bf16 %v1700_v38  ;;  %v2661_v39 = vunpack.c.h.s8.bf16 %v1669_v3  ;;  %v1198_v3 = vld [vmem:[%s4577_s27 + $0x30] sm:$0xff] }
 0x33c   : > { %3479 = vmatprep.subr.bf16.mxu1 %v2705_v42  ;;  %v2725_v42 = vunpack.c.h.s8.bf16 %v1701_v26  ;;  %v1230_v26 = vld [vmem:[%s4577_s27 + $0x130] sm:$0xff] }
 0x33e   : > { %3439 = vmatpush1.bf16.msra.mxu0 %v2640_v46  ;;  %v2660_v46 = vunpack.c.h.s8.bf16 %v1668_v37  ;;  %v1203_v37 = vld [vmem:[%s4577_s27 + $0x58] sm:$0xff] }
 0x33f   : > { %3480 = vmatpush1.bf16.msra.mxu1 %v2704_v47  ;;  %3440 = vmatprep.subr.bf16.mxu0 %v2645_v53  ;;  %v2724_v47 = vunpack.c.h.s8.bf16 %v1700_v38  ;;  %v1707_v53 = vunpack.c.l.s8.bf16 %v1195_v43  ;;  %v1235_v38 = vld [vmem:[%s4577_s27 + $0x158] sm:$0xff] }
 0x340   : > { %3481 = vmatprep.subr.bf16.mxu1 %v2709_v54  ;;  %v1771_v54 = vunpack.c.l.s8.bf16 %v1227_v44 }
 0x342   : > { %3441 = vmatpush1.bf16.msra.mxu0 %v2644_v8  ;;  %v5280_v8 = vcombine.low %v5223_v51, %v5223_v51  ;;  %v1710_v51 = vunpack.c.h.s8.bf16 %v1194_v1 }
 0x343   : > { %3482 = vmatpush1.bf16.msra.mxu1 %v2708_v57  ;;  %3442 = vmatprep.subr.bf16.mxu0 %v2649_v40  ;;  %v5284_v57 = vcombine.low %v5226_v52, %v5226_v52  ;;  %v1706_v40 = vunpack.c.l.s8.bf16 %v1194_v1  ;;  %v1774_v52 = vunpack.c.h.s8.bf16 %v1226_v5 }
 0x344   : > { %3483 = vmatprep.subr.bf16.mxu1 %v2713_v21  ;;  %v1770_v21 = vunpack.c.l.s8.bf16 %v1226_v5 }
 0x346   : > { %3443 = vmatpush1.bf16.msra.mxu0 %v2648_v15  ;;  %v1199_v15 = vld [vmem:[%s4577_s27 + $0x38] sm:$0xff] }
 0x347   : > { %3484 = vmatpush1.bf16.msra.mxu1 %v2712_v16  ;;  %3444 = vmatprep.subr.bf16.mxu0 %v2653_v17  ;;  %v1231_v16 = vld [vmem:[%s4577_s27 + $0x138] sm:$0xff]  ;;  %v1715_v17 = vunpack.c.l.s8.bf16 %v1199_v15 }
 0x348   : > { %3485 = vmatprep.subr.bf16.mxu1 %v2717_v18  ;;  %v1779_v18 = vunpack.c.l.s8.bf16 %v1231_v16 }
 0x34a   : > { %3445 = vmatpush1.bf16.msra.mxu0 %v2652_v28  ;;  %v1714_v28 = vunpack.c.l.s8.bf16 %v1198_v3 }
 0x34b   : > { %3486 = vmatpush1.bf16.msra.mxu1 %v2716_v29  ;;  %3446 = vmatprep.subr.bf16.mxu0 %v2657_v61  ;;  %v1778_v29 = vunpack.c.l.s8.bf16 %v1230_v26  ;;  %v1719_v61 = vunpack.c.h.s8.bf16 %v1199_v15 }
 0x34c   : > { %3487 = vmatprep.subr.bf16.mxu1 %v2721_v35  ;;  %v1783_v35 = vunpack.c.h.s8.bf16 %v1231_v16 }
 0x34e   : > { %3447 = vmatpush1.bf16.msra.mxu0 %v2656_v24  ;;  %v1718_v24 = vunpack.c.h.s8.bf16 %v1198_v3 }
 0x34f   : > { %3488 = vmatpush1.bf16.msra.mxu1 %v2720_v41  ;;  %3448 = vmatprep.subr.bf16.mxu0 %v2661_v39  ;;  %v1782_v41 = vunpack.c.h.s8.bf16 %v1230_v26  ;;  %v1202_v39 = vld [vmem:[%s4577_s27 + $0x50] sm:$0xff] }
 0x350   : > { %3489 = vmatprep.subr.bf16.mxu1 %v2725_v42  ;;  %v1234_v42 = vld [vmem:[%s4577_s27 + $0x150] sm:$0xff]  ;;  %v1722_v43 = vunpack.c.l.s8.bf16 %v1202_v39  ;;  %v1726_v1 = vunpack.c.h.s8.bf16 %v1202_v39 }
 0x351   : > { %v1786_v44 = vunpack.c.l.s8.bf16 %v1234_v42  ;;  %v1790_v5 = vunpack.c.h.s8.bf16 %v1234_v42 }
 0x352   : > { %3449 = vmatpush1.bf16.msra.mxu0 %v2660_v46  ;;  %v1727_v46 = vunpack.c.h.s8.bf16 %v1203_v37 }
 0x353   : > { %3490 = vmatpush1.bf16.msra.mxu1 %v2724_v47  ;;  %3500 = vmatprep.subr.bf16.mxu0 %v1707_v53  ;;  %v1791_v47 = vunpack.c.h.s8.bf16 %v1235_v38  ;;  %v1207_v53 = vld [vmem:[%s4577_s27 + $0x78] sm:$0xff] }
 0x354   : > { %3541 = vmatprep.subr.bf16.mxu1 %v1771_v54  ;;  %v1239_v54 = vld [vmem:[%s4577_s27 + $0x178] sm:$0xff] }
 0x355   : > { %3451 = vmatmul.mubr.bf16.vlgmr.msra.gmra.mrb[28].mxu0 %v5280_v8 }
 0x356   : > { %3492 = vmatmul.mubr.bf16.vlgmr.msra.gmra.mrb[28].mxu1 %v5284_v57  ;;  %3501 = vmatpush1.bf16.msra.mxu0 %v1706_v40  ;;  %v1731_v40 = vunpack.c.l.s8.bf16 %v1207_v53 }
 0x357   : > { %3542 = vmatpush1.bf16.msra.mxu1 %v1770_v21  ;;  %3502 = vmatprep.subr.bf16.mxu0 %v1711_v48  ;;  %v1795_v21 = vunpack.c.l.s8.bf16 %v1239_v54  ;;  %v1206_v48 = vld [vmem:[%s4577_s27 + $0x70] sm:$0xff] }
 0x358   : > { %3543 = vmatprep.subr.bf16.mxu1 %v1775_v14  ;;  %3532 = vmatprep.mubr.bf16.mxu0 %v4818_v9  ;;  %v1723_v9 = vunpack.c.l.s8.bf16 %v1203_v37  ;;  %v1238_v14 = vld [vmem:[%s4577_s27 + $0x170] sm:$0xff] }
 0x359   : > { %3573 = vmatprep.mubr.bf16.mxu1 %v4824_v12  ;;  %v1787_v12 = vunpack.c.l.s8.bf16 %v1235_v38  ;;  %v1799_v38 = vunpack.c.h.s8.bf16 %v1239_v54 }
 0x35a   : > { %3503 = vmatpush1.bf16.msra.mxu0 %v1710_v51 }
 0x35b   : > { %3544 = vmatpush1.bf16.msra.mxu1 %v1774_v52  ;;  %3504 = vmatprep.subr.bf16.mxu0 %v1715_v17 }
 0x35c   : > { %3545 = vmatprep.subr.bf16.mxu1 %v1779_v18 }
 0x35e   : > { %3505 = vmatpush1.bf16.msra.mxu0 %v1714_v28  ;;  %v1730_v28 = vunpack.c.l.s8.bf16 %v1206_v48 }
 0x35f   : > { %3546 = vmatpush1.bf16.msra.mxu1 %v1778_v29  ;;  %3506 = vmatprep.subr.bf16.mxu0 %v1719_v61  ;;  %v1794_v29 = vunpack.c.l.s8.bf16 %v1238_v14 }
 0x360   : > { %3547 = vmatprep.subr.bf16.mxu1 %v1783_v35 }
 0x362   : > { %3507 = vmatpush1.bf16.msra.mxu0 %v1718_v24 }
 0x363   : > { %3548 = vmatpush1.bf16.msra.mxu1 %v1782_v41  ;;  %3508 = vmatprep.subr.bf16.mxu0 %v1723_v9  ;;  %v1243_v41 = vld [vmem:[%s4577_s27 + $0x198] sm:$0xff]  ;;  %v1734_v9 = vunpack.c.h.s8.bf16 %v1206_v48 }
 0x364   : > { %3549 = vmatprep.subr.bf16.mxu1 %v1787_v12  ;;  %v1798_v12 = vunpack.c.h.s8.bf16 %v1238_v14  ;;  %v1803_v42 = vunpack.c.l.s8.bf16 %v1243_v41  ;;  %v1807_v54 = vunpack.c.h.s8.bf16 %v1243_v41 }
 0x366   : > { %3509 = vmatpush1.bf16.msra.mxu0 %v1722_v43  ;;  %v1210_v43 = vld [vmem:[%s4577_s27 + $0x90] sm:$0xff] }
 0x367   : > { %3550 = vmatpush1.bf16.msra.mxu1 %v1786_v44  ;;  %3510 = vmatprep.subr.bf16.mxu0 %v1727_v46  ;;  %v1242_v44 = vld [vmem:[%s4577_s27 + $0x190] sm:$0xff]  ;;  %v1738_v46 = vunpack.c.l.s8.bf16 %v1210_v43 }
 0x368   : > { %3551 = vmatprep.subr.bf16.mxu1 %v1791_v47  ;;  %v3206_v15 = vpop.f32.mrb[16].mxu0  ;;  %v1802_v47 = vunpack.c.l.s8.bf16 %v1242_v44 }
 0x369   : > { %v3247_v16 = vpop.f32.mrb[16].mxu1  ;;  %v3207_v51 = vadd.f32 %v3206_v15, %v5254_v7  ;;  %v3208_v52 = vpop.f32.mrb[17].mxu0  ;;  %v1735_v7 = vunpack.c.h.s8.bf16 %v1207_v53  ;;  %v1214_v15 = vld [vmem:[%s4577_s27 + $0xb0] sm:$0xff] }
 0x36a   : > { %v3249_v17 = vpop.f32.mrb[17].mxu1  ;;  %v3209_v18 = vadd.f32 %v3208_v52, %v5256_v13  ;;  %v3210_v3 = vpop.f32.mrb[18].mxu0  ;;  %3511 = vmatpush1.bf16.msra.mxu0 %v1726_v1  ;;  %v1211_v13 = vld [vmem:[%s4577_s27 + $0x98] sm:$0xff] }
 0x36b   : > { %v3251_v26 = vpop.f32.mrb[18].mxu1  ;;  %3552 = vmatpush1.bf16.msra.mxu1 %v1790_v5  ;;  %v5304_v61 = vadd.f32 %v3247_v16, %v3207_v51  ;;  %v3211_v35 = vpop.f32.mrb[19].mxu0  ;;  %3512 = vmatprep.subr.bf16.mxu0 %v1731_v40  ;;  %v1739_v39 = vunpack.c.l.s8.bf16 %v1211_v13  ;;  %v1743_v53 = vunpack.c.h.s8.bf16 %v1211_v13  ;;  %v1215_v1 = vld [vmem:[%s4577_s27 + $0xb8] sm:$0xff]  ;;  %v1742_v40 = vunpack.c.h.s8.bf16 %v1210_v43  ;;  %v1246_v16 = vld [vmem:[%s4577_s27 + $0x1b0] sm:$0xff] }
 0x36c   : > { %v3252_v37 = vpop.f32.mrb[19].mxu1  ;;  %3553 = vmatprep.subr.bf16.mxu1 %v1795_v21  ;;  %v5306_v24 = vadd.f32 %v3249_v17, %v3209_v18  ;;  %v1247_v5 = vld [vmem:[%s4577_s27 + $0x1b8] sm:$0xff]  ;;  %v1806_v21 = vunpack.c.h.s8.bf16 %v1242_v44  ;;  %v1747_v48 = vunpack.c.l.s8.bf16 %v1215_v1  ;;  %v1746_v51 = vunpack.c.l.s8.bf16 %v1214_v15 }
 0x36d   : > { %v1811_v14 = vunpack.c.l.s8.bf16 %v1247_v5  ;;  %v1810_v52 = vunpack.c.l.s8.bf16 %v1246_v16  ;;  %v1751_v17 = vunpack.c.h.s8.bf16 %v1215_v1  ;;  %v1815_v18 = vunpack.c.h.s8.bf16 %v1247_v5  ;;  %v1219_v3 = vld [vmem:[%s4577_s27 + $0xd8] sm:$0xff] }
 0x36e   : > { %3513 = vmatpush1.bf16.msra.mxu0 %v1730_v28  ;;  %v1251_v26 = vld [vmem:[%s4577_s27 + $0x1d8] sm:$0xff]  ;;  %v1750_v28 = vunpack.c.h.s8.bf16 %v1214_v15  ;;  %v1755_v35 = vunpack.c.l.s8.bf16 %v1219_v3 }
 0x36f   : > { %3554 = vmatpush1.bf16.msra.mxu1 %v1794_v29  ;;  %3514 = vmatprep.subr.bf16.mxu0 %v1735_v7  ;;  %v1814_v29 = vunpack.c.h.s8.bf16 %v1246_v16  ;;  %v1819_v37 = vunpack.c.l.s8.bf16 %v1251_v26  ;;  %v1218_v7 = vld [vmem:[%s4577_s27 + $0xd0] sm:$0xff] }
 0x370   : > { %3555 = vmatprep.subr.bf16.mxu1 %v1799_v38  ;;  %v1250_v38 = vld [vmem:[%s4577_s27 + $0x1d0] sm:$0xff]  ;;  %v1754_v13 = vunpack.c.l.s8.bf16 %v1218_v7  ;;  %v1758_v43 = vunpack.c.h.s8.bf16 %v1218_v7 }
 0x371   : > { %v1818_v41 = vunpack.c.l.s8.bf16 %v1250_v38  ;;  %v1822_v44 = vunpack.c.h.s8.bf16 %v1250_v38 }
 0x372   : > { %3515 = vmatpush1.bf16.msra.mxu0 %v1734_v9  ;;  %v1759_v9 = vunpack.c.h.s8.bf16 %v1219_v3 }
 0x373   : > { %3556 = vmatpush1.bf16.msra.mxu1 %v1798_v12  ;;  %3516 = vmatprep.subr.bf16.mxu0 %v1739_v39  ;;  %v1823_v12 = vunpack.c.h.s8.bf16 %v1251_v26  ;;  %v1223_v39 = vld [vmem:[%s4577_s27 + $0xf8] sm:$0xff] }
 0x374   : > { %3557 = vmatprep.subr.bf16.mxu1 %v1803_v42  ;;  %v1255_v42 = vld [vmem:[%s4577_s27 + $0x1f8] sm:$0xff] }
 0x376   : > { %3517 = vmatpush1.bf16.msra.mxu0 %v1738_v46  ;;  %v1763_v46 = vunpack.c.l.s8.bf16 %v1223_v39 }
 0x377   : > { %3558 = vmatpush1.bf16.msra.mxu1 %v1802_v47  ;;  %3518 = vmatprep.subr.bf16.mxu0 %v1743_v53  ;;  %v1827_v47 = vunpack.c.l.s8.bf16 %v1255_v42  ;;  %v1222_v53 = vld [vmem:[%s4577_s27 + $0xf0] sm:$0xff] }
 0x378   : > { %3559 = vmatprep.subr.bf16.mxu1 %v1807_v54  ;;  %v1254_v54 = vld [vmem:[%s4577_s27 + $0x1f0] sm:$0xff]  ;;  %v1762_v1 = vunpack.c.l.s8.bf16 %v1222_v53  ;;  %v1766_v15 = vunpack.c.h.s8.bf16 %v1222_v53 }
 0x379   : > { %v1826_v5 = vunpack.c.l.s8.bf16 %v1254_v54  ;;  %v1830_v16 = vunpack.c.h.s8.bf16 %v1254_v54  ;;  %v1266_v53 = vld [vmem:[%s4577_s27 + $0x250] sm:$0xff] }
 0x37a   : > { %3519 = vmatpush1.bf16.msra.mxu0 %v1742_v40  ;;  %v1767_v40 = vunpack.c.h.s8.bf16 %v1223_v39  ;;  %v1298_v54 = vld [vmem:[%s4577_s27 + $0x350] sm:$0xff] }
 0x37b   : > { %3560 = vmatpush1.bf16.msra.mxu1 %v1806_v21  ;;  %3520 = vmatprep.subr.bf16.mxu0 %v1747_v48  ;;  %v1831_v21 = vunpack.c.h.s8.bf16 %v1255_v42  ;;  %v1259_v48 = vld [vmem:[%s4577_s27 + $0x218] sm:$0xff] }
 0x37c   : > { %3561 = vmatprep.subr.bf16.mxu1 %v1811_v14  ;;  %v1291_v14 = vld [vmem:[%s4577_s27 + $0x318] sm:$0xff] }
 0x37e   : > { %3521 = vmatpush1.bf16.msra.mxu0 %v1746_v51  ;;  %v1835_v51 = vunpack.c.l.s8.bf16 %v1259_v48 }
 0x37f   : > { %3562 = vmatpush1.bf16.msra.mxu1 %v1810_v52  ;;  %3522 = vmatprep.subr.bf16.mxu0 %v1751_v17  ;;  %v1899_v52 = vunpack.c.l.s8.bf16 %v1291_v14  ;;  %v1258_v17 = vld [vmem:[%s4577_s27 + $0x210] sm:$0xff] }
 0x380   : > { %3563 = vmatprep.subr.bf16.mxu1 %v1815_v18  ;;  %v1290_v18 = vld [vmem:[%s4577_s27 + $0x310] sm:$0xff]  ;;  %v1834_v3 = vunpack.c.l.s8.bf16 %v1258_v17  ;;  %v1838_v7 = vunpack.c.h.s8.bf16 %v1258_v17 }
 0x381   : > { %v1898_v26 = vunpack.c.l.s8.bf16 %v1290_v18  ;;  %v1902_v38 = vunpack.c.h.s8.bf16 %v1290_v18  ;;  %v1270_v17 = vld [vmem:[%s4577_s27 + $0x270] sm:$0xff] }
 0x382   : > { %3523 = vmatpush1.bf16.msra.mxu0 %v1750_v28  ;;  %v1839_v28 = vunpack.c.h.s8.bf16 %v1259_v48  ;;  %v1271_v48 = vld [vmem:[%s4577_s27 + $0x278] sm:$0xff]  ;;  %v1302_v18 = vld [vmem:[%s4577_s27 + $0x370] sm:$0xff] }
 0x383   : > { %3564 = vmatpush1.bf16.msra.mxu1 %v1814_v29  ;;  %3524 = vmatprep.subr.bf16.mxu0 %v1755_v35  ;;  %v1903_v29 = vunpack.c.h.s8.bf16 %v1291_v14  ;;  %v1263_v35 = vld [vmem:[%s4577_s27 + $0x238] sm:$0xff] }
 0x384   : > { %3565 = vmatprep.subr.bf16.mxu1 %v1819_v37  ;;  %v1295_v37 = vld [vmem:[%s4577_s27 + $0x338] sm:$0xff]  ;;  %v1847_v39 = vunpack.c.h.s8.bf16 %v1263_v35 }
 0x385   : > { %v1911_v42 = vunpack.c.h.s8.bf16 %v1295_v37  ;;  %v1303_v14 = vld [vmem:[%s4577_s27 + $0x378] sm:$0xff] }
 0x386   : > { %3525 = vmatpush1.bf16.msra.mxu0 %v1754_v13  ;;  %v1843_v13 = vunpack.c.l.s8.bf16 %v1263_v35 }
 0x387   : > { %3566 = vmatpush1.bf16.msra.mxu1 %v1818_v41  ;;  %3526 = vmatprep.subr.bf16.mxu0 %v1759_v9  ;;  %v1907_v41 = vunpack.c.l.s8.bf16 %v1295_v37  ;;  %v1262_v9 = vld [vmem:[%s4577_s27 + $0x230] sm:$0xff] }
 0x388   : > { %3567 = vmatprep.subr.bf16.mxu1 %v1823_v12  ;;  %v1294_v12 = vld [vmem:[%s4577_s27 + $0x330] sm:$0xff] }
 0x38a   : > { %3527 = vmatpush1.bf16.msra.mxu0 %v1758_v43  ;;  %v1267_v43 = vld [vmem:[%s4577_s27 + $0x258] sm:$0xff] }
 0x38b   : > { %3568 = vmatpush1.bf16.msra.mxu1 %v1822_v44  ;;  %3528 = vmatprep.subr.bf16.mxu0 %v1763_v46  ;;  %v1299_v44 = vld [vmem:[%s4577_s27 + $0x358] sm:$0xff]  ;;  %v1846_v46 = vunpack.c.h.s8.bf16 %v1262_v9 }
 0x38c   : > { %3569 = vmatprep.subr.bf16.mxu1 %v1827_v47  ;;  %v1910_v47 = vunpack.c.h.s8.bf16 %v1294_v12 }
 0x38e   : > { %3529 = vmatpush1.bf16.msra.mxu0 %v1762_v1  ;;  %v1850_v1 = vunpack.c.l.s8.bf16 %v1266_v53 }
 0x38f   : > { %3570 = vmatpush1.bf16.msra.mxu1 %v1826_v5  ;;  %3530 = vmatprep.subr.bf16.mxu0 %v1767_v40  ;;  %v1914_v5 = vunpack.c.l.s8.bf16 %v1298_v54  ;;  %v1855_v40 = vunpack.c.h.s8.bf16 %v1267_v43 }
 0x390   : > { %3571 = vmatprep.subr.bf16.mxu1 %v1831_v21  ;;  %v1919_v21 = vunpack.c.h.s8.bf16 %v1299_v44 }
 0x392   : > { %3531 = vmatpush1.bf16.msra.mxu0 %v1766_v15  ;;  %v1854_v15 = vunpack.c.h.s8.bf16 %v1266_v53 }
 0x393   : > { %3572 = vmatpush1.bf16.msra.mxu1 %v1830_v16  ;;  %3582 = vmatprep.subr.bf16.mxu0 %v1835_v51  ;;  %v1918_v16 = vunpack.c.h.s8.bf16 %v1298_v54  ;;  %v1859_v51 = vunpack.c.l.s8.bf16 %v1271_v48 }
 0x394   : > { %3623 = vmatprep.subr.bf16.mxu1 %v1899_v52  ;;  %v1923_v52 = vunpack.c.l.s8.bf16 %v1303_v14 }
 0x395   : > { %3533 = vmatmul.mubr.bf16.vlgmr.msra.gmra.mrb[32].mxu0 %v4852_v19  ;;  %v1842_v19 = vunpack.c.l.s8.bf16 %v1262_v9 }
 0x396   : > { %3574 = vmatmul.mubr.bf16.vlgmr.msra.gmra.mrb[32].mxu1 %v4856_v20  ;;  %3583 = vmatpush1.bf16.msra.mxu0 %v1834_v3  ;;  %v1906_v20 = vunpack.c.l.s8.bf16 %v1294_v12 }
 0x397   : > { %3624 = vmatpush1.bf16.msra.mxu1 %v1898_v26  ;;  %3584 = vmatprep.subr.bf16.mxu0 %v1839_v28 }
 0x398   : > { %3625 = vmatprep.subr.bf16.mxu1 %v1903_v29  ;;  %3614 = vmatprep.mubr.bf16.mxu0 %v4868_v4  ;;  %v1851_v4 = vunpack.c.l.s8.bf16 %v1267_v43  ;;  %v1862_v43 = vunpack.c.h.s8.bf16 %v1270_v17 }
 0x399   : > { %3655 = vmatprep.mubr.bf16.mxu1 %v4872_v27  ;;  %v1915_v27 = vunpack.c.l.s8.bf16 %v1299_v44  ;;  %v1926_v44 = vunpack.c.h.s8.bf16 %v1302_v18 }
 0x39a   : > { %3585 = vmatpush1.bf16.msra.mxu0 %v1838_v7 }
 0x39b   : > { %3626 = vmatpush1.bf16.msra.mxu1 %v1902_v38  ;;  %3586 = vmatprep.subr.bf16.mxu0 %v1843_v13  ;;  %v1858_v13 = vunpack.c.l.s8.bf16 %v1270_v17 }
 0x39c   : > { %3627 = vmatprep.subr.bf16.mxu1 %v1907_v41  ;;  %v1922_v41 = vunpack.c.l.s8.bf16 %v1302_v18 }
 0x39e   : > { %3587 = vmatpush1.bf16.msra.mxu0 %v1842_v19 }
 0x39f   : > { %3628 = vmatpush1.bf16.msra.mxu1 %v1906_v20  ;;  %3588 = vmatprep.subr.bf16.mxu0 %v1847_v39  ;;  %v1927_v20 = vunpack.c.h.s8.bf16 %v1303_v14 }
 0x3a0   : > { %3629 = vmatprep.subr.bf16.mxu1 %v1911_v42  ;;  %v1307_v42 = vld [vmem:[%s4577_s27 + $0x398] sm:$0xff] }
 0x3a2   : > { %3589 = vmatpush1.bf16.msra.mxu0 %v1846_v46 }
 0x3a3   : > { %3630 = vmatpush1.bf16.msra.mxu1 %v1910_v47  ;;  %3590 = vmatprep.subr.bf16.mxu0 %v1851_v4  ;;  %v1931_v47 = vunpack.c.l.s8.bf16 %v1307_v42  ;;  %v1274_v4 = vld [vmem:[%s4577_s27 + $0x290] sm:$0xff] }
 0x3a4   : > { %3631 = vmatprep.subr.bf16.mxu1 %v1915_v27  ;;  %v1306_v27 = vld [vmem:[%s4577_s27 + $0x390] sm:$0xff]  ;;  %v1866_v53 = vunpack.c.l.s8.bf16 %v1274_v4 }
 0x3a5   : > { %v1930_v54 = vunpack.c.l.s8.bf16 %v1306_v27  ;;  %v1934_v14 = vunpack.c.h.s8.bf16 %v1306_v27  ;;  %v1318_v27 = vld [vmem:[%s4577_s27 + $0x3f0] sm:$0xff] }
 0x3a6   : > { %3591 = vmatpush1.bf16.msra.mxu0 %v1850_v1 }
 0x3a7   : > { %3632 = vmatpush1.bf16.msra.mxu1 %v1914_v5  ;;  %3592 = vmatprep.subr.bf16.mxu0 %v1855_v40  ;;  %v1935_v5 = vunpack.c.h.s8.bf16 %v1307_v42  ;;  %v1279_v40 = vld [vmem:[%s4577_s27 + $0x2b8] sm:$0xff] }
 0x3a8   : > { %3633 = vmatprep.subr.bf16.mxu1 %v1919_v21  ;;  %v3288_v3 = vpop.f32.mrb[20].mxu0  ;;  %v1311_v21 = vld [vmem:[%s4577_s27 + $0x3b8] sm:$0xff] }
 0x3a9   : > { %v3329_v26 = vpop.f32.mrb[20].mxu1  ;;  %v3289_v28 = vadd.f32 %v3288_v3, %v5304_v61  ;;  %v3290_v29 = vpop.f32.mrb[21].mxu0  ;;  %v1863_v61 = vunpack.c.h.s8.bf16 %v1271_v48  ;;  %v1870_v48 = vunpack.c.h.s8.bf16 %v1274_v4  ;;  %v1879_v3 = vunpack.c.h.s8.bf16 %v1279_v40  ;;  %v1319_v42 = vld [vmem:[%s4577_s27 + $0x3f8] sm:$0xff]  ;;  %v1286_v4 = vld [vmem:[%s4577_s27 + $0x2f0] sm:$0xff] }
 0x3aa   : > { %v3331_v35 = vpop.f32.mrb[21].mxu1  ;;  %v3291_v37 = vadd.f32 %v3290_v29, %v5306_v24  ;;  %v3292_v7 = vpop.f32.mrb[22].mxu0  ;;  %3593 = vmatpush1.bf16.msra.mxu0 %v1854_v15  ;;  %v1275_v24 = vld [vmem:[%s4577_s27 + $0x298] sm:$0xff]  ;;  %v1875_v15 = vunpack.c.l.s8.bf16 %v1279_v40 }
 0x3ab   : > { %v3333_v38 = vpop.f32.mrb[22].mxu1  ;;  %3634 = vmatpush1.bf16.msra.mxu1 %v1918_v16  ;;  %v5346_v9 = vadd.f32 %v3329_v26, %v3289_v28  ;;  %v3293_v12 = vpop.f32.mrb[23].mxu0  ;;  %3594 = vmatprep.subr.bf16.mxu0 %v1859_v51  ;;  %v1867_v46 = vunpack.c.l.s8.bf16 %v1275_v24  ;;  %v1871_v1 = vunpack.c.h.s8.bf16 %v1275_v24  ;;  %v1939_v16 = vunpack.c.l.s8.bf16 %v1311_v21  ;;  %v1278_v51 = vld [vmem:[%s4577_s27 + $0x2b0] sm:$0xff]  ;;  %v1283_v28 = vld [vmem:[%s4577_s27 + $0x2d8] sm:$0xff] }
 0x3ac   : > { %v3334_v19 = vpop.f32.mrb[23].mxu1  ;;  %3635 = vmatprep.subr.bf16.mxu1 %v1923_v52  ;;  %v5348_v39 = vadd.f32 %v3331_v35, %v3291_v37  ;;  %v1310_v52 = vld [vmem:[%s4577_s27 + $0x3b0] sm:$0xff]  ;;  %v1874_v17 = vunpack.c.l.s8.bf16 %v1278_v51  ;;  %v1943_v26 = vunpack.c.h.s8.bf16 %v1311_v21  ;;  %v1315_v29 = vld [vmem:[%s4577_s27 + $0x3d8] sm:$0xff]  ;;  %v1878_v35 = vunpack.c.h.s8.bf16 %v1278_v51 }
 0x3ad   : > { %v1938_v18 = vunpack.c.l.s8.bf16 %v1310_v52  ;;  %v1942_v37 = vunpack.c.h.s8.bf16 %v1310_v52  ;;  %v1883_v7 = vunpack.c.l.s8.bf16 %v1283_v28  ;;  %v1947_v38 = vunpack.c.l.s8.bf16 %v1315_v29  ;;  %v1287_v24 = vld [vmem:[%s4577_s27 + $0x2f8] sm:$0xff]  ;;  %v1322_v51 = vld [vmem:[%s4577_s27 + $0x410] sm:$0xff] }
 0x3ae   : > { %3595 = vmatpush1.bf16.msra.mxu0 %v1858_v13  ;;  %v1282_v13 = vld [vmem:[%s4577_s27 + $0x2d0] sm:$0xff]  ;;  %v1323_v40 = vld [vmem:[%s4577_s27 + $0x418] sm:$0xff] }
 0x3af   : > { %3636 = vmatpush1.bf16.msra.mxu1 %v1922_v41  ;;  %3596 = vmatprep.subr.bf16.mxu0 %v1863_v61  ;;  %v1314_v41 = vld [vmem:[%s4577_s27 + $0x3d0] sm:$0xff]  ;;  %v1882_v12 = vunpack.c.l.s8.bf16 %v1282_v13  ;;  %v1887_v61 = vunpack.c.h.s8.bf16 %v1283_v28  ;;  %v1355_v21 = vld [vmem:[%s4577_s27 + $0x518] sm:$0xff] }
 0x3b0   : > { %3637 = vmatprep.subr.bf16.mxu1 %v1927_v20  ;;  %v1946_v19 = vunpack.c.l.s8.bf16 %v1314_v41  ;;  %v1951_v20 = vunpack.c.h.s8.bf16 %v1315_v29  ;;  %v1354_v52 = vld [vmem:[%s4577_s27 + $0x510] sm:$0xff]  ;;  %v1327_v28 = vld [vmem:[%s4577_s27 + $0x438] sm:$0xff] }
 0x3b1   : > { %v1359_v29 = vld [vmem:[%s4577_s27 + $0x538] sm:$0xff] }
 0x3b2   : > { %3597 = vmatpush1.bf16.msra.mxu0 %v1862_v43  ;;  %v1886_v43 = vunpack.c.h.s8.bf16 %v1282_v13  ;;  %v1326_v13 = vld [vmem:[%s4577_s27 + $0x430] sm:$0xff] }
 0x3b3   : > { %3638 = vmatpush1.bf16.msra.mxu1 %v1926_v44  ;;  %3598 = vmatprep.subr.bf16.mxu0 %v1867_v46  ;;  %v1950_v44 = vunpack.c.h.s8.bf16 %v1314_v41  ;;  %v1891_v46 = vunpack.c.l.s8.bf16 %v1287_v24  ;;  %v1358_v41 = vld [vmem:[%s4577_s27 + $0x530] sm:$0xff] }
 0x3b4   : > { %3639 = vmatprep.subr.bf16.mxu1 %v1931_v47  ;;  %v1955_v47 = vunpack.c.l.s8.bf16 %v1319_v42 }
 0x3b6   : > { %3599 = vmatpush1.bf16.msra.mxu0 %v1866_v53  ;;  %v1890_v53 = vunpack.c.l.s8.bf16 %v1286_v4 }
 0x3b7   : > { %3640 = vmatpush1.bf16.msra.mxu1 %v1930_v54  ;;  %3600 = vmatprep.subr.bf16.mxu0 %v1871_v1  ;;  %v1954_v54 = vunpack.c.l.s8.bf16 %v1318_v27  ;;  %v1895_v1 = vunpack.c.h.s8.bf16 %v1287_v24  ;;  %v1974_v24 = vunpack.c.h.s8.bf16 %v1326_v13 }
 0x3b8   : > { %3641 = vmatprep.subr.bf16.mxu1 %v1935_v5  ;;  %v1959_v5 = vunpack.c.h.s8.bf16 %v1319_v42  ;;  %v2038_v42 = vunpack.c.h.s8.bf16 %v1358_v41 }
 0x3ba   : > { %3601 = vmatpush1.bf16.msra.mxu0 %v1870_v48  ;;  %v1894_v48 = vunpack.c.h.s8.bf16 %v1286_v4 }
 0x3bb   : > { %3642 = vmatpush1.bf16.msra.mxu1 %v1934_v14  ;;  %3602 = vmatprep.subr.bf16.mxu0 %v1875_v15  ;;  %v1958_v14 = vunpack.c.h.s8.bf16 %v1318_v27  ;;  %v1963_v15 = vunpack.c.l.s8.bf16 %v1323_v40 }
 0x3bc   : > { %3643 = vmatprep.subr.bf16.mxu1 %v1939_v16  ;;  %v2027_v16 = vunpack.c.l.s8.bf16 %v1355_v21 }
 0x3be   : > { %3603 = vmatpush1.bf16.msra.mxu0 %v1874_v17  ;;  %v1962_v17 = vunpack.c.l.s8.bf16 %v1322_v51 }
 0x3bf   : > { %3644 = vmatpush1.bf16.msra.mxu1 %v1938_v18  ;;  %3604 = vmatprep.subr.bf16.mxu0 %v1879_v3  ;;  %v2026_v18 = vunpack.c.l.s8.bf16 %v1354_v52  ;;  %v1967_v3 = vunpack.c.h.s8.bf16 %v1323_v40 }
 0x3c0   : > { %3645 = vmatprep.subr.bf16.mxu1 %v1943_v26  ;;  %v2031_v26 = vunpack.c.h.s8.bf16 %v1355_v21 }
 0x3c2   : > { %3605 = vmatpush1.bf16.msra.mxu0 %v1878_v35  ;;  %v1966_v35 = vunpack.c.h.s8.bf16 %v1322_v51 }
 0x3c3   : > { %3646 = vmatpush1.bf16.msra.mxu1 %v1942_v37  ;;  %3606 = vmatprep.subr.bf16.mxu0 %v1883_v7  ;;  %v2030_v37 = vunpack.c.h.s8.bf16 %v1354_v52  ;;  %v1971_v7 = vunpack.c.l.s8.bf16 %v1327_v28 }
 0x3c4   : > { %3647 = vmatprep.subr.bf16.mxu1 %v1947_v38  ;;  %v2035_v38 = vunpack.c.l.s8.bf16 %v1359_v29 }
 0x3c6   : > { %3607 = vmatpush1.bf16.msra.mxu0 %v1882_v12  ;;  %v1975_v12 = vunpack.c.h.s8.bf16 %v1327_v28 }
 0x3c7   : > { %3648 = vmatpush1.bf16.msra.mxu1 %v1946_v19  ;;  %3608 = vmatprep.subr.bf16.mxu0 %v1887_v61  ;;  %v2039_v19 = vunpack.c.h.s8.bf16 %v1359_v29  ;;  %v1331_v61 = vld [vmem:[%s4577_s27 + $0x458] sm:$0xff] }
 0x3c8   : > { %3649 = vmatprep.subr.bf16.mxu1 %v1951_v20  ;;  %v1363_v20 = vld [vmem:[%s4577_s27 + $0x558] sm:$0xff]  ;;  %v1983_v4 = vunpack.c.h.s8.bf16 %v1331_v61 }
 0x3c9   : > { %v2047_v27 = vunpack.c.h.s8.bf16 %v1363_v20 }
 0x3ca   : > { %3609 = vmatpush1.bf16.msra.mxu0 %v1886_v43  ;;  %v1330_v43 = vld [vmem:[%s4577_s27 + $0x450] sm:$0xff] }
 0x3cb   : > { %3650 = vmatpush1.bf16.msra.mxu1 %v1950_v44  ;;  %3610 = vmatprep.subr.bf16.mxu0 %v1891_v46  ;;  %v1362_v44 = vld [vmem:[%s4577_s27 + $0x550] sm:$0xff]  ;;  %v1978_v46 = vunpack.c.l.s8.bf16 %v1330_v43 }
 0x3cc   : > { %3651 = vmatprep.subr.bf16.mxu1 %v1955_v47  ;;  %v2042_v47 = vunpack.c.l.s8.bf16 %v1362_v44 }
 0x3ce   : > { %3611 = vmatpush1.bf16.msra.mxu0 %v1890_v53  ;;  %v1335_v53 = vld [vmem:[%s4577_s27 + $0x478] sm:$0xff] }
 0x3cf   : > { %3652 = vmatpush1.bf16.msra.mxu1 %v1954_v54  ;;  %3612 = vmatprep.subr.bf16.mxu0 %v1895_v1  ;;  %v1367_v54 = vld [vmem:[%s4577_s27 + $0x578] sm:$0xff]  ;;  %v1982_v1 = vunpack.c.h.s8.bf16 %v1330_v43  ;;  %v1987_v40 = vunpack.c.l.s8.bf16 %v1335_v53 }
 0x3d0   : > { %3653 = vmatprep.subr.bf16.mxu1 %v1959_v5  ;;  %v2046_v5 = vunpack.c.h.s8.bf16 %v1362_v44  ;;  %v2051_v21 = vunpack.c.l.s8.bf16 %v1367_v54  ;;  %v1343_v43 = vld [vmem:[%s4577_s27 + $0x4b8] sm:$0xff] }
 0x3d1   : > { %v1375_v44 = vld [vmem:[%s4577_s27 + $0x5b8] sm:$0xff] }
 0x3d2   : > { %3613 = vmatpush1.bf16.msra.mxu0 %v1894_v48  ;;  %v1334_v48 = vld [vmem:[%s4577_s27 + $0x470] sm:$0xff] }
 0x3d3   : > { %3654 = vmatpush1.bf16.msra.mxu1 %v1958_v14  ;;  %3664 = vmatprep.subr.bf16.mxu0 %v1963_v15  ;;  %v1366_v14 = vld [vmem:[%s4577_s27 + $0x570] sm:$0xff]  ;;  %v1986_v28 = vunpack.c.l.s8.bf16 %v1334_v48 }
 0x3d4   : > { %3705 = vmatprep.subr.bf16.mxu1 %v2027_v16  ;;  %v2050_v29 = vunpack.c.l.s8.bf16 %v1366_v14 }
 0x3d5   : > { %3615 = vmatmul.mubr.bf16.vlgmr.msra.gmra.mrb[36].mxu0 %v4910_v63  ;;  %v1970_v63 = vunpack.c.l.s8.bf16 %v1326_v13 }
 0x3d6   : > { %3656 = vmatmul.mubr.bf16.vlgmr.msra.gmra.mrb[36].mxu1 %v4914_v0  ;;  %3665 = vmatpush1.bf16.msra.mxu0 %v1962_v17  ;;  %v2034_v0 = vunpack.c.l.s8.bf16 %v1358_v41  ;;  %v1371_v41 = vld [vmem:[%s4577_s27 + $0x598] sm:$0xff] }
 0x3d7   : > { %3706 = vmatpush1.bf16.msra.mxu1 %v2026_v18  ;;  %3666 = vmatprep.subr.bf16.mxu0 %v1967_v3 }
 0x3d8   : > { %3707 = vmatprep.subr.bf16.mxu1 %v2031_v26  ;;  %3696 = vmatprep.mubr.bf16.mxu0 %v4926_v22  ;;  %v1979_v22 = vunpack.c.l.s8.bf16 %v1331_v61  ;;  %v1338_v61 = vld [vmem:[%s4577_s27 + $0x490] sm:$0xff] }
 0x3d9   : > { %3737 = vmatprep.mubr.bf16.mxu1 %v4930_v11  ;;  %v2043_v11 = vunpack.c.l.s8.bf16 %v1363_v20  ;;  %v1370_v20 = vld [vmem:[%s4577_s27 + $0x590] sm:$0xff] }
 0x3da   : > { %3667 = vmatpush1.bf16.msra.mxu0 %v1966_v35 }
 0x3db   : > { %3708 = vmatpush1.bf16.msra.mxu1 %v2030_v37  ;;  %3668 = vmatprep.subr.bf16.mxu0 %v1971_v7 }
 0x3dc   : > { %3709 = vmatprep.subr.bf16.mxu1 %v2035_v38  ;;  %v2055_v38 = vunpack.c.h.s8.bf16 %v1367_v54  ;;  %v1374_v54 = vld [vmem:[%s4577_s27 + $0x5b0] sm:$0xff] }
 0x3de   : > { %3669 = vmatpush1.bf16.msra.mxu0 %v1970_v63  ;;  %v1990_v63 = vunpack.c.h.s8.bf16 %v1334_v48  ;;  %v1347_v48 = vld [vmem:[%s4577_s27 + $0x4d8] sm:$0xff] }
 0x3df   : > { %3710 = vmatpush1.bf16.msra.mxu1 %v2034_v0  ;;  %3670 = vmatprep.subr.bf16.mxu0 %v1975_v12  ;;  %v2054_v0 = vunpack.c.h.s8.bf16 %v1366_v14  ;;  %v1379_v14 = vld [vmem:[%s4577_s27 + $0x5d8] sm:$0xff] }
 0x3e0   : > { %3711 = vmatprep.subr.bf16.mxu1 %v2039_v19  ;;  %v2059_v19 = vunpack.c.l.s8.bf16 %v1371_v41 }
 0x3e2   : > { %3671 = vmatpush1.bf16.msra.mxu0 %v1974_v24  ;;  %v1994_v24 = vunpack.c.l.s8.bf16 %v1338_v61 }
 0x3e3   : > { %3712 = vmatpush1.bf16.msra.mxu1 %v2038_v42  ;;  %3672 = vmatprep.subr.bf16.mxu0 %v1979_v22  ;;  %v2058_v42 = vunpack.c.l.s8.bf16 %v1370_v20 }
 0x3e4   : > { %3713 = vmatprep.subr.bf16.mxu1 %v2043_v11  ;;  %v2063_v11 = vunpack.c.h.s8.bf16 %v1371_v41 }
 0x3e6   : > { %3673 = vmatpush1.bf16.msra.mxu0 %v1978_v46  ;;  %v1998_v46 = vunpack.c.h.s8.bf16 %v1338_v61 }
 0x3e7   : > { %3714 = vmatpush1.bf16.msra.mxu1 %v2042_v47  ;;  %3674 = vmatprep.subr.bf16.mxu0 %v1983_v4  ;;  %v2062_v47 = vunpack.c.h.s8.bf16 %v1370_v20  ;;  %v2003_v4 = vunpack.c.l.s8.bf16 %v1343_v43 }
 0x3e8   : > { %3715 = vmatprep.subr.bf16.mxu1 %v2047_v27  ;;  %v3370_v15 = vpop.f32.mrb[24].mxu0  ;;  %v2067_v27 = vunpack.c.l.s8.bf16 %v1375_v44 }
 0x3e9   : > { %v3411_v16 = vpop.f32.mrb[24].mxu1  ;;  %v3371_v51 = vadd.f32 %v3370_v15, %v5346_v9  ;;  %v3372_v52 = vpop.f32.mrb[25].mxu0  ;;  %v1991_v9 = vunpack.c.h.s8.bf16 %v1335_v53  ;;  %v1342_v53 = vld [vmem:[%s4577_s27 + $0x4b0] sm:$0xff] }
 0x3ea   : > { %v3413_v17 = vpop.f32.mrb[25].mxu1  ;;  %v3373_v18 = vadd.f32 %v3372_v52, %v5348_v39  ;;  %v3374_v3 = vpop.f32.mrb[26].mxu0  ;;  %3675 = vmatpush1.bf16.msra.mxu0 %v1982_v1  ;;  %v1339_v39 = vld [vmem:[%s4577_s27 + $0x498] sm:$0xff]  ;;  %v2002_v1 = vunpack.c.l.s8.bf16 %v1342_v53  ;;  %v2006_v15 = vunpack.c.h.s8.bf16 %v1342_v53  ;;  %v2075_v52 = vunpack.c.l.s8.bf16 %v1379_v14 }
 0x3eb   : > { %v3415_v26 = vpop.f32.mrb[26].mxu1  ;;  %3716 = vmatpush1.bf16.msra.mxu1 %v2046_v5  ;;  %v5388_v35 = vadd.f32 %v3411_v16, %v3371_v51  ;;  %v3375_v37 = vpop.f32.mrb[27].mxu0  ;;  %3676 = vmatprep.subr.bf16.mxu0 %v1987_v40  ;;  %v1995_v12 = vunpack.c.l.s8.bf16 %v1339_v39  ;;  %v1999_v22 = vunpack.c.h.s8.bf16 %v1339_v39  ;;  %v2066_v5 = vunpack.c.l.s8.bf16 %v1374_v54 }
 0x3ec   : > { %v3416_v7 = vpop.f32.mrb[27].mxu1  ;;  %3717 = vmatprep.subr.bf16.mxu1 %v2051_v21  ;;  %v5390_v13 = vadd.f32 %v3413_v17, %v3373_v18  ;;  %v2007_v40 = vunpack.c.h.s8.bf16 %v1343_v43  ;;  %v2071_v21 = vunpack.c.h.s8.bf16 %v1375_v44  ;;  %v2070_v16 = vunpack.c.h.s8.bf16 %v1374_v54  ;;  %v1346_v17 = vld [vmem:[%s4577_s27 + $0x4d0] sm:$0xff]  ;;  %v1351_v37 = vld [vmem:[%s4577_s27 + $0x4f8] sm:$0xff] }
 0x3ed   : > { %v2011_v51 = vunpack.c.l.s8.bf16 %v1347_v48  ;;  %v1378_v18 = vld [vmem:[%s4577_s27 + $0x5d0] sm:$0xff]  ;;  %v2010_v3 = vunpack.c.l.s8.bf16 %v1346_v17  ;;  %v1383_v7 = vld [vmem:[%s4577_s27 + $0x5f8] sm:$0xff]  ;;  %v2019_v39 = vunpack.c.l.s8.bf16 %v1351_v37  ;;  %v2023_v61 = vunpack.c.h.s8.bf16 %v1351_v37 }
 0x3ee   : > { %3677 = vmatpush1.bf16.msra.mxu0 %v1986_v28  ;;  %v2074_v26 = vunpack.c.l.s8.bf16 %v1378_v18  ;;  %v2015_v28 = vunpack.c.h.s8.bf16 %v1347_v48  ;;  %v2083_v41 = vunpack.c.l.s8.bf16 %v1383_v7  ;;  %v2087_v20 = vunpack.c.h.s8.bf16 %v1383_v7 }
 0x3ef   : > { %3718 = vmatpush1.bf16.msra.mxu1 %v2050_v29  ;;  %3678 = vmatprep.subr.bf16.mxu0 %v1991_v9  ;;  %v2079_v29 = vunpack.c.h.s8.bf16 %v1379_v14  ;;  %v2014_v9 = vunpack.c.h.s8.bf16 %v1346_v17  ;;  %v1395_v17 = vld [vmem:[%s4577_s27 + $0x658] sm:$0xff] }
 0x3f0   : > { %3719 = vmatprep.subr.bf16.mxu1 %v2055_v38  ;;  %v2078_v38 = vunpack.c.h.s8.bf16 %v1378_v18  ;;  %v1427_v18 = vld [vmem:[%s4577_s27 + $0x758] sm:$0xff] }
 0x3f2   : > { %3679 = vmatpush1.bf16.msra.mxu0 %v1990_v63  ;;  %v1350_v63 = vld [vmem:[%s4577_s27 + $0x4f0] sm:$0xff] }
 0x3f3   : > { %3720 = vmatpush1.bf16.msra.mxu1 %v2054_v0  ;;  %3680 = vmatprep.subr.bf16.mxu0 %v1995_v12  ;;  %v1382_v0 = vld [vmem:[%s4577_s27 + $0x5f0] sm:$0xff]  ;;  %v2018_v12 = vunpack.c.l.s8.bf16 %v1350_v63 }
 0x3f4   : > { %3721 = vmatprep.subr.bf16.mxu1 %v2059_v19  ;;  %v2082_v19 = vunpack.c.l.s8.bf16 %v1382_v0 }
 0x3f6   : > { %3681 = vmatpush1.bf16.msra.mxu0 %v1994_v24  ;;  %v1387_v24 = vld [vmem:[%s4577_s27 + $0x618] sm:$0xff] }
 0x3f7   : > { %3722 = vmatpush1.bf16.msra.mxu1 %v2058_v42  ;;  %3682 = vmatprep.subr.bf16.mxu0 %v1999_v22  ;;  %v1419_v42 = vld [vmem:[%s4577_s27 + $0x718] sm:$0xff]  ;;  %v2022_v22 = vunpack.c.h.s8.bf16 %v1350_v63  ;;  %v2091_v43 = vunpack.c.l.s8.bf16 %v1387_v24  ;;  %v2095_v53 = vunpack.c.h.s8.bf16 %v1387_v24 }
 0x3f8   : > { %3723 = vmatprep.subr.bf16.mxu1 %v2063_v11  ;;  %v2086_v11 = vunpack.c.h.s8.bf16 %v1382_v0  ;;  %v2155_v44 = vunpack.c.l.s8.bf16 %v1419_v42  ;;  %v2159_v54 = vunpack.c.h.s8.bf16 %v1419_v42 }
 0x3fa   : > { %3683 = vmatpush1.bf16.msra.mxu0 %v1998_v46  ;;  %v1386_v46 = vld [vmem:[%s4577_s27 + $0x610] sm:$0xff] }
 0x3fb   : > { %3724 = vmatpush1.bf16.msra.mxu1 %v2062_v47  ;;  %3684 = vmatprep.subr.bf16.mxu0 %v2003_v4  ;;  %v1418_v47 = vld [vmem:[%s4577_s27 + $0x710] sm:$0xff]  ;;  %v2090_v4 = vunpack.c.l.s8.bf16 %v1386_v46 }
 0x3fc   : > { %3725 = vmatprep.subr.bf16.mxu1 %v2067_v27  ;;  %v2154_v27 = vunpack.c.l.s8.bf16 %v1418_v47 }
 0x3fe   : > { %3685 = vmatpush1.bf16.msra.mxu0 %v2002_v1  ;;  %v1391_v1 = vld [vmem:[%s4577_s27 + $0x638] sm:$0xff] }
 0x3ff   : > { %3726 = vmatpush1.bf16.msra.mxu1 %v2066_v5  ;;  %3686 = vmatprep.subr.bf16.mxu0 %v2007_v40  ;;  %v1423_v5 = vld [vmem:[%s4577_s27 + $0x738] sm:$0xff]  ;;  %v2094_v40 = vunpack.c.h.s8.bf16 %v1386_v46  ;;  %v2099_v48 = vunpack.c.l.s8.bf16 %v1391_v1 }
 0x400   : > { %3727 = vmatprep.subr.bf16.mxu1 %v2071_v21  ;;  %v2158_v21 = vunpack.c.h.s8.bf16 %v1418_v47  ;;  %v2163_v14 = vunpack.c.l.s8.bf16 %v1423_v5 }
 0x402   : > { %3687 = vmatpush1.bf16.msra.mxu0 %v2006_v15  ;;  %v1390_v15 = vld [vmem:[%s4577_s27 + $0x630] sm:$0xff] }
 0x403   : > { %3728 = vmatpush1.bf16.msra.mxu1 %v2070_v16  ;;  %3688 = vmatprep.subr.bf16.mxu0 %v2011_v51  ;;  %v1422_v16 = vld [vmem:[%s4577_s27 + $0x730] sm:$0xff]  ;;  %v2103_v51 = vunpack.c.h.s8.bf16 %v1391_v1  ;;  %v2729_v1 = vld [vmem:[#allocation3 + $0x8] sm:$0xff] }
 0x404   : > { %3729 = vmatprep.subr.bf16.mxu1 %v2075_v52  ;;  %v2167_v52 = vunpack.c.h.s8.bf16 %v1423_v5 }
 0x406   : > { %3689 = vmatpush1.bf16.msra.mxu0 %v2010_v3  ;;  %v2102_v3 = vunpack.c.h.s8.bf16 %v1390_v15 }
 0x407   : > { %3730 = vmatpush1.bf16.msra.mxu1 %v2074_v26  ;;  %3690 = vmatprep.subr.bf16.mxu0 %v2015_v28  ;;  %v2166_v26 = vunpack.c.h.s8.bf16 %v1422_v16  ;;  %v1394_v28 = vld [vmem:[%s4577_s27 + $0x650] sm:$0xff] }
 0x408   : > { %3731 = vmatprep.subr.bf16.mxu1 %v2079_v29  ;;  %v1426_v29 = vld [vmem:[%s4577_s27 + $0x750] sm:$0xff]  ;;  %v2106_v37 = vunpack.c.l.s8.bf16 %v1394_v28  ;;  %v2110_v63 = vunpack.c.h.s8.bf16 %v1394_v28  ;;  %v1407_v28 = vld [vmem:[%s4577_s27 + $0x6b8] sm:$0xff] }
 0x409   : > { %v2170_v7 = vunpack.c.l.s8.bf16 %v1426_v29  ;;  %v2174_v0 = vunpack.c.h.s8.bf16 %v1426_v29  ;;  %v1439_v29 = vld [vmem:[%s4577_s27 + $0x7b8] sm:$0xff] }
 0x40a   : > { %3691 = vmatpush1.bf16.msra.mxu0 %v2014_v9  ;;  %v2111_v9 = vunpack.c.h.s8.bf16 %v1395_v17 }
 0x40b   : > { %3732 = vmatpush1.bf16.msra.mxu1 %v2078_v38  ;;  %3692 = vmatprep.subr.bf16.mxu0 %v2019_v39  ;;  %v2175_v38 = vunpack.c.h.s8.bf16 %v1427_v18  ;;  %v1399_v39 = vld [vmem:[%s4577_s27 + $0x678] sm:$0xff] }
 0x40c   : > { %3733 = vmatprep.subr.bf16.mxu1 %v2083_v41  ;;  %v1431_v41 = vld [vmem:[%s4577_s27 + $0x778] sm:$0xff] }
 0x40e   : > { %3693 = vmatpush1.bf16.msra.mxu0 %v2018_v12  ;;  %v2115_v12 = vunpack.c.l.s8.bf16 %v1399_v39 }
 0x40f   : > { %3734 = vmatpush1.bf16.msra.mxu1 %v2082_v19  ;;  %3694 = vmatprep.subr.bf16.mxu0 %v2023_v61  ;;  %v2179_v19 = vunpack.c.l.s8.bf16 %v1431_v41  ;;  %v1398_v61 = vld [vmem:[%s4577_s27 + $0x670] sm:$0xff] }
 0x410   : > { %3735 = vmatprep.subr.bf16.mxu1 %v2087_v20  ;;  %v1430_v20 = vld [vmem:[%s4577_s27 + $0x770] sm:$0xff] }
 0x412   : > { %3695 = vmatpush1.bf16.msra.mxu0 %v2022_v22 }
 0x413   : > { %3736 = vmatpush1.bf16.msra.mxu1 %v2086_v11  ;;  %3746 = vmatprep.subr.bf16.mxu0 %v2091_v43 }
 0x414   : > { %3787 = vmatprep.subr.bf16.mxu1 %v2155_v44  ;;  %v2728_v44 = vld [vmem:[#allocation3] sm:$0xff] }
 0x415   : > { %3697 = vmatmul.mubr.bf16.vlgmr.msra.gmra.mrb[40].mxu0 %v4968_v55  ;;  %v2098_v55 = vunpack.c.l.s8.bf16 %v1390_v15 }
 0x416   : > { %3738 = vmatmul.mubr.bf16.vlgmr.msra.gmra.mrb[40].mxu1 %v4972_v56  ;;  %3747 = vmatpush1.bf16.msra.mxu0 %v2090_v4  ;;  %v2162_v56 = vunpack.c.l.s8.bf16 %v1422_v16 }
 0x417   : > { %3788 = vmatpush1.bf16.msra.mxu1 %v2154_v27  ;;  %3748 = vmatprep.subr.bf16.mxu0 %v2095_v53  ;;  %v2114_v27 = vunpack.c.l.s8.bf16 %v1398_v61  ;;  %v2178_v53 = vunpack.c.l.s8.bf16 %v1430_v20 }
 0x418   : > { %3789 = vmatprep.subr.bf16.mxu1 %v2159_v54  ;;  %3778 = vmatprep.mubr.bf16.mxu0 %v4984_v2  ;;  %v2107_v2 = vunpack.c.l.s8.bf16 %v1395_v17  ;;  %v1402_v17 = vld [vmem:[%s4577_s27 + $0x690] sm:$0xff] }
 0x419   : > { %3819 = vmatprep.mubr.bf16.mxu1 %v4988_v6  ;;  %v2171_v6 = vunpack.c.l.s8.bf16 %v1427_v18  ;;  %v1434_v18 = vld [vmem:[%s4577_s27 + $0x790] sm:$0xff] }
 0x41a   : > { %3749 = vmatpush1.bf16.msra.mxu0 %v2094_v40 }
 0x41b   : > { %3790 = vmatpush1.bf16.msra.mxu1 %v2158_v21  ;;  %3750 = vmatprep.subr.bf16.mxu0 %v2099_v48  ;;  %v2183_v21 = vunpack.c.h.s8.bf16 %v1431_v41  ;;  %v1438_v41 = vld [vmem:[%s4577_s27 + $0x7b0] sm:$0xff] }
 0x41c   : > { %3791 = vmatprep.subr.bf16.mxu1 %v2163_v14  ;;  %v1435_v14 = vld [vmem:[%s4577_s27 + $0x798] sm:$0xff] }
 0x41e   : > { %3751 = vmatpush1.bf16.msra.mxu0 %v2098_v55  ;;  %v2118_v55 = vunpack.c.h.s8.bf16 %v1398_v61  ;;  %v1411_v61 = vld [vmem:[%s4577_s27 + $0x6d8] sm:$0xff] }
 0x41f   : > { %3792 = vmatpush1.bf16.msra.mxu1 %v2162_v56  ;;  %3752 = vmatprep.subr.bf16.mxu0 %v2103_v51  ;;  %v2182_v56 = vunpack.c.h.s8.bf16 %v1430_v20  ;;  %v1443_v20 = vld [vmem:[%s4577_s27 + $0x7d8] sm:$0xff] }
 0x420   : > { %3793 = vmatprep.subr.bf16.mxu1 %v2167_v52  ;;  %v2187_v52 = vunpack.c.l.s8.bf16 %v1435_v14 }
 0x422   : > { %3753 = vmatpush1.bf16.msra.mxu0 %v2102_v3  ;;  %v2122_v3 = vunpack.c.l.s8.bf16 %v1402_v17 }
 0x423   : > { %3794 = vmatpush1.bf16.msra.mxu1 %v2166_v26  ;;  %3754 = vmatprep.subr.bf16.mxu0 %v2107_v2  ;;  %v2186_v26 = vunpack.c.l.s8.bf16 %v1434_v18 }
 0x424   : > { %3795 = vmatprep.subr.bf16.mxu1 %v2171_v6  ;;  %v2191_v6 = vunpack.c.h.s8.bf16 %v1435_v14 }
 0x426   : > { %3755 = vmatpush1.bf16.msra.mxu0 %v2106_v37  ;;  %v2126_v37 = vunpack.c.h.s8.bf16 %v1402_v17 }
 0x427   : > { %3796 = vmatpush1.bf16.msra.mxu1 %v2170_v7  ;;  %3756 = vmatprep.subr.bf16.mxu0 %v2111_v9  ;;  %v2190_v7 = vunpack.c.h.s8.bf16 %v1434_v18  ;;  %v2131_v9 = vunpack.c.l.s8.bf16 %v1407_v28 }
 0x428   : > { %3797 = vmatprep.subr.bf16.mxu1 %v2175_v38  ;;  %v3452_v24 = vpop.f32.mrb[28].mxu0  ;;  %v2195_v38 = vunpack.c.l.s8.bf16 %v1439_v29 }
 0x429   : > { %v3493_v42 = vpop.f32.mrb[28].mxu1  ;;  %v3453_v22 = vadd.f32 %v3452_v24, %v5388_v35  ;;  %v3454_v11 = vpop.f32.mrb[29].mxu0  ;;  %v2119_v35 = vunpack.c.h.s8.bf16 %v1399_v39  ;;  %v1406_v39 = vld [vmem:[%s4577_s27 + $0x6b0] sm:$0xff] }
 0x42a   : > { %v3495_v43 = vpop.f32.mrb[29].mxu1  ;;  %v3455_v46 = vadd.f32 %v3454_v11, %v5390_v13  ;;  %v3456_v47 = vpop.f32.mrb[30].mxu0  ;;  %3757 = vmatpush1.bf16.msra.mxu0 %v2110_v63  ;;  %v1403_v13 = vld [vmem:[%s4577_s27 + $0x698] sm:$0xff]  ;;  %v2130_v63 = vunpack.c.l.s8.bf16 %v1406_v39  ;;  %v2134_v24 = vunpack.c.h.s8.bf16 %v1406_v39  ;;  %v2203_v11 = vunpack.c.l.s8.bf16 %v1443_v20 }
 0x42b   : > { %v3497_v4 = vpop.f32.mrb[30].mxu1  ;;  %3798 = vmatpush1.bf16.msra.mxu1 %v2174_v0  ;;  %v3494_v54 = vadd.f32 %v3493_v42, %v3453_v22  ;;  %v3457_v5 = vpop.f32.mrb[31].mxu0  ;;  %3758 = vmatprep.subr.bf16.mxu0 %v2115_v12  ;;  %v2123_v51 = vunpack.c.l.s8.bf16 %v1403_v13  ;;  %v2127_v2 = vunpack.c.h.s8.bf16 %v1403_v13  ;;  %v2194_v0 = vunpack.c.l.s8.bf16 %v1438_v41 }
 0x42c   : > { %v3498_v40 = vpop.f32.mrb[31].mxu1  ;;  %3799 = vmatprep.subr.bf16.mxu1 %v2179_v19  ;;  %v3496_v48 = vadd.f32 %v3495_v43, %v3455_v46  ;;  %v2135_v12 = vunpack.c.h.s8.bf16 %v1407_v28  ;;  %v2199_v19 = vunpack.c.h.s8.bf16 %v1439_v29  ;;  %v2198_v42 = vunpack.c.h.s8.bf16 %v1438_v41  ;;  %v1410_v43 = vld [vmem:[%s4577_s27 + $0x6d0] sm:$0xff] }
 0x42d   : > { %v4156_v15 = vadd.f32 %v3494_v54, %v2728_v44  ;;  %v2139_v22 = vunpack.c.l.s8.bf16 %v1411_v61  ;;  %v1442_v44 = vld [vmem:[%s4577_s27 + $0x7d0] sm:$0xff]  ;;  %v2138_v46 = vunpack.c.l.s8.bf16 %v1410_v43  ;;  %v2143_v4 = vunpack.c.h.s8.bf16 %v1411_v61  ;;  %v1447_v54 = vld [vmem:[%s4577_s27 + $0x7f8] sm:$0xff] }
 0x42e   : > { %v4157_v16 = vadd.f32 %v3496_v48, %v2729_v1  ;;  %3759 = vmatpush1.bf16.msra.mxu0 %v2114_v27  ;;  %v2202_v47 = vunpack.c.l.s8.bf16 %v1442_v44  ;;  %v2207_v27 = vunpack.c.h.s8.bf16 %v1443_v20  ;;  %v2142_v1 = vunpack.c.h.s8.bf16 %v1410_v43  ;;  %v1446_v48 = vld [vmem:[%s4577_s27 + $0x7f0] sm:$0xff]  ;;  %v1459_v61 = vld [vmem:[%s4577_s27 + $0x858] sm:$0xff] }
 0x42f   : > { %3800 = vmatpush1.bf16.msra.mxu1 %v2178_v53  ;;  %4160 = vst [vmem:[#allocation3] sm:$0xff] %v4156_v15  ;;  %3760 = vmatprep.subr.bf16.mxu0 %v2119_v35  ;;  %v1415_v53 = vld [vmem:[%s4577_s27 + $0x6f8] sm:$0xff]  ;;  %v2206_v5 = vunpack.c.h.s8.bf16 %v1442_v44  ;;  %v2211_v35 = vunpack.c.l.s8.bf16 %v1447_v54  ;;  %v2210_v14 = vunpack.c.l.s8.bf16 %v1446_v48 }
 0x430   : > { %3801 = vmatprep.subr.bf16.mxu1 %v2183_v21  ;;  %4161 = vst [vmem:[#allocation3 + $0x8] sm:$0xff] %v4157_v16  ;;  %v2147_v40 = vunpack.c.l.s8.bf16 %v1415_v53  ;;  %v1414_v21 = vld [vmem:[%s4577_s27 + $0x6f0] sm:$0xff]  ;;  %v2151_v15 = vunpack.c.h.s8.bf16 %v1415_v53  ;;  %v2215_v16 = vunpack.c.h.s8.bf16 %v1447_v54  ;;  %v1491_v20 = vld [vmem:[%s4577_s27 + $0x958] sm:$0xff] }
 0x431   : > { %v2146_v13 = vunpack.c.l.s8.bf16 %v1414_v21 }
 0x432   : > { %3761 = vmatpush1.bf16.msra.mxu0 %v2118_v55  ;;  %v1451_v55 = vld [vmem:[%s4577_s27 + $0x818] sm:$0xff] }
 0x433   : > { %3802 = vmatpush1.bf16.msra.mxu1 %v2182_v56  ;;  %3762 = vmatprep.subr.bf16.mxu0 %v2123_v51  ;;  %v1483_v56 = vld [vmem:[%s4577_s27 + $0x918] sm:$0xff]  ;;  %v2150_v51 = vunpack.c.h.s8.bf16 %v1414_v21  ;;  %v2219_v17 = vunpack.c.l.s8.bf16 %v1451_v55  ;;  %v2223_v28 = vunpack.c.h.s8.bf16 %v1451_v55 }
 0x434   : > { %3803 = vmatprep.subr.bf16.mxu1 %v2187_v52  ;;  %v2214_v52 = vunpack.c.h.s8.bf16 %v1446_v48  ;;  %v2283_v18 = vunpack.c.l.s8.bf16 %v1483_v56  ;;  %v2287_v29 = vunpack.c.h.s8.bf16 %v1483_v56 }
 0x436   : > { %3763 = vmatpush1.bf16.msra.mxu0 %v2122_v3  ;;  %v1450_v3 = vld [vmem:[%s4577_s27 + $0x810] sm:$0xff] }
 0x437   : > { %3804 = vmatpush1.bf16.msra.mxu1 %v2186_v26  ;;  %3764 = vmatprep.subr.bf16.mxu0 %v2127_v2  ;;  %v1482_v26 = vld [vmem:[%s4577_s27 + $0x910] sm:$0xff]  ;;  %v2218_v2 = vunpack.c.l.s8.bf16 %v1450_v3 }
 0x438   : > { %3805 = vmatprep.subr.bf16.mxu1 %v2191_v6  ;;  %v2282_v6 = vunpack.c.l.s8.bf16 %v1482_v26 }
 0x43a   : > { %3765 = vmatpush1.bf16.msra.mxu0 %v2126_v37  ;;  %v1455_v37 = vld [vmem:[%s4577_s27 + $0x838] sm:$0xff] }
 0x43b   : > { %3806 = vmatpush1.bf16.msra.mxu1 %v2190_v7  ;;  %3766 = vmatprep.subr.bf16.mxu0 %v2131_v9  ;;  %v1487_v7 = vld [vmem:[%s4577_s27 + $0x938] sm:$0xff]  ;;  %v2222_v9 = vunpack.c.h.s8.bf16 %v1450_v3  ;;  %v2227_v39 = vunpack.c.l.s8.bf16 %v1455_v37 }
 0x43c   : > { %3807 = vmatprep.subr.bf16.mxu1 %v2195_v38  ;;  %v2286_v38 = vunpack.c.h.s8.bf16 %v1482_v26  ;;  %v2291_v41 = vunpack.c.l.s8.bf16 %v1487_v7 }
 0x43e   : > { %3767 = vmatpush1.bf16.msra.mxu0 %v2130_v63  ;;  %v1454_v63 = vld [vmem:[%s4577_s27 + $0x830] sm:$0xff] }
 0x43f   : > { %3808 = vmatpush1.bf16.msra.mxu1 %v2194_v0  ;;  %3768 = vmatprep.subr.bf16.mxu0 %v2135_v12  ;;  %v1486_v0 = vld [vmem:[%s4577_s27 + $0x930] sm:$0xff]  ;;  %v2231_v12 = vunpack.c.h.s8.bf16 %v1455_v37 }
 0x440   : > { %3809 = vmatprep.subr.bf16.mxu1 %v2199_v19  ;;  %v2295_v19 = vunpack.c.h.s8.bf16 %v1487_v7 }
 0x442   : > { %3769 = vmatpush1.bf16.msra.mxu0 %v2134_v24  ;;  %v2230_v24 = vunpack.c.h.s8.bf16 %v1454_v63 }
 0x443   : > { %3810 = vmatpush1.bf16.msra.mxu1 %v2198_v42  ;;  %3770 = vmatprep.subr.bf16.mxu0 %v2139_v22  ;;  %v2294_v42 = vunpack.c.h.s8.bf16 %v1486_v0  ;;  %v1458_v22 = vld [vmem:[%s4577_s27 + $0x850] sm:$0xff] }
 0x444   : > { %3811 = vmatprep.subr.bf16.mxu1 %v2203_v11  ;;  %v1490_v11 = vld [vmem:[%s4577_s27 + $0x950] sm:$0xff]  ;;  %v2234_v43 = vunpack.c.l.s8.bf16 %v1458_v22  ;;  %v2238_v53 = vunpack.c.h.s8.bf16 %v1458_v22 }
 0x445   : > { %v2298_v44 = vunpack.c.l.s8.bf16 %v1490_v11  ;;  %v2302_v54 = vunpack.c.h.s8.bf16 %v1490_v11 }
 0x446   : > { %3771 = vmatpush1.bf16.msra.mxu0 %v2138_v46  ;;  %v2239_v46 = vunpack.c.h.s8.bf16 %v1459_v61 }
 0x447   : > { %3812 = vmatpush1.bf16.msra.mxu1 %v2202_v47  ;;  %3772 = vmatprep.subr.bf16.mxu0 %v2143_v4  ;;  %v2303_v47 = vunpack.c.h.s8.bf16 %v1491_v20  ;;  %v1463_v4 = vld [vmem:[%s4577_s27 + $0x878] sm:$0xff] }
 0x448   : > { %3813 = vmatprep.subr.bf16.mxu1 %v2207_v27  ;;  %v1495_v27 = vld [vmem:[%s4577_s27 + $0x978] sm:$0xff]  ;;  %v2247_v3 = vunpack.c.h.s8.bf16 %v1463_v4 }
 0x449   : > { %v2311_v26 = vunpack.c.h.s8.bf16 %v1495_v27 }
 0x44a   : > { %3773 = vmatpush1.bf16.msra.mxu0 %v2142_v1  ;;  %v2243_v1 = vunpack.c.l.s8.bf16 %v1463_v4 }
 0x44b   : > { %3814 = vmatpush1.bf16.msra.mxu1 %v2206_v5  ;;  %3774 = vmatprep.subr.bf16.mxu0 %v2147_v40  ;;  %v2307_v5 = vunpack.c.l.s8.bf16 %v1495_v27  ;;  %v1462_v40 = vld [vmem:[%s4577_s27 + $0x870] sm:$0xff] }
 0x44c   : > { %3815 = vmatprep.subr.bf16.mxu1 %v2211_v35  ;;  %v1494_v35 = vld [vmem:[%s4577_s27 + $0x970] sm:$0xff] }
 0x44e   : > { %3775 = vmatpush1.bf16.msra.mxu0 %v2146_v13 }
 0x44f   : > { %3816 = vmatpush1.bf16.msra.mxu1 %v2210_v14  ;;  %3776 = vmatprep.subr.bf16.mxu0 %v2151_v15 }
 0x450   : > { %3817 = vmatprep.subr.bf16.mxu1 %v2215_v16 }
 0x452   : > { %3777 = vmatpush1.bf16.msra.mxu0 %v2150_v51  ;;  %v2242_v51 = vunpack.c.l.s8.bf16 %v1462_v40 }
 0x453   : > { %3818 = vmatpush1.bf16.msra.mxu1 %v2214_v52  ;;  %3828 = vmatprep.subr.bf16.mxu0 %v2219_v17  ;;  %v2306_v52 = vunpack.c.l.s8.bf16 %v1494_v35 }
 0x454   : > { %3869 = vmatprep.subr.bf16.mxu1 %v2283_v18 }
 0x455   : > { %3779 = vmatmul.mubr.bf16.vlgmr.msra.gmra.mrb[44].mxu0 %v5026_v59  ;;  %v2226_v59 = vunpack.c.l.s8.bf16 %v1454_v63 }
 0x456   : > { %3820 = vmatmul.mubr.bf16.vlgmr.msra.gmra.mrb[44].mxu1 %v5030_v60  ;;  %3829 = vmatpush1.bf16.msra.mxu0 %v2218_v2  ;;  %v2290_v60 = vunpack.c.l.s8.bf16 %v1486_v0  ;;  %v1467_v2 = vld [vmem:[%s4577_s27 + $0x898] sm:$0xff] }
 0x457   : > { %3870 = vmatpush1.bf16.msra.mxu1 %v2282_v6  ;;  %3830 = vmatprep.subr.bf16.mxu0 %v2223_v28  ;;  %v1499_v6 = vld [vmem:[%s4577_s27 + $0x998] sm:$0xff]  ;;  %v2246_v28 = vunpack.c.h.s8.bf16 %v1462_v40  ;;  %v2251_v37 = vunpack.c.l.s8.bf16 %v1467_v2  ;;  %v2255_v63 = vunpack.c.h.s8.bf16 %v1467_v2 }
 0x458   : > { %3871 = vmatprep.subr.bf16.mxu1 %v2287_v29  ;;  %3860 = vmatprep.mubr.bf16.mxu0 %v5042_v58  ;;  %v2235_v58 = vunpack.c.l.s8.bf16 %v1459_v61  ;;  %v2310_v29 = vunpack.c.h.s8.bf16 %v1494_v35  ;;  %v2315_v7 = vunpack.c.l.s8.bf16 %v1499_v6  ;;  %v2319_v0 = vunpack.c.h.s8.bf16 %v1499_v6  ;;  %v1515_v2 = vld [vmem:[%s4577_s27 + $0xa18] sm:$0xff] }
 0x459   : > { %3901 = vmatprep.mubr.bf16.mxu1 %v5046_v10  ;;  %v2299_v10 = vunpack.c.l.s8.bf16 %v1491_v20  ;;  %v1547_v6 = vld [vmem:[%s4577_s27 + $0xb18] sm:$0xff] }
 0x45a   : > { %3831 = vmatpush1.bf16.msra.mxu0 %v2222_v9  ;;  %v1466_v9 = vld [vmem:[%s4577_s27 + $0x890] sm:$0xff] }
 0x45b   : > { %3872 = vmatpush1.bf16.msra.mxu1 %v2286_v38  ;;  %3832 = vmatprep.subr.bf16.mxu0 %v2227_v39  ;;  %v1498_v38 = vld [vmem:[%s4577_s27 + $0x990] sm:$0xff]  ;;  %v2250_v39 = vunpack.c.l.s8.bf16 %v1466_v9 }
 0x45c   : > { %3873 = vmatprep.subr.bf16.mxu1 %v2291_v41  ;;  %v2314_v41 = vunpack.c.l.s8.bf16 %v1498_v38 }
 0x45e   : > { %3833 = vmatpush1.bf16.msra.mxu0 %v2226_v59  ;;  %v1471_v59 = vld [vmem:[%s4577_s27 + $0x8b8] sm:$0xff] }
 0x45f   : > { %3874 = vmatpush1.bf16.msra.mxu1 %v2290_v60  ;;  %3834 = vmatprep.subr.bf16.mxu0 %v2231_v12  ;;  %v1503_v60 = vld [vmem:[%s4577_s27 + $0x9b8] sm:$0xff]  ;;  %v2254_v12 = vunpack.c.h.s8.bf16 %v1466_v9  ;;  %v2259_v61 = vunpack.c.l.s8.bf16 %v1471_v59  ;;  %v2263_v22 = vunpack.c.h.s8.bf16 %v1471_v59  ;;  %v1514_v9 = vld [vmem:[%s4577_s27 + $0xa10] sm:$0xff] }
 0x460   : > { %3875 = vmatprep.subr.bf16.mxu1 %v2295_v19  ;;  %v2318_v19 = vunpack.c.h.s8.bf16 %v1498_v38  ;;  %v2323_v20 = vunpack.c.l.s8.bf16 %v1503_v60  ;;  %v2327_v11 = vunpack.c.h.s8.bf16 %v1503_v60  ;;  %v1546_v38 = vld [vmem:[%s4577_s27 + $0xb10] sm:$0xff]  ;;  %v1519_v59 = vld [vmem:[%s4577_s27 + $0xa38] sm:$0xff] }
 0x461   : > { %v1551_v60 = vld [vmem:[%s4577_s27 + $0xb38] sm:$0xff] }
 0x462   : > { %3835 = vmatpush1.bf16.msra.mxu0 %v2230_v24  ;;  %v1470_v24 = vld [vmem:[%s4577_s27 + $0x8b0] sm:$0xff] }
 0x463   : > { %3876 = vmatpush1.bf16.msra.mxu1 %v2294_v42  ;;  %3836 = vmatprep.subr.bf16.mxu0 %v2235_v58  ;;  %v1502_v42 = vld [vmem:[%s4577_s27 + $0x9b0] sm:$0xff]  ;;  %v2258_v58 = vunpack.c.l.s8.bf16 %v1470_v24 }
 0x464   : > { %3877 = vmatprep.subr.bf16.mxu1 %v2299_v10  ;;  %v2322_v10 = vunpack.c.l.s8.bf16 %v1502_v42 }
 0x466   : > { %3837 = vmatpush1.bf16.msra.mxu0 %v2234_v43  ;;  %v1475_v43 = vld [vmem:[%s4577_s27 + $0x8d8] sm:$0xff] }
 0x467   : > { %3878 = vmatpush1.bf16.msra.mxu1 %v2298_v44  ;;  %3838 = vmatprep.subr.bf16.mxu0 %v2239_v46  ;;  %v1507_v44 = vld [vmem:[%s4577_s27 + $0x9d8] sm:$0xff]  ;;  %v2262_v46 = vunpack.c.h.s8.bf16 %v1470_v24  ;;  %v2267_v4 = vunpack.c.l.s8.bf16 %v1475_v43  ;;  %v2271_v40 = vunpack.c.h.s8.bf16 %v1475_v43  ;;  %v1518_v24 = vld [vmem:[%s4577_s27 + $0xa30] sm:$0xff] }
 0x468   : > { %3879 = vmatprep.subr.bf16.mxu1 %v2303_v47  ;;  %v3534_v21 = vpop.f32.mrb[32].mxu0  ;;  %v2326_v47 = vunpack.c.h.s8.bf16 %v1502_v42  ;;  %v2331_v27 = vunpack.c.l.s8.bf16 %v1507_v44  ;;  %v2335_v35 = vunpack.c.h.s8.bf16 %v1507_v44  ;;  %v1550_v42 = vld [vmem:[%s4577_s27 + $0xb30] sm:$0xff]  ;;  %v2358_v43 = vunpack.c.h.s8.bf16 %v1518_v24 }
 0x469   : > { %v3575_v48 = vpop.f32.mrb[32].mxu1  ;;  %v3536_v14 = vpop.f32.mrb[33].mxu0  ;;  %v2422_v44 = vunpack.c.h.s8.bf16 %v1550_v42 }
 0x46a   : > { %v5466_v13 = vadd.f32 %v3575_v48, %v3534_v21  ;;  %v3577_v15 = vpop.f32.mrb[33].mxu1  ;;  %v3538_v55 = vpop.f32.mrb[34].mxu0  ;;  %3839 = vmatpush1.bf16.msra.mxu0 %v2238_v53  ;;  %v1474_v53 = vld [vmem:[%s4577_s27 + $0x8d0] sm:$0xff]  ;;  %v1479_v21 = vld [vmem:[%s4577_s27 + $0x8f8] sm:$0xff] }
 0x46b   : > { %v5468_v16 = vadd.f32 %v3577_v15, %v3536_v14  ;;  %v3579_v56 = vpop.f32.mrb[34].mxu1  ;;  %3880 = vmatpush1.bf16.msra.mxu1 %v2302_v54  ;;  %v3539_v17 = vpop.f32.mrb[35].mxu0  ;;  %3840 = vmatprep.subr.bf16.mxu0 %v2243_v1  ;;  %v1506_v54 = vld [vmem:[%s4577_s27 + $0x9d0] sm:$0xff]  ;;  %v2266_v1 = vunpack.c.l.s8.bf16 %v1474_v53  ;;  %v1511_v48 = vld [vmem:[%s4577_s27 + $0x9f8] sm:$0xff]  ;;  %v2270_v14 = vunpack.c.h.s8.bf16 %v1474_v53  ;;  %v2275_v55 = vunpack.c.l.s8.bf16 %v1479_v21 }
 0x46c   : > { %v3580_v18 = vpop.f32.mrb[35].mxu1  ;;  %3881 = vmatprep.subr.bf16.mxu1 %v2307_v5  ;;  %v2330_v5 = vunpack.c.l.s8.bf16 %v1506_v54  ;;  %v2334_v15 = vunpack.c.h.s8.bf16 %v1506_v54  ;;  %v2339_v56 = vunpack.c.l.s8.bf16 %v1511_v48 }
 0x46e   : > { %3841 = vmatpush1.bf16.msra.mxu0 %v2242_v51  ;;  %v1478_v51 = vld [vmem:[%s4577_s27 + $0x8f0] sm:$0xff] }
 0x46f   : > { %3882 = vmatpush1.bf16.msra.mxu1 %v2306_v52  ;;  %3842 = vmatprep.subr.bf16.mxu0 %v2247_v3  ;;  %v1510_v52 = vld [vmem:[%s4577_s27 + $0x9f0] sm:$0xff]  ;;  %v2274_v17 = vunpack.c.l.s8.bf16 %v1478_v51  ;;  %v2279_v3 = vunpack.c.h.s8.bf16 %v1479_v21 }
 0x470   : > { %3883 = vmatprep.subr.bf16.mxu1 %v2311_v26  ;;  %v2338_v18 = vunpack.c.l.s8.bf16 %v1510_v52  ;;  %v2343_v26 = vunpack.c.h.s8.bf16 %v1511_v48 }
 0x472   : > { %3843 = vmatpush1.bf16.msra.mxu0 %v2246_v28  ;;  %v2278_v28 = vunpack.c.h.s8.bf16 %v1478_v51 }
 0x473   : > { %3884 = vmatpush1.bf16.msra.mxu1 %v2310_v29  ;;  %3844 = vmatprep.subr.bf16.mxu0 %v2251_v37  ;;  %v2342_v29 = vunpack.c.h.s8.bf16 %v1510_v52  ;;  %v2347_v37 = vunpack.c.l.s8.bf16 %v1515_v2 }
 0x474   : > { %3885 = vmatprep.subr.bf16.mxu1 %v2315_v7  ;;  %v2411_v7 = vunpack.c.l.s8.bf16 %v1547_v6 }
 0x476   : > { %3845 = vmatpush1.bf16.msra.mxu0 %v2250_v39  ;;  %v2346_v39 = vunpack.c.l.s8.bf16 %v1514_v9 }
 0x477   : > { %3886 = vmatpush1.bf16.msra.mxu1 %v2314_v41  ;;  %3846 = vmatprep.subr.bf16.mxu0 %v2255_v63  ;;  %v2410_v41 = vunpack.c.l.s8.bf16 %v1546_v38  ;;  %v2351_v63 = vunpack.c.h.s8.bf16 %v1515_v2 }
 0x478   : > { %3887 = vmatprep.subr.bf16.mxu1 %v2319_v0  ;;  %v2415_v0 = vunpack.c.h.s8.bf16 %v1547_v6 }
 0x47a   : > { %3847 = vmatpush1.bf16.msra.mxu0 %v2254_v12  ;;  %v2350_v12 = vunpack.c.h.s8.bf16 %v1514_v9 }
 0x47b   : > { %3888 = vmatpush1.bf16.msra.mxu1 %v2318_v19  ;;  %3848 = vmatprep.subr.bf16.mxu0 %v2259_v61  ;;  %v2414_v19 = vunpack.c.h.s8.bf16 %v1546_v38  ;;  %v2355_v61 = vunpack.c.l.s8.bf16 %v1519_v59  ;;  %v1563_v38 = vld [vmem:[%s4577_s27 + $0xb98] sm:$0xff] }
 0x47c   : > { %3889 = vmatprep.subr.bf16.mxu1 %v2323_v20  ;;  %v2419_v20 = vunpack.c.l.s8.bf16 %v1551_v60 }
 0x47e   : > { %3849 = vmatpush1.bf16.msra.mxu0 %v2258_v58  ;;  %v2359_v58 = vunpack.c.h.s8.bf16 %v1519_v59  ;;  %v1530_v59 = vld [vmem:[%s4577_s27 + $0xa90] sm:$0xff] }
 0x47f   : > { %3890 = vmatpush1.bf16.msra.mxu1 %v2322_v10  ;;  %3850 = vmatprep.subr.bf16.mxu0 %v2263_v22  ;;  %v2423_v10 = vunpack.c.h.s8.bf16 %v1551_v60  ;;  %v1523_v22 = vld [vmem:[%s4577_s27 + $0xa58] sm:$0xff]  ;;  %v1562_v60 = vld [vmem:[%s4577_s27 + $0xb90] sm:$0xff] }
 0x480   : > { %3891 = vmatprep.subr.bf16.mxu1 %v2327_v11  ;;  %v1555_v11 = vld [vmem:[%s4577_s27 + $0xb58] sm:$0xff]  ;;  %v2367_v53 = vunpack.c.h.s8.bf16 %v1523_v22 }
 0x481   : > { %v2431_v54 = vunpack.c.h.s8.bf16 %v1555_v11 }
 0x482   : > { %3851 = vmatpush1.bf16.msra.mxu0 %v2262_v46  ;;  %v1522_v46 = vld [vmem:[%s4577_s27 + $0xa50] sm:$0xff] }
 0x483   : > { %3892 = vmatpush1.bf16.msra.mxu1 %v2326_v47  ;;  %3852 = vmatprep.subr.bf16.mxu0 %v2267_v4  ;;  %v1554_v47 = vld [vmem:[%s4577_s27 + $0xb50] sm:$0xff]  ;;  %v2362_v4 = vunpack.c.l.s8.bf16 %v1522_v46 }
 0x484   : > { %3893 = vmatprep.subr.bf16.mxu1 %v2331_v27  ;;  %v2426_v27 = vunpack.c.l.s8.bf16 %v1554_v47 }
 0x486   : > { %3853 = vmatpush1.bf16.msra.mxu0 %v2266_v1  ;;  %v1527_v1 = vld [vmem:[%s4577_s27 + $0xa78] sm:$0xff] }
 0x487   : > { %3894 = vmatpush1.bf16.msra.mxu1 %v2330_v5  ;;  %3854 = vmatprep.subr.bf16.mxu0 %v2271_v40  ;;  %v1559_v5 = vld [vmem:[%s4577_s27 + $0xb78] sm:$0xff]  ;;  %v2366_v40 = vunpack.c.h.s8.bf16 %v1522_v46  ;;  %v2371_v21 = vunpack.c.l.s8.bf16 %v1527_v1 }
 0x488   : > { %3895 = vmatprep.subr.bf16.mxu1 %v2335_v35  ;;  %v2430_v35 = vunpack.c.h.s8.bf16 %v1554_v47  ;;  %v2435_v48 = vunpack.c.l.s8.bf16 %v1559_v5  ;;  %v1539_v46 = vld [vmem:[%s4577_s27 + $0xad8] sm:$0xff] }
 0x489   : > { %v1571_v47 = vld [vmem:[%s4577_s27 + $0xbd8] sm:$0xff] }
 0x48a   : > { %3855 = vmatpush1.bf16.msra.mxu0 %v2270_v14  ;;  %v1526_v14 = vld [vmem:[%s4577_s27 + $0xa70] sm:$0xff] }
 0x48b   : > { %3896 = vmatpush1.bf16.msra.mxu1 %v2334_v15  ;;  %3856 = vmatprep.subr.bf16.mxu0 %v2275_v55  ;;  %v1558_v15 = vld [vmem:[%s4577_s27 + $0xb70] sm:$0xff]  ;;  %v2370_v2 = vunpack.c.l.s8.bf16 %v1526_v14 }
 0x48c   : > { %3897 = vmatprep.subr.bf16.mxu1 %v2339_v56  ;;  %v2434_v6 = vunpack.c.l.s8.bf16 %v1558_v15 }
 0x48e   : > { %3857 = vmatpush1.bf16.msra.mxu0 %v2274_v17 }
 0x48f   : > { %3898 = vmatpush1.bf16.msra.mxu1 %v2338_v18  ;;  %3858 = vmatprep.subr.bf16.mxu0 %v2279_v3 }
 0x490   : > { %3899 = vmatprep.subr.bf16.mxu1 %v2343_v26 }
 0x492   : > { %3859 = vmatpush1.bf16.msra.mxu0 %v2278_v28 }
 0x493   : > { %3900 = vmatpush1.bf16.msra.mxu1 %v2342_v29  ;;  %3910 = vmatprep.subr.bf16.mxu0 %v2347_v37 }
 0x494   : > { %3951 = vmatprep.subr.bf16.mxu1 %v2411_v7  ;;  %v2439_v7 = vunpack.c.h.s8.bf16 %v1559_v5  ;;  %v1570_v5 = vld [vmem:[%s4577_s27 + $0xbd0] sm:$0xff] }
 0x495   : > { %3861 = vmatmul.mubr.bf16.vlgmr.msra.gmra.mrb[48].mxu0 %v5088_v30  ;;  %v2354_v30 = vunpack.c.l.s8.bf16 %v1518_v24  ;;  %v1535_v24 = vld [vmem:[%s4577_s27 + $0xab8] sm:$0xff] }
 0x496   : > { %3902 = vmatmul.mubr.bf16.vlgmr.msra.gmra.mrb[48].mxu1 %v5092_v31  ;;  %3911 = vmatpush1.bf16.msra.mxu0 %v2346_v39  ;;  %v2418_v31 = vunpack.c.l.s8.bf16 %v1550_v42  ;;  %v2374_v39 = vunpack.c.h.s8.bf16 %v1526_v14  ;;  %v1567_v42 = vld [vmem:[%s4577_s27 + $0xbb8] sm:$0xff] }
 0x497   : > { %3952 = vmatpush1.bf16.msra.mxu1 %v2410_v41  ;;  %3912 = vmatprep.subr.bf16.mxu0 %v2351_v63  ;;  %v2438_v41 = vunpack.c.h.s8.bf16 %v1558_v15  ;;  %v1543_v14 = vld [vmem:[%s4577_s27 + $0xaf8] sm:$0xff] }
 0x498   : > { %3953 = vmatprep.subr.bf16.mxu1 %v2415_v0  ;;  %3942 = vmatprep.mubr.bf16.mxu0 %v5104_v62  ;;  %v2363_v62 = vunpack.c.l.s8.bf16 %v1523_v22  ;;  %v2443_v0 = vunpack.c.l.s8.bf16 %v1563_v38  ;;  %v1534_v22 = vld [vmem:[%s4577_s27 + $0xab0] sm:$0xff]  ;;  %v1575_v15 = vld [vmem:[%s4577_s27 + $0xbf8] sm:$0xff] }
 0x499   : > { %3983 = vmatprep.mubr.bf16.mxu1 %v5108_v36  ;;  %v2427_v36 = vunpack.c.l.s8.bf16 %v1555_v11  ;;  %v1566_v11 = vld [vmem:[%s4577_s27 + $0xbb0] sm:$0xff] }
 0x49a   : > { %3913 = vmatpush1.bf16.msra.mxu0 %v2350_v12  ;;  %v2378_v12 = vunpack.c.l.s8.bf16 %v1530_v59 }
 0x49b   : > { %3954 = vmatpush1.bf16.msra.mxu1 %v2414_v19  ;;  %3914 = vmatprep.subr.bf16.mxu0 %v2355_v61  ;;  %v2442_v19 = vunpack.c.l.s8.bf16 %v1562_v60 }
 0x49c   : > { %3955 = vmatprep.subr.bf16.mxu1 %v2419_v20  ;;  %v2447_v20 = vunpack.c.h.s8.bf16 %v1563_v38 }
 0x49e   : > { %3915 = vmatpush1.bf16.msra.mxu0 %v2354_v30  ;;  %v2382_v30 = vunpack.c.h.s8.bf16 %v1530_v59 }
 0x49f   : > { %3956 = vmatpush1.bf16.msra.mxu1 %v2418_v31  ;;  %3916 = vmatprep.subr.bf16.mxu0 %v2359_v58  ;;  %v2446_v31 = vunpack.c.h.s8.bf16 %v1562_v60  ;;  %v2387_v58 = vunpack.c.l.s8.bf16 %v1535_v24 }
 0x4a0   : > { %3957 = vmatprep.subr.bf16.mxu1 %v2423_v10  ;;  %v2451_v10 = vunpack.c.l.s8.bf16 %v1567_v42 }
 0x4a2   : > { %3917 = vmatpush1.bf16.msra.mxu0 %v2358_v43  ;;  %v2386_v43 = vunpack.c.l.s8.bf16 %v1534_v22 }
 0x4a3   : > { %3958 = vmatpush1.bf16.msra.mxu1 %v2422_v44  ;;  %3918 = vmatprep.subr.bf16.mxu0 %v2363_v62  ;;  %v2450_v44 = vunpack.c.l.s8.bf16 %v1566_v11  ;;  %v2391_v62 = vunpack.c.h.s8.bf16 %v1535_v24 }
 0x4a4   : > { %3959 = vmatprep.subr.bf16.mxu1 %v2427_v36  ;;  %v2455_v36 = vunpack.c.h.s8.bf16 %v1567_v42 }
 0x4a6   : > { %3919 = vmatpush1.bf16.msra.mxu0 %v2362_v4  ;;  %v2390_v4 = vunpack.c.h.s8.bf16 %v1534_v22  ;;  %v1587_v22 = vld [vmem:[%s4577_s27 + $0xc58] sm:$0xff] }
 0x4a7   : > { %3960 = vmatpush1.bf16.msra.mxu1 %v2426_v27  ;;  %3920 = vmatprep.subr.bf16.mxu0 %v2367_v53  ;;  %v2454_v27 = vunpack.c.h.s8.bf16 %v1566_v11  ;;  %v2395_v53 = vunpack.c.l.s8.bf16 %v1539_v46  ;;  %v1619_v11 = vld [vmem:[%s4577_s27 + $0xd58] sm:$0xff] }
 0x4a8   : > { %3961 = vmatprep.subr.bf16.mxu1 %v2431_v54  ;;  %v3616_v55 = vpop.f32.mrb[36].mxu0  ;;  %v2459_v54 = vunpack.c.l.s8.bf16 %v1571_v47 }
 0x4a9   : > { %v3657_v56 = vpop.f32.mrb[36].mxu1  ;;  %v3617_v51 = vadd.f32 %v3616_v55, %v5466_v13  ;;  %v3618_v52 = vpop.f32.mrb[37].mxu0  ;;  %v2375_v13 = vunpack.c.h.s8.bf16 %v1527_v1  ;;  %v1538_v1 = vld [vmem:[%s4577_s27 + $0xad0] sm:$0xff] }
 0x4aa   : > { %v3659_v17 = vpop.f32.mrb[37].mxu1  ;;  %v3619_v18 = vadd.f32 %v3618_v52, %v5468_v16  ;;  %v3620_v3 = vpop.f32.mrb[38].mxu0  ;;  %3921 = vmatpush1.bf16.msra.mxu0 %v2366_v40  ;;  %v1531_v16 = vld [vmem:[%s4577_s27 + $0xa98] sm:$0xff]  ;;  %v2394_v40 = vunpack.c.l.s8.bf16 %v1538_v1  ;;  %v2398_v55 = vunpack.c.h.s8.bf16 %v1538_v1  ;;  %v2467_v52 = vunpack.c.l.s8.bf16 %v1575_v15 }
 0x4ab   : > { %v3661_v26 = vpop.f32.mrb[38].mxu1  ;;  %3962 = vmatpush1.bf16.msra.mxu1 %v2430_v35  ;;  %v5508_v28 = vadd.f32 %v3657_v56, %v3617_v51  ;;  %v3621_v29 = vpop.f32.mrb[39].mxu0  ;;  %3922 = vmatprep.subr.bf16.mxu0 %v2371_v21  ;;  %v2379_v63 = vunpack.c.l.s8.bf16 %v1531_v16  ;;  %v2383_v61 = vunpack.c.h.s8.bf16 %v1531_v16  ;;  %v2458_v35 = vunpack.c.l.s8.bf16 %v1570_v5 }
 0x4ac   : > { %v3662_v37 = vpop.f32.mrb[39].mxu1  ;;  %3963 = vmatprep.subr.bf16.mxu1 %v2435_v48  ;;  %v5510_v9 = vadd.f32 %v3659_v17, %v3619_v18  ;;  %v2399_v21 = vunpack.c.h.s8.bf16 %v1539_v46  ;;  %v2463_v48 = vunpack.c.h.s8.bf16 %v1571_v47  ;;  %v2462_v56 = vunpack.c.h.s8.bf16 %v1570_v5  ;;  %v1542_v17 = vld [vmem:[%s4577_s27 + $0xaf0] sm:$0xff]  ;;  %v1579_v29 = vld [vmem:[%s4577_s27 + $0xc18] sm:$0xff] }
 0x4ad   : > { %v2403_v51 = vunpack.c.l.s8.bf16 %v1543_v14  ;;  %v1574_v18 = vld [vmem:[%s4577_s27 + $0xbf0] sm:$0xff]  ;;  %v2402_v3 = vunpack.c.l.s8.bf16 %v1542_v17  ;;  %v1611_v37 = vld [vmem:[%s4577_s27 + $0xd18] sm:$0xff]  ;;  %v2475_v16 = vunpack.c.l.s8.bf16 %v1579_v29  ;;  %v2479_v59 = vunpack.c.h.s8.bf16 %v1579_v29 }
 0x4ae   : > { %3923 = vmatpush1.bf16.msra.mxu0 %v2370_v2  ;;  %v2466_v26 = vunpack.c.l.s8.bf16 %v1574_v18  ;;  %v2407_v2 = vunpack.c.h.s8.bf16 %v1543_v14  ;;  %v2539_v38 = vunpack.c.l.s8.bf16 %v1611_v37  ;;  %v2543_v60 = vunpack.c.h.s8.bf16 %v1611_v37 }
 0x4af   : > { %3964 = vmatpush1.bf16.msra.mxu1 %v2434_v6  ;;  %3924 = vmatprep.subr.bf16.mxu0 %v2375_v13  ;;  %v2471_v6 = vunpack.c.h.s8.bf16 %v1575_v15  ;;  %v2406_v13 = vunpack.c.h.s8.bf16 %v1542_v17 }
 0x4b0   : > { %3965 = vmatprep.subr.bf16.mxu1 %v2439_v7  ;;  %v2470_v7 = vunpack.c.h.s8.bf16 %v1574_v18 }
 0x4b2   : > { %3925 = vmatpush1.bf16.msra.mxu0 %v2374_v39  ;;  %v1578_v39 = vld [vmem:[%s4577_s27 + $0xc10] sm:$0xff] }
 0x4b3   : > { %3966 = vmatpush1.bf16.msra.mxu1 %v2438_v41  ;;  %3926 = vmatprep.subr.bf16.mxu0 %v2379_v63  ;;  %v1610_v41 = vld [vmem:[%s4577_s27 + $0xd10] sm:$0xff]  ;;  %v2474_v63 = vunpack.c.l.s8.bf16 %v1578_v39 }
 0x4b4   : > { %3967 = vmatprep.subr.bf16.mxu1 %v2443_v0  ;;  %v2538_v0 = vunpack.c.l.s8.bf16 %v1610_v41 }
 0x4b6   : > { %3927 = vmatpush1.bf16.msra.mxu0 %v2378_v12  ;;  %v1583_v12 = vld [vmem:[%s4577_s27 + $0xc38] sm:$0xff] }
 0x4b7   : > { %3968 = vmatpush1.bf16.msra.mxu1 %v2442_v19  ;;  %3928 = vmatprep.subr.bf16.mxu0 %v2383_v61  ;;  %v1615_v19 = vld [vmem:[%s4577_s27 + $0xd38] sm:$0xff]  ;;  %v2478_v61 = vunpack.c.h.s8.bf16 %v1578_v39  ;;  %v2483_v24 = vunpack.c.l.s8.bf16 %v1583_v12 }
 0x4b8   : > { %3969 = vmatprep.subr.bf16.mxu1 %v2447_v20  ;;  %v2542_v20 = vunpack.c.h.s8.bf16 %v1610_v41  ;;  %v2547_v42 = vunpack.c.l.s8.bf16 %v1615_v19 }
 0x4ba   : > { %3929 = vmatpush1.bf16.msra.mxu0 %v2382_v30  ;;  %v1582_v30 = vld [vmem:[%s4577_s27 + $0xc30] sm:$0xff] }
 0x4bb   : > { %3970 = vmatpush1.bf16.msra.mxu1 %v2446_v31  ;;  %3930 = vmatprep.subr.bf16.mxu0 %v2387_v58  ;;  %v1614_v31 = vld [vmem:[%s4577_s27 + $0xd30] sm:$0xff]  ;;  %v2487_v58 = vunpack.c.h.s8.bf16 %v1583_v12 }
 0x4bc   : > { %3971 = vmatprep.subr.bf16.mxu1 %v2451_v10  ;;  %v2551_v10 = vunpack.c.h.s8.bf16 %v1615_v19 }
 0x4be   : > { %3931 = vmatpush1.bf16.msra.mxu0 %v2386_v43  ;;  %v2486_v43 = vunpack.c.h.s8.bf16 %v1582_v30 }
 0x4bf   : > { %3972 = vmatpush1.bf16.msra.mxu1 %v2450_v44  ;;  %3932 = vmatprep.subr.bf16.mxu0 %v2391_v62  ;;  %v2550_v44 = vunpack.c.h.s8.bf16 %v1614_v31  ;;  %v1586_v62 = vld [vmem:[%s4577_s27 + $0xc50] sm:$0xff] }
 0x4c0   : > { %3973 = vmatprep.subr.bf16.mxu1 %v2455_v36  ;;  %v1618_v36 = vld [vmem:[%s4577_s27 + $0xd50] sm:$0xff]  ;;  %v2490_v46 = vunpack.c.l.s8.bf16 %v1586_v62  ;;  %v2494_v1 = vunpack.c.h.s8.bf16 %v1586_v62 }
 0x4c1   : > { %v2554_v47 = vunpack.c.l.s8.bf16 %v1618_v36  ;;  %v2558_v5 = vunpack.c.h.s8.bf16 %v1618_v36 }
 0x4c2   : > { %3933 = vmatpush1.bf16.msra.mxu0 %v2390_v4  ;;  %v2495_v4 = vunpack.c.h.s8.bf16 %v1587_v22 }
 0x4c3   : > { %3974 = vmatpush1.bf16.msra.mxu1 %v2454_v27  ;;  %3934 = vmatprep.subr.bf16.mxu0 %v2395_v53  ;;  %v2559_v27 = vunpack.c.h.s8.bf16 %v1619_v11  ;;  %v1591_v53 = vld [vmem:[%s4577_s27 + $0xc78] sm:$0xff] }
 0x4c4   : > { %3975 = vmatprep.subr.bf16.mxu1 %v2459_v54  ;;  %v1623_v54 = vld [vmem:[%s4577_s27 + $0xd78] sm:$0xff] }
 0x4c5   : > { %v2567_v37 = vunpack.c.h.s8.bf16 %v1623_v54 }
 0x4c6   : > { %3935 = vmatpush1.bf16.msra.mxu0 %v2394_v40  ;;  %v2499_v40 = vunpack.c.l.s8.bf16 %v1591_v53 }
 0x4c7   : > { %3976 = vmatpush1.bf16.msra.mxu1 %v2458_v35  ;;  %3936 = vmatprep.subr.bf16.mxu0 %v2399_v21  ;;  %v2563_v35 = vunpack.c.l.s8.bf16 %v1623_v54  ;;  %v1590_v21 = vld [vmem:[%s4577_s27 + $0xc70] sm:$0xff] }
 0x4c8   : > { %3977 = vmatprep.subr.bf16.mxu1 %v2463_v48  ;;  %v1622_v48 = vld [vmem:[%s4577_s27 + $0xd70] sm:$0xff] }
 0x4ca   : > { %3937 = vmatpush1.bf16.msra.mxu0 %v2398_v55 }
 0x4cb   : > { %3978 = vmatpush1.bf16.msra.mxu1 %v2462_v56  ;;  %3938 = vmatprep.subr.bf16.mxu0 %v2403_v51 }
 0x4cc   : > { %3979 = vmatprep.subr.bf16.mxu1 %v2467_v52 }
 0x4ce   : > { %3939 = vmatpush1.bf16.msra.mxu0 %v2402_v3  ;;  %v2498_v3 = vunpack.c.l.s8.bf16 %v1590_v21 }
 0x4cf   : > { %3980 = vmatpush1.bf16.msra.mxu1 %v2466_v26  ;;  %3940 = vmatprep.subr.bf16.mxu0 %v2407_v2  ;;  %v2562_v26 = vunpack.c.l.s8.bf16 %v1622_v48 }
 0x4d0   : > { %3981 = vmatprep.subr.bf16.mxu1 %v2471_v6 }
 0x4d2   : > { %3941 = vmatpush1.bf16.msra.mxu0 %v2406_v13 }
 0x4d3   : > { %3982 = vmatpush1.bf16.msra.mxu1 %v2470_v7  ;;  %3992 = vmatprep.subr.bf16.mxu0 %v2475_v16  ;;  %v1627_v7 = vld [vmem:[%s4577_s27 + $0xd98] sm:$0xff]  ;;  %v2502_v16 = vunpack.c.h.s8.bf16 %v1590_v21 }
 0x4d4   : > { %4033 = vmatprep.subr.bf16.mxu1 %v2539_v38  ;;  %v2566_v38 = vunpack.c.h.s8.bf16 %v1622_v48  ;;  %v2571_v41 = vunpack.c.l.s8.bf16 %v1627_v7  ;;  %v2575_v19 = vunpack.c.h.s8.bf16 %v1627_v7 }
 0x4d5   : > { %3943 = vmatmul.mubr.bf16.vlgmr.msra.gmra.mrb[52].mxu0 %v5152_v49  ;;  %v2482_v49 = vunpack.c.l.s8.bf16 %v1582_v30 }
 0x4d6   : > { %3984 = vmatmul.mubr.bf16.vlgmr.msra.gmra.mrb[52].mxu1 %v5156_v23  ;;  %3993 = vmatpush1.bf16.msra.mxu0 %v2474_v63  ;;  %v2546_v23 = vunpack.c.l.s8.bf16 %v1614_v31  ;;  %v1594_v63 = vld [vmem:[%s4577_s27 + $0xc90] sm:$0xff] }
 0x4d7   : > { %4034 = vmatpush1.bf16.msra.mxu1 %v2538_v0  ;;  %3994 = vmatprep.subr.bf16.mxu0 %v2479_v59  ;;  %v1626_v0 = vld [vmem:[%s4577_s27 + $0xd90] sm:$0xff]  ;;  %v2506_v59 = vunpack.c.l.s8.bf16 %v1594_v63 }
 0x4d8   : > { %4035 = vmatprep.subr.bf16.mxu1 %v2543_v60  ;;  %4024 = vmatprep.mubr.bf16.mxu0 %v5168_v33  ;;  %v2491_v33 = vunpack.c.l.s8.bf16 %v1587_v22  ;;  %v2570_v60 = vunpack.c.l.s8.bf16 %v1626_v0 }
 0x4d9   : > { %4065 = vmatprep.mubr.bf16.mxu1 %v5172_v34  ;;  %v2555_v34 = vunpack.c.l.s8.bf16 %v1619_v11 }
 0x4da   : > { %3995 = vmatpush1.bf16.msra.mxu0 %v2478_v61  ;;  %v1599_v61 = vld [vmem:[%s4577_s27 + $0xcb8] sm:$0xff] }
 0x4db   : > { %4036 = vmatpush1.bf16.msra.mxu1 %v2542_v20  ;;  %3996 = vmatprep.subr.bf16.mxu0 %v2483_v24  ;;  %v1631_v20 = vld [vmem:[%s4577_s27 + $0xdb8] sm:$0xff]  ;;  %v2510_v24 = vunpack.c.h.s8.bf16 %v1594_v63  ;;  %v2515_v30 = vunpack.c.l.s8.bf16 %v1599_v61  ;;  %v2519_v22 = vunpack.c.h.s8.bf16 %v1599_v61 }
 0x4dc   : > { %4037 = vmatprep.subr.bf16.mxu1 %v2547_v42  ;;  %v2574_v42 = vunpack.c.h.s8.bf16 %v1626_v0  ;;  %v2579_v31 = vunpack.c.l.s8.bf16 %v1631_v20  ;;  %v2583_v11 = vunpack.c.h.s8.bf16 %v1631_v20 }
 0x4de   : > { %3997 = vmatpush1.bf16.msra.mxu0 %v2482_v49  ;;  %v1598_v49 = vld [vmem:[%s4577_s27 + $0xcb0] sm:$0xff] }
 0x4df   : > { %4038 = vmatpush1.bf16.msra.mxu1 %v2546_v23  ;;  %3998 = vmatprep.subr.bf16.mxu0 %v2487_v58  ;;  %v1630_v23 = vld [vmem:[%s4577_s27 + $0xdb0] sm:$0xff]  ;;  %v2514_v58 = vunpack.c.l.s8.bf16 %v1598_v49 }
 0x4e0   : > { %4039 = vmatprep.subr.bf16.mxu1 %v2551_v10  ;;  %v2578_v10 = vunpack.c.l.s8.bf16 %v1630_v23 }
 0x4e2   : > { %3999 = vmatpush1.bf16.msra.mxu0 %v2486_v43  ;;  %v1603_v43 = vld [vmem:[%s4577_s27 + $0xcd8] sm:$0xff] }
 0x4e3   : > { %4040 = vmatpush1.bf16.msra.mxu1 %v2550_v44  ;;  %4000 = vmatprep.subr.bf16.mxu0 %v2491_v33  ;;  %v1635_v44 = vld [vmem:[%s4577_s27 + $0xdd8] sm:$0xff]  ;;  %v2518_v33 = vunpack.c.h.s8.bf16 %v1598_v49  ;;  %v2523_v62 = vunpack.c.l.s8.bf16 %v1603_v43  ;;  %v1650_v49 = vld [vmem:[%s4577_s27 + $0xe50] sm:$0xff] }
 0x4e4   : > { %4041 = vmatprep.subr.bf16.mxu1 %v2555_v34  ;;  %v2582_v34 = vunpack.c.h.s8.bf16 %v1630_v23  ;;  %v2587_v36 = vunpack.c.l.s8.bf16 %v1635_v44  ;;  %v2591_v54 = vunpack.c.h.s8.bf16 %v1635_v44  ;;  %v1682_v23 = vld [vmem:[%s4577_s27 + $0xf50] sm:$0xff]  ;;  %v1687_v44 = vld [vmem:[%s4577_s27 + $0xf78] sm:$0xff] }
 0x4e6   : > { %4001 = vmatpush1.bf16.msra.mxu0 %v2490_v46  ;;  %v1602_v46 = vld [vmem:[%s4577_s27 + $0xcd0] sm:$0xff] }
 0x4e7   : > { %4042 = vmatpush1.bf16.msra.mxu1 %v2554_v47  ;;  %4002 = vmatprep.subr.bf16.mxu0 %v2495_v4  ;;  %v1634_v47 = vld [vmem:[%s4577_s27 + $0xdd0] sm:$0xff]  ;;  %v2522_v4 = vunpack.c.l.s8.bf16 %v1602_v46 }
 0x4e8   : > { %4043 = vmatprep.subr.bf16.mxu1 %v2559_v27  ;;  %v3698_v14 = vpop.f32.mrb[40].mxu0  ;;  %v2586_v27 = vunpack.c.l.s8.bf16 %v1634_v47 }
 0x4e9   : > { %v3739_v15 = vpop.f32.mrb[40].mxu1  ;;  %v3699_v55 = vadd.f32 %v3698_v14, %v5508_v28  ;;  %v3700_v56 = vpop.f32.mrb[41].mxu0  ;;  %v2503_v28 = vunpack.c.h.s8.bf16 %v1591_v53  ;;  %v2527_v53 = vunpack.c.h.s8.bf16 %v1603_v43  ;;  %v1606_v14 = vld [vmem:[%s4577_s27 + $0xcf0] sm:$0xff]  ;;  %v1655_v43 = vld [vmem:[%s4577_s27 + $0xe78] sm:$0xff] }
 0x4ea   : > { %v3741_v51 = vpop.f32.mrb[41].mxu1  ;;  %v3701_v52 = vadd.f32 %v3700_v56, %v5510_v9  ;;  %v3702_v17 = vpop.f32.mrb[42].mxu0  ;;  %4003 = vmatpush1.bf16.msra.mxu0 %v2494_v1  ;;  %v1595_v9 = vld [vmem:[%s4577_s27 + $0xc98] sm:$0xff] }
 0x4eb   : > { %v3743_v18 = vpop.f32.mrb[42].mxu1  ;;  %4044 = vmatpush1.bf16.msra.mxu1 %v2558_v5  ;;  %v5550_v2 = vadd.f32 %v3739_v15, %v3699_v55  ;;  %v3703_v6 = vpop.f32.mrb[43].mxu0  ;;  %4004 = vmatprep.subr.bf16.mxu0 %v2499_v40  ;;  %v2507_v39 = vunpack.c.l.s8.bf16 %v1595_v9  ;;  %v2511_v12 = vunpack.c.h.s8.bf16 %v1595_v9  ;;  %v1607_v1 = vld [vmem:[%s4577_s27 + $0xcf8] sm:$0xff]  ;;  %v2526_v40 = vunpack.c.h.s8.bf16 %v1602_v46  ;;  %v1638_v15 = vld [vmem:[%s4577_s27 + $0xdf0] sm:$0xff] }
 0x4ec   : > { %v3744_v29 = vpop.f32.mrb[43].mxu1  ;;  %4045 = vmatprep.subr.bf16.mxu1 %v2563_v35  ;;  %v5552_v13 = vadd.f32 %v3741_v51, %v3701_v52  ;;  %v1639_v5 = vld [vmem:[%s4577_s27 + $0xdf8] sm:$0xff]  ;;  %v2590_v35 = vunpack.c.h.s8.bf16 %v1634_v47  ;;  %v2531_v21 = vunpack.c.l.s8.bf16 %v1607_v1  ;;  %v2530_v55 = vunpack.c.l.s8.bf16 %v1606_v14  ;;  %v1654_v46 = vld [vmem:[%s4577_s27 + $0xe70] sm:$0xff] }
 0x4ed   : > { %v2595_v48 = vunpack.c.l.s8.bf16 %v1639_v5  ;;  %v2594_v56 = vunpack.c.l.s8.bf16 %v1638_v15  ;;  %v2535_v51 = vunpack.c.h.s8.bf16 %v1607_v1  ;;  %v2599_v52 = vunpack.c.h.s8.bf16 %v1639_v5  ;;  %v1643_v17 = vld [vmem:[%s4577_s27 + $0xe18] sm:$0xff]  ;;  %v1686_v47 = vld [vmem:[%s4577_s27 + $0xf70] sm:$0xff] }
 0x4ee   : > { %4005 = vmatpush1.bf16.msra.mxu0 %v2498_v3  ;;  %v1675_v18 = vld [vmem:[%s4577_s27 + $0xf18] sm:$0xff]  ;;  %v2534_v3 = vunpack.c.h.s8.bf16 %v1606_v14  ;;  %v2603_v6 = vunpack.c.l.s8.bf16 %v1643_v17 }
 0x4ef   : > { %4046 = vmatpush1.bf16.msra.mxu1 %v2562_v26  ;;  %4006 = vmatprep.subr.bf16.mxu0 %v2503_v28  ;;  %v2598_v26 = vunpack.c.h.s8.bf16 %v1638_v15  ;;  %v2667_v29 = vunpack.c.l.s8.bf16 %v1675_v18  ;;  %v1642_v28 = vld [vmem:[%s4577_s27 + $0xe10] sm:$0xff] }
 0x4f0   : > { %4047 = vmatprep.subr.bf16.mxu1 %v2567_v37  ;;  %v1674_v37 = vld [vmem:[%s4577_s27 + $0xf10] sm:$0xff]  ;;  %v2602_v9 = vunpack.c.l.s8.bf16 %v1642_v28  ;;  %v2606_v63 = vunpack.c.h.s8.bf16 %v1642_v28 }
 0x4f1   : > { %v2666_v7 = vunpack.c.l.s8.bf16 %v1674_v37  ;;  %v2670_v0 = vunpack.c.h.s8.bf16 %v1674_v37 }
 0x4f2   : > { %4007 = vmatpush1.bf16.msra.mxu0 %v2502_v16  ;;  %v2607_v16 = vunpack.c.h.s8.bf16 %v1643_v17  ;;  %v2630_v17 = vunpack.c.h.s8.bf16 %v1654_v46 }
 0x4f3   : > { %4048 = vmatpush1.bf16.msra.mxu1 %v2566_v38  ;;  %4008 = vmatprep.subr.bf16.mxu0 %v2507_v39  ;;  %v2671_v38 = vunpack.c.h.s8.bf16 %v1675_v18  ;;  %v1647_v39 = vld [vmem:[%s4577_s27 + $0xe38] sm:$0xff]  ;;  %v2694_v18 = vunpack.c.h.s8.bf16 %v1686_v47 }
 0x4f4   : > { %4049 = vmatprep.subr.bf16.mxu1 %v2571_v41  ;;  %v1679_v41 = vld [vmem:[%s4577_s27 + $0xf38] sm:$0xff]  ;;  %v2615_v61 = vunpack.c.h.s8.bf16 %v1647_v39 }
 0x4f5   : > { %v2679_v20 = vunpack.c.h.s8.bf16 %v1679_v41 }
 0x4f6   : > { %4009 = vmatpush1.bf16.msra.mxu0 %v2506_v59  ;;  %v2611_v59 = vunpack.c.l.s8.bf16 %v1647_v39 }
 0x4f7   : > { %4050 = vmatpush1.bf16.msra.mxu1 %v2570_v60  ;;  %4010 = vmatprep.subr.bf16.mxu0 %v2511_v12  ;;  %v2675_v60 = vunpack.c.l.s8.bf16 %v1679_v41  ;;  %v1646_v12 = vld [vmem:[%s4577_s27 + $0xe30] sm:$0xff] }
 0x4f8   : > { %4051 = vmatprep.subr.bf16.mxu1 %v2575_v19  ;;  %v1678_v19 = vld [vmem:[%s4577_s27 + $0xf30] sm:$0xff] }
 0x4fa   : > { %4011 = vmatpush1.bf16.msra.mxu0 %v2510_v24  ;;  %v1651_v24 = vld [vmem:[%s4577_s27 + $0xe58] sm:$0xff] }
 0x4fb   : > { %4052 = vmatpush1.bf16.msra.mxu1 %v2574_v42  ;;  %4012 = vmatprep.subr.bf16.mxu0 %v2515_v30  ;;  %v1683_v42 = vld [vmem:[%s4577_s27 + $0xf58] sm:$0xff]  ;;  %v2614_v30 = vunpack.c.h.s8.bf16 %v1646_v12 }
 0x4fc   : > { %4053 = vmatprep.subr.bf16.mxu1 %v2579_v31  ;;  %v2678_v31 = vunpack.c.h.s8.bf16 %v1678_v19 }
 0x4fe   : > { %4013 = vmatpush1.bf16.msra.mxu0 %v2514_v58  ;;  %v2618_v58 = vunpack.c.l.s8.bf16 %v1650_v49 }
 0x4ff   : > { %4054 = vmatpush1.bf16.msra.mxu1 %v2578_v10  ;;  %4014 = vmatprep.subr.bf16.mxu0 %v2519_v22  ;;  %v2682_v10 = vunpack.c.l.s8.bf16 %v1682_v23  ;;  %v2623_v22 = vunpack.c.h.s8.bf16 %v1651_v24 }
 0x500   : > { %4055 = vmatprep.subr.bf16.mxu1 %v2583_v11  ;;  %v2687_v11 = vunpack.c.h.s8.bf16 %v1683_v42 }
 0x502   : > { %4015 = vmatpush1.bf16.msra.mxu0 %v2518_v33  ;;  %v2622_v33 = vunpack.c.h.s8.bf16 %v1650_v49 }
 0x503   : > { %4056 = vmatpush1.bf16.msra.mxu1 %v2582_v34  ;;  %4016 = vmatprep.subr.bf16.mxu0 %v2523_v62  ;;  %v2686_v34 = vunpack.c.h.s8.bf16 %v1682_v23  ;;  %v2627_v62 = vunpack.c.l.s8.bf16 %v1655_v43 }
 0x504   : > { %4057 = vmatprep.subr.bf16.mxu1 %v2587_v36  ;;  %v2691_v36 = vunpack.c.l.s8.bf16 %v1687_v44 }
 0x506   : > { %4017 = vmatpush1.bf16.msra.mxu0 %v2522_v4 }
 0x507   : > { %4058 = vmatpush1.bf16.msra.mxu1 %v2586_v27  ;;  %4018 = vmatprep.subr.bf16.mxu0 %v2527_v53 }
 0x508   : > { %4059 = vmatprep.subr.bf16.mxu1 %v2591_v54 }
 0x50a   : > { %4019 = vmatpush1.bf16.msra.mxu0 %v2526_v40 }
 0x50b   : > { %4060 = vmatpush1.bf16.msra.mxu1 %v2590_v35  ;;  %4020 = vmatprep.subr.bf16.mxu0 %v2531_v21  ;;  %v2626_v21 = vunpack.c.l.s8.bf16 %v1654_v46 }
 0x50c   : > { %4061 = vmatprep.subr.bf16.mxu1 %v2595_v48  ;;  %v2690_v48 = vunpack.c.l.s8.bf16 %v1686_v47 }
 0x50e   : > { %4021 = vmatpush1.bf16.msra.mxu0 %v2530_v55 }
 0x50f   : > { %4062 = vmatpush1.bf16.msra.mxu1 %v2594_v56  ;;  %4022 = vmatprep.subr.bf16.mxu0 %v2535_v51  ;;  %v2695_v56 = vunpack.c.h.s8.bf16 %v1687_v44 }
 0x510   : > { %4063 = vmatprep.subr.bf16.mxu1 %v2599_v52  ;;  %v1691_v52 = vld [vmem:[%s4577_s27 + $0xf98] sm:$0xff] }
 0x512   : > { %4023 = vmatpush1.bf16.msra.mxu0 %v2534_v3 }
 0x513   : > { %4064 = vmatpush1.bf16.msra.mxu1 %v2598_v26  ;;  %4074 = vmatprep.subr.bf16.mxu0 %v2603_v6  ;;  %v2699_v26 = vunpack.c.l.s8.bf16 %v1691_v52  ;;  %v1658_v6 = vld [vmem:[%s4577_s27 + $0xe90] sm:$0xff] }
 0x514   : > { %4115 = vmatprep.subr.bf16.mxu1 %v2667_v29  ;;  %v1690_v29 = vld [vmem:[%s4577_s27 + $0xf90] sm:$0xff]  ;;  %v2634_v28 = vunpack.c.l.s8.bf16 %v1658_v6  ;;  %v2638_v39 = vunpack.c.h.s8.bf16 %v1658_v6 }
 0x515   : > { %4025 = vmatmul.mubr.bf16.vlgmr.msra.gmra.mrb[56].mxu0 %v5216_v32  ;;  %v2610_v32 = vunpack.c.l.s8.bf16 %v1646_v12  ;;  %v2698_v37 = vunpack.c.l.s8.bf16 %v1690_v29  ;;  %v2702_v41 = vunpack.c.h.s8.bf16 %v1690_v29 }
 0x516   : > { %4066 = vmatmul.mubr.bf16.vlgmr.msra.gmra.mrb[56].mxu1 %v5220_v50  ;;  %4075 = vmatpush1.bf16.msra.mxu0 %v2602_v9  ;;  %v2674_v50 = vunpack.c.l.s8.bf16 %v1678_v19 }
 0x517   : > { %4116 = vmatpush1.bf16.msra.mxu1 %v2666_v7  ;;  %4076 = vmatprep.subr.bf16.mxu0 %v2607_v16  ;;  %v2703_v7 = vunpack.c.h.s8.bf16 %v1691_v52  ;;  %v1663_v16 = vld [vmem:[%s4577_s27 + $0xeb8] sm:$0xff] }
 0x518   : > { %4117 = vmatprep.subr.bf16.mxu1 %v2671_v38  ;;  %4106 = vmatprep.mubr.bf16.mxu0 %v5232_v25  ;;  %v2619_v25 = vunpack.c.l.s8.bf16 %v1651_v24  ;;  %v1695_v38 = vld [vmem:[%s4577_s27 + $0xfb8] sm:$0xff] }
 0x519   : > { %4147 = vmatprep.mubr.bf16.mxu1 %v5236_v45  ;;  %v2683_v45 = vunpack.c.l.s8.bf16 %v1683_v42 }
 0x51a   : > { %4077 = vmatpush1.bf16.msra.mxu0 %v2606_v63  ;;  %v2643_v63 = vunpack.c.l.s8.bf16 %v1663_v16 }
 0x51b   : > { %4118 = vmatpush1.bf16.msra.mxu1 %v2670_v0  ;;  %4078 = vmatprep.subr.bf16.mxu0 %v2611_v59  ;;  %v2707_v0 = vunpack.c.l.s8.bf16 %v1695_v38  ;;  %v1662_v59 = vld [vmem:[%s4577_s27 + $0xeb0] sm:$0xff] }
 0x51c   : > { %4119 = vmatprep.subr.bf16.mxu1 %v2675_v60  ;;  %v1694_v60 = vld [vmem:[%s4577_s27 + $0xfb0] sm:$0xff]  ;;  %v2642_v12 = vunpack.c.l.s8.bf16 %v1662_v59  ;;  %v2646_v24 = vunpack.c.h.s8.bf16 %v1662_v59 }
 0x51d   : > { %v2706_v19 = vunpack.c.l.s8.bf16 %v1694_v60  ;;  %v2710_v42 = vunpack.c.h.s8.bf16 %v1694_v60 }
 0x51e   : > { %4079 = vmatpush1.bf16.msra.mxu0 %v2610_v32  ;;  %v2647_v32 = vunpack.c.h.s8.bf16 %v1663_v16 }
 0x51f   : > { %4120 = vmatpush1.bf16.msra.mxu1 %v2674_v50  ;;  %4080 = vmatprep.subr.bf16.mxu0 %v2615_v61  ;;  %v2711_v50 = vunpack.c.h.s8.bf16 %v1695_v38  ;;  %v1667_v61 = vld [vmem:[%s4577_s27 + $0xed8] sm:$0xff] }
 0x520   : > { %4121 = vmatprep.subr.bf16.mxu1 %v2679_v20  ;;  %v1699_v20 = vld [vmem:[%s4577_s27 + $0xfd8] sm:$0xff] }
 0x522   : > { %4081 = vmatpush1.bf16.msra.mxu0 %v2614_v30  ;;  %v2651_v30 = vunpack.c.l.s8.bf16 %v1667_v61 }
 0x523   : > { %4122 = vmatpush1.bf16.msra.mxu1 %v2678_v31  ;;  %4082 = vmatprep.subr.bf16.mxu0 %v2619_v25  ;;  %v2715_v31 = vunpack.c.l.s8.bf16 %v1699_v20  ;;  %v1666_v25 = vld [vmem:[%s4577_s27 + $0xed0] sm:$0xff] }
 0x524   : > { %4123 = vmatprep.subr.bf16.mxu1 %v2683_v45  ;;  %v1698_v45 = vld [vmem:[%s4577_s27 + $0xfd0] sm:$0xff]  ;;  %v2650_v49 = vunpack.c.l.s8.bf16 %v1666_v25 }
 0x525   : > { %v2714_v23 = vunpack.c.l.s8.bf16 %v1698_v45  ;;  %v2718_v44 = vunpack.c.h.s8.bf16 %v1698_v45 }
 0x526   : > { %4083 = vmatpush1.bf16.msra.mxu0 %v2618_v58  ;;  %v2655_v58 = vunpack.c.h.s8.bf16 %v1667_v61 }
 0x527   : > { %4124 = vmatpush1.bf16.msra.mxu1 %v2682_v10  ;;  %4084 = vmatprep.subr.bf16.mxu0 %v2623_v22  ;;  %v2719_v10 = vunpack.c.h.s8.bf16 %v1699_v20  ;;  %v1671_v22 = vld [vmem:[%s4577_s27 + $0xef8] sm:$0xff] }
 0x528   : > { %4125 = vmatprep.subr.bf16.mxu1 %v2687_v11  ;;  %v3780_v4 = vpop.f32.mrb[44].mxu0  ;;  %v1703_v11 = vld [vmem:[%s4577_s27 + $0xff8] sm:$0xff] }
 0x529   : > { %v3821_v27 = vpop.f32.mrb[44].mxu1  ;;  %v3781_v53 = vadd.f32 %v3780_v4, %v5550_v2  ;;  %v3782_v54 = vpop.f32.mrb[45].mxu0  ;;  %v2631_v2 = vunpack.c.h.s8.bf16 %v1655_v43  ;;  %v2654_v43 = vunpack.c.h.s8.bf16 %v1666_v25  ;;  %v2663_v4 = vunpack.c.h.s8.bf16 %v1671_v22 }
 0x52a   : > { %v3823_v1 = vpop.f32.mrb[45].mxu1  ;;  %v3783_v5 = vadd.f32 %v3782_v54, %v5552_v13  ;;  %v3784_v40 = vpop.f32.mrb[46].mxu0  ;;  %4085 = vmatpush1.bf16.msra.mxu0 %v2622_v33  ;;  %v1659_v13 = vld [vmem:[%s4577_s27 + $0xe98] sm:$0xff]  ;;  %v2659_v33 = vunpack.c.l.s8.bf16 %v1671_v22 }
 0x52b   : > { %v3825_v35 = vpop.f32.mrb[46].mxu1  ;;  %4126 = vmatpush1.bf16.msra.mxu1 %v2686_v34  ;;  %v5592_v14 = vadd.f32 %v3821_v27, %v3781_v53  ;;  %v3785_v15 = vpop.f32.mrb[47].mxu0  ;;  %4086 = vmatprep.subr.bf16.mxu0 %v2627_v62  ;;  %v2635_v3 = vunpack.c.l.s8.bf16 %v1659_v13  ;;  %v2639_v9 = vunpack.c.h.s8.bf16 %v1659_v13  ;;  %v2723_v34 = vunpack.c.l.s8.bf16 %v1703_v11  ;;  %v1670_v62 = vld [vmem:[%s4577_s27 + $0xef0] sm:$0xff] }
 0x52c   : > { %v3826_v55 = vpop.f32.mrb[47].mxu1  ;;  %4127 = vmatprep.subr.bf16.mxu1 %v2691_v36  ;;  %v5594_v51 = vadd.f32 %v3823_v1, %v3783_v5  ;;  %v1702_v36 = vld [vmem:[%s4577_s27 + $0xff0] sm:$0xff]  ;;  %v2658_v46 = vunpack.c.l.s8.bf16 %v1670_v62  ;;  %v2727_v27 = vunpack.c.h.s8.bf16 %v1703_v11  ;;  %v2662_v53 = vunpack.c.h.s8.bf16 %v1670_v62 }
 0x52d   : > { %v2722_v47 = vunpack.c.l.s8.bf16 %v1702_v36  ;;  %v2726_v54 = vunpack.c.h.s8.bf16 %v1702_v36 }
 0x52e   : > { %4087 = vmatpush1.bf16.msra.mxu0 %v2626_v21 }
 0x52f   : > { %4128 = vmatpush1.bf16.msra.mxu1 %v2690_v48  ;;  %4088 = vmatprep.subr.bf16.mxu0 %v2631_v2 }
 0x530   : > { %4129 = vmatprep.subr.bf16.mxu1 %v2695_v56 }
 0x532   : > { %4089 = vmatpush1.bf16.msra.mxu0 %v2630_v17 }
 0x533   : > { %4130 = vmatpush1.bf16.msra.mxu1 %v2694_v18  ;;  %4090 = vmatprep.subr.bf16.mxu0 %v2635_v3 }
 0x534   : > { %4131 = vmatprep.subr.bf16.mxu1 %v2699_v26 }
 0x536   : > { %4091 = vmatpush1.bf16.msra.mxu0 %v2634_v28 }
 0x537   : > { %4132 = vmatpush1.bf16.msra.mxu1 %v2698_v37  ;;  %4092 = vmatprep.subr.bf16.mxu0 %v2639_v9 }
 0x538   : > { %4133 = vmatprep.subr.bf16.mxu1 %v2703_v7 }
 0x53a   : > { %4093 = vmatpush1.bf16.msra.mxu0 %v2638_v39 }
 0x53b   : > { %4134 = vmatpush1.bf16.msra.mxu1 %v2702_v41  ;;  %4094 = vmatprep.subr.bf16.mxu0 %v2643_v63 }
 0x53c   : > { %4135 = vmatprep.subr.bf16.mxu1 %v2707_v0 }
 0x53e   : > { %4095 = vmatpush1.bf16.msra.mxu0 %v2642_v12 }
 0x53f   : > { %4136 = vmatpush1.bf16.msra.mxu1 %v2706_v19  ;;  %4096 = vmatprep.subr.bf16.mxu0 %v2647_v32 }
 0x540   : > { %4137 = vmatprep.subr.bf16.mxu1 %v2711_v50 }
 0x542   : > { %4097 = vmatpush1.bf16.msra.mxu0 %v2646_v24 }
 0x543   : > { %4138 = vmatpush1.bf16.msra.mxu1 %v2710_v42  ;;  %4098 = vmatprep.subr.bf16.mxu0 %v2651_v30  ;;  %v2730_v42 = vld [vmem:[#allocation3 + $0x10] sm:$0xff] }
 0x544   : > { %4139 = vmatprep.subr.bf16.mxu1 %v2715_v31 }
 0x546   : > { %4099 = vmatpush1.bf16.msra.mxu0 %v2650_v49  ;;  %v2731_v49 = vld [vmem:[#allocation3 + $0x18] sm:$0xff] }
 0x547   : > { %4140 = vmatpush1.bf16.msra.mxu1 %v2714_v23  ;;  %4100 = vmatprep.subr.bf16.mxu0 %v2655_v58 }
 0x548   : > { %4141 = vmatprep.subr.bf16.mxu1 %v2719_v10 }
 0x54a   : > { %4101 = vmatpush1.bf16.msra.mxu0 %v2654_v43  ;;  %v4174_v43 = vlaneseq (!%p4384_p5) }
 0x54b   : > { %4142 = vmatpush1.bf16.msra.mxu1 %v2718_v44  ;;  %4102 = vmatprep.subr.bf16.mxu0 %v2659_v33  ;;  %v4172_v33 = vld [vmem:[%s5642_s4] sm:$0xf] (!%p4384_p5) }
 0x54c   : > { %4143 = vmatprep.subr.bf16.mxu1 %v2723_v34  ;;  %v4175_v44 = vshrl.u32 (!%p4384_p5), %v4174_v43, 7  ;;  %v4198_v34 = vld [vmem:[%s5643_s5] sm:$0xf] (!%p4384_p5) }
 0x54e   : > { %4103 = vmatpush1.bf16.msra.mxu0 %v2658_v46  ;;  %v4176_v62 = vsub.s32 (!%p4384_p5), 0, %v4175_v44  ;;  %v4180_v36 = vsub.s32 (!%p4384_p5), 1, %v4175_v44  ;;  %v4184_v46 = vsub.s32 (!%p4384_p5), 2, %v4175_v44 }
 0x54f   : > { %4144 = vmatpush1.bf16.msra.mxu1 %v2722_v47  ;;  %4104 = vmatprep.subr.bf16.mxu0 %v2663_v4  ;;  %v4188_v47 = vsub.s32 (!%p4384_p5), 3, %v4175_v44  ;;  %v4168_v4 = vld [vmem:[#allocation3] sm:$0xff] (!%p4384_p5) }
 0x550   : > { %4145 = vmatprep.subr.bf16.mxu1 %v2727_v27  ;;  %v4169_v27 = vld [vmem:[#allocation3 + $0x8] sm:$0xff] (!%p4384_p5) }
 0x552   : > { %4105 = vmatpush1.bf16.msra.mxu0 %v2662_v53  ;;  %v4177_v53 = vrot.slane (!%p4384_p5), %v4172_v33, %v4176_v62 }
 0x553   : > { %4146 = vmatpush1.bf16.msra.mxu1 %v2726_v54  ;;  %v4203_v54 = vrot.slane (!%p4384_p5), %v4198_v34, %v4176_v62 }
 0x555   : > { %4107 = vmatmul.mubr.bf16.vlgmr.msra.gmra.mrb[60].mxu0 %v5280_v8 }
 0x556   : > { %4148 = vmatmul.mubr.bf16.vlgmr.msra.gmra.mrb[60].mxu1 %v5284_v57 }
 0x568   : > { %v3862_v1 = vpop.f32.mrb[48].mxu0 }
 0x569   : > { %v3903_v5 = vpop.f32.mrb[48].mxu1  ;;  %v3863_v40 = vadd.f32 %v3862_v1, %v5592_v14  ;;  %v3864_v35 = vpop.f32.mrb[49].mxu0  ;;  %v4181_v1 = vrot.slane (!%p4384_p5), %v4172_v33, %v4180_v36 }
 0x56a   : > { %v3905_v21 = vpop.f32.mrb[49].mxu1  ;;  %v3865_v48 = vadd.f32 %v3864_v35, %v5594_v51  ;;  %v3866_v15 = vpop.f32.mrb[50].mxu0 }
 0x56b   : > { %v3907_v55 = vpop.f32.mrb[50].mxu1  ;;  %v3904_v2 = vadd.f32 %v3903_v5, %v3863_v40  ;;  %v3867_v56 = vpop.f32.mrb[51].mxu0  ;;  %v4207_v5 = vrot.slane (!%p4384_p5), %v4198_v34, %v4180_v36  ;;  %v4189_v15 = vrot.slane (!%p4384_p5), %v4172_v33, %v4188_v47 }
 0x56c   : > { %v3908_v13 = vpop.f32.mrb[51].mxu1  ;;  %v3906_v52 = vadd.f32 %v3905_v21, %v3865_v48  ;;  %v4185_v21 = vrot.slane (!%p4384_p5), %v4172_v33, %v4184_v46  ;;  %v4211_v48 = vrot.slane (!%p4384_p5), %v4198_v34, %v4184_v46  ;;  %v4215_v55 = vrot.slane (!%p4384_p5), %v4198_v34, %v4188_v47 }
 0x56d   : > { %v4195_v56 = vmul.f32 (!%p4384_p5), %v4181_v1, %v4169_v27 }
 0x5a8   : > { %v3944_v17 = vpop.f32.mrb[52].mxu0 }
 0x5a9   : > { %v3985_v18 = vpop.f32.mrb[52].mxu1  ;;  %v3945_v3 = vadd.f32 %v3944_v17, %v3904_v2  ;;  %v3946_v8 = vpop.f32.mrb[53].mxu0  ;;  %v4194_v2 = vmul.f32 (!%p4384_p5), %v4177_v53, %v4168_v4 }
 0x5aa   : > { %v3987_v26 = vpop.f32.mrb[53].mxu1  ;;  %v3947_v57 = vadd.f32 %v3946_v8, %v3906_v52  ;;  %v3948_v6 = vpop.f32.mrb[54].mxu0 }
 0x5ab   : > { %v3989_v29 = vpop.f32.mrb[54].mxu1  ;;  %v3986_v28 = vadd.f32 %v3985_v18, %v3945_v3  ;;  %v3949_v14 = vpop.f32.mrb[55].mxu0  ;;  %v4220_v17 = vadd.f32 (!%p4384_p5), %v4203_v54, %v4194_v2  ;;  %v4221_v18 = vadd.f32 (!%p4384_p5), %v4207_v5, %v4195_v56 }
 0x5ac   : > { %v3990_v37 = vpop.f32.mrb[55].mxu1  ;;  %v3988_v9 = vadd.f32 %v3987_v26, %v3947_v57 }
 0x5ad   : > { %vm4224_vm0 = vcmp.ge.f32.partialorder (!%p4384_p5), %v4220_v17, 0.0  ;;  %v4228_v26 = vmul.f32 (!%p4384_p5), 0.2, %v4220_v17  ;;  %vm4225_vm1 = vcmp.ge.f32.partialorder (!%p4384_p5), %v4221_v18, 0.0  ;;  %v4229_v57 = vmul.f32 (!%p4384_p5), 0.2, %v4221_v18 }
 0x5af   : > { %v4233_v14 = vsel (!%p4384_p5), %vm4225_vm1, %v4221_v18, %v4229_v57 }
 0x5b0   : > { %4237 = vst [vmem:[%s5644_s6 + $0x8] sm:$0xff] (!%p4384_p5), %v4233_v14 }
 0x5e8   : > { %v4026_v7 = vpop.f32.mrb[56].mxu0 }
 0x5e9   : > { %v4067_v51 = vpop.f32.mrb[56].mxu1  ;;  %v4027_v16 = vadd.f32 %v4026_v7, %v3986_v28  ;;  %v4028_v38 = vpop.f32.mrb[57].mxu0  ;;  %v4232_v28 = vsel (!%p4384_p5), %vm4224_vm0, %v4220_v17, %v4228_v26 }
 0x5ea   : > { %v4069_v39 = vpop.f32.mrb[57].mxu1  ;;  %v4029_v41 = vadd.f32 %v4028_v38, %v3988_v9  ;;  %v4030_v63 = vpop.f32.mrb[58].mxu0  ;;  %4236 = vst [vmem:[%s5644_s6] sm:$0xff] (!%p4384_p5), %v4232_v28 }
 0x5eb   : > { %v4071_v0 = vpop.f32.mrb[58].mxu1  ;;  %v4068_v59 = vadd.f32 %v4067_v51, %v4027_v16  ;;  %v4031_v60 = vpop.f32.mrb[59].mxu0 }
 0x5ec   : > { %v4072_v12 = vpop.f32.mrb[59].mxu1  ;;  %v4070_v19 = vadd.f32 %v4069_v39, %v4029_v41 }
 0x628   : > { %v4108_v32 = vpop.f32.mrb[60].mxu0 }
 0x629   : > { %v4149_v50 = vpop.f32.mrb[60].mxu1  ;;  %v4109_v61 = vadd.f32 %v4108_v32, %v4068_v59  ;;  %v4110_v20 = vpop.f32.mrb[61].mxu0 }
 0x62a   : > { %v4151_v24 = vpop.f32.mrb[61].mxu1  ;;  %v4111_v30 = vadd.f32 %v4110_v20, %v4070_v19  ;;  %v4112_v31 = vpop.f32.mrb[62].mxu0  ;;  %4167 = sbr.rel (%p4384_p5) target bundleno = 1600 (0x640), region = 52 }
 0x62b   : > { %v4153_v25 = vpop.f32.mrb[62].mxu1  ;;  %v4150_v45 = vadd.f32 %v4149_v50, %v4109_v61  ;;  %v4113_v23 = vpop.f32.mrb[63].mxu0 }
 0x62c   : > { %v4154_v58 = vpop.f32.mrb[63].mxu1  ;;  %v4152_v10 = vadd.f32 %v4151_v24, %v4111_v30 }
 0x62d   : > { %v4158_v22 = vadd.f32 %v4150_v45, %v2730_v42 }
 0x62e   : > { %v4159_v11 = vadd.f32 %v4152_v10, %v2731_v49 }
 0x62f   : > { %4162 = vst [vmem:[#allocation3 + $0x10] sm:$0xff] %v4158_v22 }
 0x630   : > { %4163 = vst [vmem:[#allocation3 + $0x18] sm:$0xff] %v4159_v11 }
 0x636   : > { %v4170_v40 = vld [vmem:[#allocation3 + $0x10] sm:$0xff] }
 0x637   : > { %v4171_v35 = vld [vmem:[#allocation3 + $0x18] sm:$0xff]  ;;  %v4196_v13 = vmul.f32 %v4185_v21, %v4170_v40 }
 0x638   : > { %v4197_v52 = vmul.f32 %v4189_v15, %v4171_v35 }
 0x639   : > { %v4222_v3 = vadd.f32 %v4211_v48, %v4196_v13 }
 0x63a   : > { %v4223_v8 = vadd.f32 %v4215_v55, %v4197_v52 }
 0x63b   : > { %vm4226_vm2 = vcmp.ge.f32.partialorder %v4222_v3, 0.0  ;;  %v4230_v6 = vmul.f32 0.2, %v4222_v3 }
 0x63c   : > { %vm4227_vm3 = vcmp.ge.f32.partialorder %v4223_v8, 0.0  ;;  %v4231_v29 = vmul.f32 0.2, %v4223_v8 }
 0x63d   : > { %v4234_v37 = vsel %vm4226_vm2, %v4222_v3, %v4230_v6 }
 0x63e   : > { %v4235_v9 = vsel %vm4227_vm3, %v4223_v8, %v4231_v29  ;;  %4238 = vst [vmem:[%s5644_s6 + $0x10] sm:$0xff] %v4234_v37 }
 0x63f   : > { %4239 = vst [vmem:[%s5644_s6 + $0x18] sm:$0xff] %v4235_v9 }
 0x640 PF: > { %s16_s21 = sadd.s32 1, %s4524_s21  }
 0x641   : > { %p13_p6 = scmp.ge.s32.totalorder %s16_s21, 4  }
 0x643   :  { %15 = sbr.rel (!%p13_p6) target bundleno = 1 (0x1), region = 79 }

</bundles_post_ra>
